<compile_context>
chip_gen: v7x
topology: tpu7x:2x2x1
jax: 0.10.0
libtpu: 0.0.40
codegen_flags: <defaults>
</compile_context>

<pallas_src>
import jax
import jax.numpy as jnp
from jax.experimental import pallas as pl
from jax.experimental.pallas import tpu as pltpu

# ---- model dims (lane-dense: all feature dims are multiples of 128, except
#      Z_DIM whose *packed* head/output width 2*Z_DIM = 128 is lane-dense) ----
BATCH = 1024        # total users per call (amortizes launch/DMA overhead)
BLOCK_B = 256       # rows per grid step (fills v6e/v7x 256-wide MXU passes)
INPUT_DIM = 256     # ae_structure[0]  (item-vocabulary-like dim)
HIDDEN = 128        # ae_structure[1]
Z_DIM = 64          # latent dim (2*Z_DIM = 128 -> one full lane tile)

# offsets into the packed bias buffer [b_enc | b_heads | b_dec0 | b_dec1]
_B_ENC0, _B_ENC1 = 0, HIDDEN
_B_HEAD0, _B_HEAD1 = _B_ENC1, _B_ENC1 + 2 * Z_DIM
_B_DEC00, _B_DEC01 = _B_HEAD1, _B_HEAD1 + HIDDEN
_B_DEC10, _B_DEC11 = _B_DEC01, _B_DEC01 + INPUT_DIM
_B_TOTAL = _B_DEC11  # 128 + 128 + 128 + 256 = 640 (5 * 128 lanes)


def _vae_kernel(
    x_ref, eps_ref,
    w_enc_ref, w_heads_ref, w_dec0_ref, w_dec1_ref, b_ref,
    out_ref, mulv_ref,
):
    x = x_ref[...]                               # (TB, INPUT_DIM)
    eps = eps_ref[...]                           # (TB, Z_DIM)

    # packed biases -> static, lane-aligned slices (128-column boundaries)
    b_enc = b_ref[:, _B_ENC0:_B_ENC1]            # (1, HIDDEN)
    b_head = b_ref[:, _B_HEAD0:_B_HEAD1]         # (1, 2*Z_DIM)
    b_dec0 = b_ref[:, _B_DEC00:_B_DEC01]         # (1, HIDDEN)
    b_dec1 = b_ref[:, _B_DEC10:_B_DEC11]         # (1, INPUT_DIM)

    # ---- encoder: fc0 + tanh ----
    h = jnp.dot(x, w_enc_ref[...], preferred_element_type=jnp.float32)
    h = jnp.tanh(h + b_enc)                      # (TB, HIDDEN)

    # ---- fused heads: one matmul producing [mu | logvar] ----
    mulv = jnp.dot(h, w_heads_ref[...], preferred_element_type=jnp.float32) + b_head
    mu = mulv[:, :Z_DIM]                         # (TB, Z_DIM)
    logvar = mulv[:, Z_DIM:]                     # (TB, Z_DIM)

    # ---- reparameterize: z = mu + eps * exp(0.5 * logvar) ----
    z = mu + eps * jnp.exp(0.5 * logvar)         # (TB, Z_DIM)

    # ---- decoder: fc0 + tanh, fc1 (no activation) ----
    d = jnp.dot(z, w_dec0_ref[...], preferred_element_type=jnp.float32)
    d = jnp.tanh(d + b_dec0)                     # (TB, HIDDEN)
    logits = jnp.dot(d, w_dec1_ref[...], preferred_element_type=jnp.float32) + b_dec1

    # ---- likelihood == 'mult': softmax over dim=1 (features) ----
    m = jnp.max(logits, axis=1, keepdims=True)
    e = jnp.exp(logits - m)
    denom = jnp.sum(e, axis=1, keepdims=True)
    out_ref[...] = e * pl.reciprocal(denom, approx=True)   # EUP vrcp (free slot)

    # lane-dense packed [mu | logvar] output (split in the wrapper)
    mulv_ref[...] = mulv


def vae_forward(x, eps, params):
    """Fused VAE forward.

    x:   (B, INPUT_DIM) float32, B % BLOCK_B == 0
    eps: (B, Z_DIM)     float32 standard-normal reparameterization noise
    Returns (x_recon, mu, logvar).
    """
    batch = x.shape[0]
    assert batch % BLOCK_B == 0, "batch must be a multiple of BLOCK_B"
    nb = batch // BLOCK_B

    grid_spec = pltpu.PrefetchScalarGridSpec(
        num_scalar_prefetch=0,
        grid=(nb,),
        in_specs=[
            pl.BlockSpec((BLOCK_B, INPUT_DIM), lambda i: (i, 0)),        # x
            pl.BlockSpec((BLOCK_B, Z_DIM), lambda i: (i, 0)),            # eps
            pl.BlockSpec((INPUT_DIM, HIDDEN), lambda i: (0, 0)),         # w_enc
            pl.BlockSpec((HIDDEN, 2 * Z_DIM), lambda i: (0, 0)),         # w_heads
            pl.BlockSpec((Z_DIM, HIDDEN), lambda i: (0, 0)),             # w_dec0
            pl.BlockSpec((HIDDEN, INPUT_DIM), lambda i: (0, 0)),         # w_dec1
            pl.BlockSpec((1, _B_TOTAL), lambda i: (0, 0)),               # packed biases
        ],
        out_specs=(
            pl.BlockSpec((BLOCK_B, INPUT_DIM), lambda i: (i, 0)),        # x_recon
            pl.BlockSpec((BLOCK_B, 2 * Z_DIM), lambda i: (i, 0)),        # [mu|logvar]
        ),
    )

    x_recon, mulv = pl.pallas_call(
        _vae_kernel,
        out_shape=(
            jax.ShapeDtypeStruct((batch, INPUT_DIM), jnp.float32),
            jax.ShapeDtypeStruct((batch, 2 * Z_DIM), jnp.float32),
        ),
        grid_spec=grid_spec,
        compiler_params=pltpu.CompilerParams(
            dimension_semantics=("parallel",),   # shards blocks across v7x's 2 TCs
        ),
    )(
        x, eps,
        params["w_enc"], params["w_heads"], params["w_dec0"], params["w_dec1"],
        params["b_all"],
    )

    mu = mulv[:, :Z_DIM]
    logvar = mulv[:, Z_DIM:]
    return x_recon, mu, logvar


def init_params(key):
    """Deterministic synthetic parameters matching nn.Linear init/shapes.

    Weights stored as (in_features, out_features). mu/logvar head weights are
    fused column-wise; all biases are packed into one (1, 640) buffer.
    """
    ks = jax.random.split(key, 10)

    def lin(kw, kb, fan_in, fan_out):
        bound = 1.0 / jnp.sqrt(jnp.float32(fan_in))
        w = jax.random.uniform(kw, (fan_in, fan_out), jnp.float32, -bound, bound)
        b = jax.random.uniform(kb, (1, fan_out), jnp.float32, -bound, bound)
        return w, b

    w_enc, b_enc = lin(ks[0], ks[1], INPUT_DIM, HIDDEN)      # encoder.fc0
    w_mu, b_mu = lin(ks[2], ks[3], HIDDEN, Z_DIM)            # enc_mu
    w_lv, b_lv = lin(ks[4], ks[5], HIDDEN, Z_DIM)            # enc_logvar
    w_dec0, b_dec0 = lin(ks[6], ks[7], Z_DIM, HIDDEN)        # decoder.fc0 (+act)
    w_dec1, b_dec1 = lin(ks[8], ks[9], HIDDEN, INPUT_DIM)    # decoder.fc1 (no act)

    w_heads = jnp.concatenate([w_mu, w_lv], axis=1)          # (HIDDEN, 2*Z_DIM)
    b_all = jnp.concatenate([b_enc,
                             jnp.concatenate([b_mu, b_lv], axis=1),
                             b_dec0, b_dec1], axis=1)        # (1, 640)

    return dict(w_enc=w_enc, w_heads=w_heads, w_dec0=w_dec0, w_dec1=w_dec1,
                b_all=b_all)


def _reference_forward(x, eps, p):
    """Pure-JAX reference (HIGHEST matmul precision for a fair f32 check)."""
    hp = jax.lax.Precision.HIGHEST
    b = p["b_all"]
    b_enc = b[:, _B_ENC0:_B_ENC1]
    b_head = b[:, _B_HEAD0:_B_HEAD1]
    b_dec0 = b[:, _B_DEC00:_B_DEC01]
    b_dec1 = b[:, _B_DEC10:_B_DEC11]

    h = jnp.tanh(jnp.dot(x, p["w_enc"], precision=hp) + b_enc)
    mulv = jnp.dot(h, p["w_heads"], precision=hp) + b_head
    mu, logvar = mulv[:, :Z_DIM], mulv[:, Z_DIM:]
    z = mu + eps * jnp.exp(0.5 * logvar)
    d = jnp.tanh(jnp.dot(z, p["w_dec0"], precision=hp) + b_dec0)
    logits = jnp.dot(d, p["w_dec1"], precision=hp) + b_dec1
    return jax.nn.softmax(logits, axis=1), mu, logvar


if __name__ == "__main__":
    key = jax.random.PRNGKey(0)
    k_param, k_x, k_eps = jax.random.split(key, 3)

    params = init_params(k_param)
    # Input resembling implicit-feedback user vectors (non-negative).
    x = jax.random.uniform(k_x, (BATCH, INPUT_DIM), jnp.float32, 0.0, 1.0)
    # torch.randn_like has no in-kernel equivalent that is reproducible against
    # a pure-JAX reference, so eps is supplied as a (cheap, per-block) input.
    # TODO(synk): optionally generate eps in-kernel via pltpu.prng_seed +
    # pltpu.prng_random_bits to drop this DMA when exact repro is not needed.
    eps = jax.random.normal(k_eps, (BATCH, Z_DIM), jnp.float32)

    x_recon, mu, logvar = vae_forward(x, eps, params)
    jax.block_until_ready((x_recon, mu, logvar))

    # Sanity check against the pure-JAX reference.
    r_recon, r_mu, r_lv = _reference_forward(x, eps, params)
    assert jnp.allclose(mu, r_mu, atol=1e-4, rtol=1e-4)
    assert jnp.allclose(logvar, r_lv, atol=1e-4, rtol=1e-4)
    # x_recon tolerance relaxed for pl.reciprocal(approx=True).
    assert jnp.allclose(x_recon, r_recon, atol=1e-3, rtol=1e-3)
    # Softmax rows must sum to ~1 (approx reciprocal => slightly looser bound).
    assert jnp.allclose(jnp.sum(x_recon, axis=1), 1.0, atol=2e-3)

    print("KERNEL_OK")
</pallas_src>

<mosaic_0001>
module attributes {stable_mosaic.version = 11 : i64} {
  func.func @_vae_kernel(%arg0: i32, %arg1: memref<256x256xf32, #tpu.memory_space<vmem>>, %arg2: memref<256x64xf32, #tpu.memory_space<vmem>>, %arg3: memref<256x128xf32, #tpu.memory_space<vmem>>, %arg4: memref<128x128xf32, #tpu.memory_space<vmem>>, %arg5: memref<64x128xf32, #tpu.memory_space<vmem>>, %arg6: memref<128x256xf32, #tpu.memory_space<vmem>>, %arg7: memref<1x640xf32, #tpu.memory_space<vmem>>, %arg8: memref<256x256xf32, #tpu.memory_space<vmem>>, %arg9: memref<256x128xf32, #tpu.memory_space<vmem>>) attributes {dimension_semantics = [#tpu.dimension_semantics<parallel>], iteration_bounds = array<i64: 4>, scalar_prefetch = 0 : i64, scratch_operands = 0 : i64, tpu.core_type = #tpu.core_type<tc>, window_params = [{transform_indices = @transform_0, window_bounds = array<i64: 256, 256>}, {transform_indices = @transform_1, window_bounds = array<i64: 256, 64>}, {pipeline_mode = #tpu.pipeline_mode<synchronous>, transform_indices = @transform_2, window_bounds = array<i64: 256, 128>}, {pipeline_mode = #tpu.pipeline_mode<synchronous>, transform_indices = @transform_3, window_bounds = array<i64: 128, 128>}, {pipeline_mode = #tpu.pipeline_mode<synchronous>, transform_indices = @transform_4, window_bounds = array<i64: 64, 128>}, {pipeline_mode = #tpu.pipeline_mode<synchronous>, transform_indices = @transform_5, window_bounds = array<i64: 128, 256>}, {pipeline_mode = #tpu.pipeline_mode<synchronous>, transform_indices = @transform_6, window_bounds = array<i64: 1, 640>}, {transform_indices = @transform_7, window_bounds = array<i64: 256, 256>}, {transform_indices = @transform_8, window_bounds = array<i64: 256, 128>}]} {
    %c0 = arith.constant 0 : index
    %c0_0 = arith.constant 0 : index
    %0 = vector.load %arg1[%c0, %c0_0] : memref<256x256xf32, #tpu.memory_space<vmem>>, vector<256x256xf32>
    %c0_1 = arith.constant 0 : index
    %c0_2 = arith.constant 0 : index
    %1 = vector.load %arg2[%c0_1, %c0_2] : memref<256x64xf32, #tpu.memory_space<vmem>>, vector<256x64xf32>
    %c0_3 = arith.constant 0 : index
    %c0_4 = arith.constant 0 : index
    %2 = vector.load %arg7[%c0_3, %c0_4] : memref<1x640xf32, #tpu.memory_space<vmem>>, vector<1x128xf32>
    %c0_5 = arith.constant 0 : index
    %c128 = arith.constant 128 : index
    %3 = vector.load %arg7[%c0_5, %c128] : memref<1x640xf32, #tpu.memory_space<vmem>>, vector<1x128xf32>
    %c0_6 = arith.constant 0 : index
    %c256 = arith.constant 256 : index
    %4 = vector.load %arg7[%c0_6, %c256] : memref<1x640xf32, #tpu.memory_space<vmem>>, vector<1x128xf32>
    %c0_7 = arith.constant 0 : index
    %c384 = arith.constant 384 : index
    %5 = vector.load %arg7[%c0_7, %c384] : memref<1x640xf32, #tpu.memory_space<vmem>>, vector<1x256xf32>
    %c0_8 = arith.constant 0 : index
    %c0_9 = arith.constant 0 : index
    %6 = vector.load %arg3[%c0_8, %c0_9] : memref<256x128xf32, #tpu.memory_space<vmem>>, vector<256x128xf32>
    %cst = arith.constant dense<0.000000e+00> : vector<256x128xf32>
    %7 = tpu.matmul %0, %6, %cst {dimension_numbers = #tpu.dot_dimension_numbers<[1], [0], [0], [1], [0, 0, 1, 1], [], []>} : vector<256x256xf32>, vector<256x128xf32>, vector<256x128xf32> -> vector<256x128xf32>
    %8 = vector.broadcast %2 : vector<1x128xf32> to vector<256x128xf32>
    %9 = arith.addf %7, %8 : vector<256x128xf32>
    %10 = math.tanh %9 : vector<256x128xf32>
    %c0_10 = arith.constant 0 : index
    %c0_11 = arith.constant 0 : index
    %11 = vector.load %arg4[%c0_10, %c0_11] : memref<128x128xf32, #tpu.memory_space<vmem>>, vector<128x128xf32>
    %cst_12 = arith.constant dense<0.000000e+00> : vector<256x128xf32>
    %12 = tpu.matmul %10, %11, %cst_12 {dimension_numbers = #tpu.dot_dimension_numbers<[1], [0], [0], [1], [0, 0, 1, 1], [], []>} : vector<256x128xf32>, vector<128x128xf32>, vector<256x128xf32> -> vector<256x128xf32>
    %13 = vector.broadcast %3 : vector<1x128xf32> to vector<256x128xf32>
    %14 = arith.addf %12, %13 : vector<256x128xf32>
    %15 = vector.extract_strided_slice %14 {offsets = [0, 0], sizes = [256, 64], strides = [1, 1]} : vector<256x128xf32> to vector<256x64xf32>
    %16 = vector.extract_strided_slice %14 {offsets = [0, 64], sizes = [256, 64], strides = [1, 1]} : vector<256x128xf32> to vector<256x64xf32>
    %cst_13 = arith.constant 5.000000e-01 : f32
    %17 = vector.broadcast %cst_13 : f32 to vector<256x64xf32>
    %18 = arith.mulf %17, %16 : vector<256x64xf32>
    %19 = math.exp %18 : vector<256x64xf32>
    %20 = arith.mulf %1, %19 : vector<256x64xf32>
    %21 = arith.addf %15, %20 : vector<256x64xf32>
    %c0_14 = arith.constant 0 : index
    %c0_15 = arith.constant 0 : index
    %22 = vector.load %arg5[%c0_14, %c0_15] : memref<64x128xf32, #tpu.memory_space<vmem>>, vector<64x128xf32>
    %cst_16 = arith.constant dense<0.000000e+00> : vector<256x128xf32>
    %23 = tpu.matmul %21, %22, %cst_16 {dimension_numbers = #tpu.dot_dimension_numbers<[1], [0], [0], [1], [0, 0, 1, 1], [], []>} : vector<256x64xf32>, vector<64x128xf32>, vector<256x128xf32> -> vector<256x128xf32>
    %24 = vector.broadcast %4 : vector<1x128xf32> to vector<256x128xf32>
    %25 = arith.addf %23, %24 : vector<256x128xf32>
    %26 = math.tanh %25 : vector<256x128xf32>
    %c0_17 = arith.constant 0 : index
    %c0_18 = arith.constant 0 : index
    %27 = vector.load %arg6[%c0_17, %c0_18] : memref<128x256xf32, #tpu.memory_space<vmem>>, vector<128x256xf32>
    %cst_19 = arith.constant dense<0.000000e+00> : vector<256x256xf32>
    %28 = tpu.matmul %26, %27, %cst_19 {dimension_numbers = #tpu.dot_dimension_numbers<[1], [0], [0], [1], [0, 0, 1, 1], [], []>} : vector<256x128xf32>, vector<128x256xf32>, vector<256x256xf32> -> vector<256x256xf32>
    %29 = vector.broadcast %5 : vector<1x256xf32> to vector<256x256xf32>
    %30 = arith.addf %28, %29 : vector<256x256xf32>
    %cst_20 = arith.constant dense<0xFF800000> : vector<256xf32>
    %31 = vector.multi_reduction <maximumf>, %30, %cst_20 [1] : vector<256x256xf32> to vector<256xf32>
    %32 = vector.shape_cast %31 : vector<256xf32> to vector<256x1xf32>
    %33 = vector.broadcast %32 : vector<256x1xf32> to vector<256x256xf32>
    %34 = arith.subf %30, %33 : vector<256x256xf32>
    %35 = math.exp %34 : vector<256x256xf32>
    %cst_21 = arith.constant dense<0.000000e+00> : vector<256xf32>
    %36 = vector.multi_reduction <add>, %35, %cst_21 [1] : vector<256x256xf32> to vector<256xf32>
    %37 = vector.shape_cast %36 : vector<256xf32> to vector<256x1xf32>
    %38 = tpu.reciprocal %37 {approx = true} : vector<256x1xf32> -> vector<256x1xf32>
    %39 = vector.broadcast %38 : vector<256x1xf32> to vector<256x256xf32>
    %40 = arith.mulf %35, %39 : vector<256x256xf32>
    %c0_22 = arith.constant 0 : index
    %c0_23 = arith.constant 0 : index
    %41 = vector.load %arg8[%c0_22, %c0_23] : memref<256x256xf32, #tpu.memory_space<vmem>>, vector<256x256xf32>
    tpu.vector_store %arg8[%c0_22, %c0_23], %40 {strides = array<i32>} : memref<256x256xf32, #tpu.memory_space<vmem>>, vector<256x256xf32>,
    %c0_24 = arith.constant 0 : index
    %c0_25 = arith.constant 0 : index
    %42 = vector.load %arg9[%c0_24, %c0_25] : memref<256x128xf32, #tpu.memory_space<vmem>>, vector<256x128xf32>
    tpu.vector_store %arg9[%c0_24, %c0_25], %14 {strides = array<i32>} : memref<256x128xf32, #tpu.memory_space<vmem>>, vector<256x128xf32>,
    return
  }
  func.func @transform_0(%arg0: i32) -> (i32, i32) {
    %c0_i32 = arith.constant 0 : i32
    %c0_i32_0 = arith.constant 0 : i32
    return %arg0, %c0_i32 : i32, i32
  }
  func.func @transform_1(%arg0: i32) -> (i32, i32) {
    %c0_i32 = arith.constant 0 : i32
    %c0_i32_0 = arith.constant 0 : i32
    return %arg0, %c0_i32 : i32, i32
  }
  func.func @transform_2(%arg0: i32) -> (i32, i32) {
    %c0_i32 = arith.constant 0 : i32
    %c0_i32_0 = arith.constant 0 : i32
    %c0_i32_1 = arith.constant 0 : i32
    return %c0_i32, %c0_i32_0 : i32, i32
  }
  func.func @transform_3(%arg0: i32) -> (i32, i32) {
    %c0_i32 = arith.constant 0 : i32
    %c0_i32_0 = arith.constant 0 : i32
    %c0_i32_1 = arith.constant 0 : i32
    return %c0_i32, %c0_i32_0 : i32, i32
  }
  func.func @transform_4(%arg0: i32) -> (i32, i32) {
    %c0_i32 = arith.constant 0 : i32
    %c0_i32_0 = arith.constant 0 : i32
    %c0_i32_1 = arith.constant 0 : i32
    return %c0_i32, %c0_i32_0 : i32, i32
  }
  func.func @transform_5(%arg0: i32) -> (i32, i32) {
    %c0_i32 = arith.constant 0 : i32
    %c0_i32_0 = arith.constant 0 : i32
    %c0_i32_1 = arith.constant 0 : i32
    return %c0_i32, %c0_i32_0 : i32, i32
  }
  func.func @transform_6(%arg0: i32) -> (i32, i32) {
    %c0_i32 = arith.constant 0 : i32
    %c0_i32_0 = arith.constant 0 : i32
    %c0_i32_1 = arith.constant 0 : i32
    return %c0_i32, %c0_i32_0 : i32, i32
  }
  func.func @transform_7(%arg0: i32) -> (i32, i32) {
    %c0_i32 = arith.constant 0 : i32
    %c0_i32_0 = arith.constant 0 : i32
    return %arg0, %c0_i32 : i32, i32
  }
  func.func @transform_8(%arg0: i32) -> (i32, i32) {
    %c0_i32 = arith.constant 0 : i32
    %c0_i32_0 = arith.constant 0 : i32
    return %arg0, %c0_i32 : i32, i32
  }
}

</mosaic_0001>

<bundles_post_ra>
// kernel: tpu_custom_call.1
= control target key start
LH: loop header
LB: loop body
LE: loop exit
PB: predicated region body
PF: predicated region fallthrough
CT: control target
= control target key end

     0   :  { %14 = vsyncpa [#allocation3], 0  ;;  %s5390_s0 = inlined_call_operand.hbm [shape: f32[1024,256], index: 0, kind: input, shape index: {}]   ;;  %s5391_s1 = inlined_call_operand.vmem [shape: f32[1024,64], index: 1, kind: input, shape index: {}]   ;;  %s5392_s2 = inlined_call_operand.vmem [shape: f32[256,128], index: 2, kind: input, shape index: {}]   ;;  %s5393_s3 = inlined_call_operand.vmem [shape: f32[128,128], index: 3, kind: input, shape index: {}]   ;;  %s5394_s4 = inlined_call_operand.vmem [shape: f32[64,128], index: 4, kind: input, shape index: {}]   ;;  %s5395_s5 = inlined_call_operand.vmem [shape: f32[128,256], index: 5, kind: input, shape index: {}]   ;;  %s5396_s6 = inlined_call_operand.vmem [shape: f32[1,640], index: 6, kind: input, shape index: {}]   ;;  %s5397_s7 = inlined_call_operand.hbm [shape: f32[1024,256], index: 7, kind: output, shape index: {0}]   ;;  %s5398_s8 = inlined_call_operand.hbm [shape: f32[1024,128], index: 8, kind: output, shape index: {1}]  }
   0x1   :  { %16 = vsyncpa [#allocation3 + $0x1], 0 }
   0x2   :  { %17 = vsyncpa [#allocation4], 0 }
   0x3   :  { %19 = vsyncpa [#allocation4 + $0x1], 0 }
   0x4   :  { %20 = vsyncpa [#allocation7], 0 }
   0x5   :  { %22 = vsyncpa [#allocation7 + $0x1], 0  ;;  %s3757_s27 = smov 0   ;;  %s3759_s28 = smov 0  }
   0x6   :  { %s3761_s29 = smov 0   ;;  %s3763_s30 = smov 0  }
   0x7 LB: > { %s3778_s9 = sadd.s32 4294967295, %s3698_s30   ;;  %s2688_s10 = sadd.s32 4294967294, %s3698_s30   ;;  %s3698_s30 = sphi %s3763_s30, %s5473_s30   ;;  %s3694_s29 = sphi %s3761_s29, %s5472_s29   ;;  %s3690_s28 = sphi %s3759_s28, %s5471_s28   ;;  %s3686_s27 = sphi %s3757_s27, %s5470_s27  }
   0x8   : > { %s3782_s11 = sadd.s32 1, %s3698_s30   ;;  %s35_s12 = sadd.s32 1, %s3694_s29 }
   0x9   : > { %s32_s13 = ssub.s32 %s3698_s30, %s3782_s11  ;;  %p42_p0 = scmp.ne.s32.totalorder %s3694_s29, %s3690_s28 }
   0xa   : > { %p33_p1 = scmp.eq.s32.totalorder %s32_s13, 0  ;;  %p43_p2 = scmp.eq.s32.totalorder %s3698_s30, 0 }
   0xb   : > { %p48_p3 = scmp.ne.s32.totalorder %s3690_s28, %s3686_s27  ;;  %p49_p4 = scmp.eq.s32.totalorder %s3778_s9, 0 }
   0xc   : > { %s3794_s14 = scalar_select %p33_p1, %s3694_s29, %s35_s12  }
   0xd   : > { %p3796_p5 = por %p43_p2, %p42_p0  ;;  %p3800_p6 = por %p49_p4, %p48_p3 }
   0xe   : > { %p203_p7 = scmp.eq.s32.totalorder %s3778_s9, 3  ;;  %p209_p8 = scmp.eq.s32.totalorder %s2688_s10, 3 }
   0xf   : > { %p3143_p9 = scmp.lt.s32.totalorder %s3698_s30, 4  ;;  %s270_s19 = sand.u32 1, %s3694_s29  }
  0x10   : > { %p3806_p10 = por %p203_p7, %p42_p0  ;;  %p3810_p11 = por %p209_p8, %p48_p3 }
  0x11   : > { %s2746_s20 = sshll.u32 %s3698_s30, 13  ;;  %s2691_s21 = sshll.u32 %s270_s19, 9 }
  0x12   : > { %s5423_s17 = scalar_select %p3806_p10, 1, 0 }
  0x13   : > { %s5424_s18 = scalar_select %p3810_p11, 1, 0 }
  0x14   : > { %s3819_s24 = scalar_lea.hbm %s5390_s0, %s2746_s20  ;;  %s274_s25 = scalar_lea.vmem [#allocation2], %s2691_s21 }
  0x15   : > { %s282_s26 = sshll.u32 %s274_s25, 4  ;;  %p3823_p12 = pnand %p3143_p9, %p3796_p5  ;;  %s3827_s26 = int_to_ptr.vmem [resolvable:$true] %s282_s26 }
  0x16   : > { %s3829_s12 = scalar_lea.sflag [#allocation3], %s270_s19  ;;  %s3570_s13 = scalar_lea.hbm %s3819_s24, 8192 }
  0x17   : > { %p3571_p13 = scmp.ne.s32.totalorder %s3819_s24, %s3570_s13  ;;  %p3572_p0 = pneg %p3823_p12 }
  0x18   : > { %s3575_s21 = scalar_lea.hbm %s5390_s0, 32768  ;;  %p3576_p3 = scmp.lt.u32.totalorder %s3819_s24, %s5390_s0 }
  0x19   : > { %p3573_p1 = pnand %p3572_p0, %p3571_p13  ;;  %p3577_p4 = scmp.lt.u32.totalorder %s3575_s21, %s3570_s13 }
  0x1a   : > { %p3579_p7 = scmp.lt.u32.totalorder %s3570_s13, %s3819_s24 }
  0x1b   : > { %p3574_p2 = pneg %p3573_p1  ;;  %p3578_p5 = por %p3577_p4, %p3576_p3 }
  0x1d   : > { %p3580_p8 = por %p3579_p7, %p3578_p5 }
  0x1f   : > { %p3581_p9 = pnand %p3580_p8, %p3574_p2 }
  0x21   : > { %3584 = shalt.err (!%p3581_p9)
}
  0x22   : > { %s3585_s19 = scalar_lea.vmem %s3827_s26, 8192  ;;  %s3700_s25 = smov [#allocation2]  }
  0x23   : > { %p3586_p13 = scmp.ne.s32.totalorder %s3827_s26, %s3585_s19  ;;  %s3590_s20 = sshll.u32 %s3700_s25, 4  ;;  %s3591_s20 = int_to_ptr.vmem [resolvable:$false] %s3590_s20 }
  0x24   : > { %s3592_s15 = scalar_lea.vmem %s3591_s20, 16384  ;;  %p3593_p10 = scmp.lt.s32.totalorder %s3827_s26, %s3591_s20 }
  0x25   : > { %p3588_p1 = pnand %p3586_p13, %p3572_p0  ;;  %p3594_p3 = scmp.lt.s32.totalorder %s3592_s15, %s3585_s19 }
  0x27   : > { %p3589_p11 = pneg %p3588_p1  ;;  %p3595_p4 = por %p3594_p3, %p3593_p10 }
  0x29   : > { %p3596_p5 = pnand %p3595_p4, %p3589_p11 }
  0x2b   : > { %3599 = shalt.err (!%p3596_p5)
}
  0x2c   : > { %s3701_s13 = smov 256   ;;  %s3702_s21 = smov 16  }
  0x2d   : > { %3135 = dma.hbm_to_vmem [thread:$0]  (!%p3823_p12), %s3819_s24, 8192, %s3827_s26, %s3829_s12, %s3701_s13, %s3701_s13, %s3702_s21  }
  0x2e   : > { %p2695_p0 = scmp.ge.s32.totalorder %s3698_s30, 1  ;;  %p299_p2 = scmp.lt.s32.totalorder %s3698_s30, 5 }
  0x30   : > { %p300_p7 = pnand %p2695_p0, %p299_p2 }
  0x32   : > { %303 = sbr.rel (%p300_p7) target bundleno = 1606 (0x646), region = 48 }
  0x39   : > { %s3860_s22 = sand.u32 1, %s3690_s28  }
  0x3a   : > { %s2696_s23 = sshll.u32 %s3860_s22, 9  ;;  %s306_s19 = scalar_lea.sflag [#allocation3], %s3860_s22 }
  0x3b   : > { %s3866_s25 = scalar_lea.vmem [#allocation2], %s2696_s23 }
  0x3c   : > { %3673 = dma.done.wait (%p3800_p6), %s306_s19, 8192  }
  0x3d   : > { %3675 = vsyncadd (%p3800_p6), %s306_s19, 4294959104  ;;  %v3703_v0 = vmov 0.0|0.0   ;;  %v461_v1 = vld [vmem:[%s5392_s2] sm:$0xff]  ;;  %v462_v2 = vld [vmem:[%s5392_s2 + $0x8] sm:$0xff]  ;;  %s2698_s26 = sshll.u32 %s3860_s22, 8  ;;  %s3704_s13 = smov 64  }
  0x3e   : > { %2982 = vmatprep.subr.bf16.mxu0 %v3703_v0  ;;  %v463_v3 = vld [vmem:[%s5392_s2 + $0x10] sm:$0xff]  ;;  %v2983_v4 = vpack.c.bf16 %v462_v2, %v461_v1  ;;  %v464_v5 = vld [vmem:[%s5392_s2 + $0x18] sm:$0xff]  ;;  %v465_v7 = vld [vmem:[%s5392_s2 + $0x20] sm:$0xff]  ;;  %s2699_s16 = sshll.u32 %s3778_s9, 5  ;;  %vm1305_vm0 = vcmask 523264   ;;  %s5181_s24 = scalar_lea.vmem [#allocation5], %s2696_s23 }
  0x3f   : > { %v2986_v6 = vpack.c.bf16 %v464_v5, %v463_v3  ;;  %v466_v8 = vld [vmem:[%s5392_s2 + $0x28] sm:$0xff]  ;;  %v467_v10 = vld [vmem:[%s5392_s2 + $0x30] sm:$0xff]  ;;  %v468_v11 = vld [vmem:[%s5392_s2 + $0x38] sm:$0xff]  ;;  %p354_p6 = scmp.lt.s32.totalorder %s2699_s16, 127  ;;  %s2541_s23 = scalar_lea.sflag [#allocation7], %s3860_s22 }
  0x40   : > { %2984 = vmatpush1.bf16.msra.mxu0 %v2983_v4  ;;  %v2989_v9 = vpack.c.bf16 %v466_v8, %v465_v7  ;;  %v362_v12 = vld [vmem:[%s3866_s25 + $0x8] sm:$0xff]  ;;  %v2992_v13 = vpack.c.bf16 %v468_v11, %v467_v10  ;;  %v469_v14 = vld [vmem:[%s5392_s2 + $0x40] sm:$0xff]  ;;  %v471_v17 = vld [vmem:[%s5392_s2 + $0x50] sm:$0xff]  ;;  %p5460_p11 = scmp.ne.s32.totalorder %s5423_s17, 0 }
  0x41   : > { %2985 = vmatprep.subr.bf16.mxu0 %v3703_v0  ;;  %563 = vmatprep.mubr.f32.mxu0 %v362_v12  ;;  %v470_v15 = vld [vmem:[%s5392_s2 + $0x48] sm:$0xff]  ;;  %v472_v18 = vld [vmem:[%s5392_s2 + $0x58] sm:$0xff]  ;;  %v473_v20 = vld [vmem:[%s5392_s2 + $0x60] sm:$0xff]  ;;  %s5475_s16 = smov (!%p354_p6, %s2699_s16), 127 }
  0x42   : > { %v2995_v16 = vpack.c.bf16 %v470_v15, %v469_v14  ;;  %v2998_v19 = vpack.c.bf16 %v472_v18, %v471_v17  ;;  %v474_v21 = vld [vmem:[%s5392_s2 + $0x68] sm:$0xff]  ;;  %v475_v23 = vld [vmem:[%s5392_s2 + $0x70] sm:$0xff]  ;;  %v476_v24 = vld [vmem:[%s5392_s2 + $0x78] sm:$0xff]  ;;  %s2700_s21 = sshll.u32 %s5475_s16, 3 }
  0x43   : > { %v3001_v22 = vpack.c.bf16 %v474_v21, %v473_v20  ;;  %v3004_v25 = vpack.c.bf16 %v476_v24, %v475_v23  ;;  %v477_v26 = vld [vmem:[%s5392_s2 + $0x80] sm:$0xff]  ;;  %v478_v27 = vld [vmem:[%s5392_s2 + $0x88] sm:$0xff]  ;;  %v479_v29 = vld [vmem:[%s5392_s2 + $0x90] sm:$0xff]  ;;  %s4389_s10 = scalar_lea.vmem %s5391_s1, %s2700_s21  ;;  %s2749_s21 = sshll.u32 %s3778_s9, 12 }
  0x44   : > { %2987 = vmatpush1.bf16.msra.mxu0 %v2986_v6  ;;  %v3007_v28 = vpack.c.bf16 %v478_v27, %v477_v26  ;;  %v480_v30 = vld [vmem:[%s5392_s2 + $0x98] sm:$0xff]  ;;  %v481_v32 = vld [vmem:[%s5392_s2 + $0xa0] sm:$0xff]  ;;  %v482_v33 = vld [vmem:[%s5392_s2 + $0xa8] sm:$0xff]  ;;  %s5188_s20 = scalar_lea.hbm %s5398_s8, %s2749_s21 }
  0x45   : > { %2988 = vmatprep.subr.bf16.mxu0 %v3703_v0  ;;  %v3010_v31 = vpack.c.bf16 %v480_v30, %v479_v29  ;;  %v756_v34 = vld [vmem:[%s5393_s3] sm:$0xff]  ;;  %v757_v35 = vld [vmem:[%s5393_s3 + $0x8] sm:$0xff]  ;;  %v3013_v36 = vpack.c.bf16 %v482_v33, %v481_v32  ;;  %v483_v38 = vld [vmem:[%s5392_s2 + $0xb0] sm:$0xff] }
  0x46   : > { %v3030_v37 = vpack.c.bf16 %v757_v35, %v756_v34  ;;  %v484_v39 = vld [vmem:[%s5392_s2 + $0xb8] sm:$0xff]  ;;  %v485_v41 = vld [vmem:[%s5392_s2 + $0xc0] sm:$0xff]  ;;  %v486_v42 = vld [vmem:[%s5392_s2 + $0xc8] sm:$0xff] }
  0x47   : > { %v3016_v40 = vpack.c.bf16 %v484_v39, %v483_v38  ;;  %v3019_v43 = vpack.c.bf16 %v486_v42, %v485_v41  ;;  %v487_v44 = vld [vmem:[%s5392_s2 + $0xd0] sm:$0xff]  ;;  %v488_v45 = vld [vmem:[%s5392_s2 + $0xd8] sm:$0xff]  ;;  %v489_v47 = vld [vmem:[%s5392_s2 + $0xe0] sm:$0xff] }
  0x48   : > { %2990 = vmatpush1.bf16.msra.mxu0 %v2989_v9  ;;  %3110 = vmatprep.subr.bf16.mxu1 %v3030_v37  ;;  %v3022_v46 = vpack.c.bf16 %v488_v45, %v487_v44  ;;  %v490_v48 = vld [vmem:[%s5392_s2 + $0xe8] sm:$0xff]  ;;  %v758_v49 = vld [vmem:[%s5393_s3 + $0x10] sm:$0xff]  ;;  %v759_v50 = vld [vmem:[%s5393_s3 + $0x18] sm:$0xff] }
  0x49   : > { %2991 = vmatprep.subr.bf16.mxu0 %v3703_v0  ;;  %3118 = vmatpush3.bf16.msra.mxu1 %v3030_v37  ;;  %v3025_v51 = vpack.c.bf16 %v490_v48, %v489_v47  ;;  %v3034_v52 = vpack.c.bf16 %v759_v50, %v758_v49  ;;  %v491_v53 = vld [vmem:[%s5392_s2 + $0xf0] sm:$0xff]  ;;  %v492_v54 = vld [vmem:[%s5392_s2 + $0xf8] sm:$0xff]  ;;  %v760_v56 = vld [vmem:[%s5393_s3 + $0x20] sm:$0xff] }
  0x4a   : > { %v3028_v55 = vpack.c.bf16 %v492_v54, %v491_v53  ;;  %v761_v57 = vld [vmem:[%s5393_s3 + $0x28] sm:$0xff]  ;;  %v361_v58 = vld [vmem:[%s3866_s25] sm:$0xff]  ;;  %v762_v60 = vld [vmem:[%s5393_s3 + $0x30] sm:$0xff] }
  0x4b   : > { %3111 = vmatprep.subr.bf16.mxu1 %v3034_v52  ;;  %v3038_v59 = vpack.c.bf16 %v761_v57, %v760_v56  ;;  %v763_v61 = vld [vmem:[%s5393_s3 + $0x38] sm:$0xff]  ;;  %v764_v1 = vld [vmem:[%s5393_s3 + $0x40] sm:$0xff]  ;;  %v765_v2 = vld [vmem:[%s5393_s3 + $0x48] sm:$0xff] }
  0x4c   : > { %2993 = vmatpush1.bf16.msra.mxu0 %v2992_v13  ;;  %v364_v62 = vld [vmem:[%s3866_s25 + $0x18] sm:$0xff]  ;;  %v3042_v63 = vpack.c.bf16 %v763_v61, %v762_v60  ;;  %v366_v3 = vld [vmem:[%s3866_s25 + $0x28] sm:$0xff]  ;;  %v3046_v4 = vpack.c.bf16 %v765_v2, %v764_v1  ;;  %v365_v5 = vld [vmem:[%s3866_s25 + $0x20] sm:$0xff] }
  0x4d   : > { %2994 = vmatprep.subr.bf16.mxu0 %v3703_v0  ;;  %3119 = vmatpush3.bf16.msra.mxu1 %v3034_v52  ;;  %v766_v6 = vld [vmem:[%s5393_s3 + $0x50] sm:$0xff]  ;;  %v767_v7 = vld [vmem:[%s5393_s3 + $0x58] sm:$0xff]  ;;  %v768_v11 = vld [vmem:[%s5393_s3 + $0x60] sm:$0xff] }
  0x4e   : > { %3112 = vmatprep.subr.bf16.mxu1 %v3038_v59  ;;  %v368_v8 = vld [vmem:[%s3866_s25 + $0x38] sm:$0xff]  ;;  %v3050_v9 = vpack.c.bf16 %v767_v7, %v766_v6  ;;  %v367_v10 = vld [vmem:[%s3866_s25 + $0x30] sm:$0xff]  ;;  %v769_v12 = vld [vmem:[%s5393_s3 + $0x68] sm:$0xff] }
  0x4f   : > { %v370_v13 = vld [vmem:[%s3866_s25 + $0x48] sm:$0xff]  ;;  %v3054_v14 = vpack.c.bf16 %v769_v12, %v768_v11  ;;  %v369_v15 = vld [vmem:[%s3866_s25 + $0x40] sm:$0xff]  ;;  %v371_v17 = vld [vmem:[%s3866_s25 + $0x50] sm:$0xff] }
  0x50   : > { %2996 = vmatpush1.bf16.msra.mxu0 %v2995_v16  ;;  %v372_v16 = vld [vmem:[%s3866_s25 + $0x58] sm:$0xff]  ;;  %v374_v18 = vld [vmem:[%s3866_s25 + $0x68] sm:$0xff]  ;;  %v375_v21 = vld [vmem:[%s3866_s25 + $0x70] sm:$0xff] }
  0x51   : > { %2997 = vmatprep.subr.bf16.mxu0 %v3703_v0  ;;  %3120 = vmatpush3.bf16.msra.mxu1 %v3038_v59  ;;  %v376_v20 = vld [vmem:[%s3866_s25 + $0x78] sm:$0xff]  ;;  %v377_v23 = vld [vmem:[%s3866_s25 + $0x80] sm:$0xff]  ;;  %v382_v26 = vld [vmem:[%s3866_s25 + $0xa8] sm:$0xff] }
  0x52   : > { %3113 = vmatprep.subr.bf16.mxu1 %v3042_v63  ;;  %v380_v24 = vld [vmem:[%s3866_s25 + $0x98] sm:$0xff]  ;;  %v381_v27 = vld [vmem:[%s3866_s25 + $0xa0] sm:$0xff]  ;;  %v383_v29 = vld [vmem:[%s3866_s25 + $0xb0] sm:$0xff] }
  0x53   : > { %v386_v30 = vld [vmem:[%s3866_s25 + $0xc8] sm:$0xff]  ;;  %v388_v32 = vld [vmem:[%s3866_s25 + $0xd8] sm:$0xff]  ;;  %v387_v33 = vld [vmem:[%s3866_s25 + $0xd0] sm:$0xff] }
  0x54   : > { %2999 = vmatpush1.bf16.msra.mxu0 %v2998_v19  ;;  %v373_v19 = vld [vmem:[%s3866_s25 + $0x60] sm:$0xff]  ;;  %v390_v34 = vld [vmem:[%s3866_s25 + $0xe8] sm:$0xff]  ;;  %v395_v41 = vld [vmem:[%s3866_s25 + $0x110] sm:$0xff] }
  0x55   : > { %3000 = vmatprep.subr.bf16.mxu0 %v3703_v0  ;;  %3121 = vmatpush3.bf16.msra.mxu1 %v3042_v63  ;;  %v389_v35 = vld [vmem:[%s3866_s25 + $0xe0] sm:$0xff]  ;;  %v394_v38 = vld [vmem:[%s3866_s25 + $0x108] sm:$0xff]  ;;  %v400_v44 = vld [vmem:[%s3866_s25 + $0x138] sm:$0xff] }
  0x56   : > { %3114 = vmatprep.subr.bf16.mxu1 %v3046_v4  ;;  %v393_v39 = vld [vmem:[%s3866_s25 + $0x100] sm:$0xff]  ;;  %v398_v42 = vld [vmem:[%s3866_s25 + $0x128] sm:$0xff]  ;;  %v399_v45 = vld [vmem:[%s3866_s25 + $0x130] sm:$0xff] }
  0x57   : > { %v401_v47 = vld [vmem:[%s3866_s25 + $0x140] sm:$0xff]  ;;  %v404_v48 = vld [vmem:[%s3866_s25 + $0x158] sm:$0xff]  ;;  %v403_v49 = vld [vmem:[%s3866_s25 + $0x150] sm:$0xff] }
  0x58   : > { %3002 = vmatpush1.bf16.msra.mxu0 %v3001_v22  ;;  %v378_v22 = vld [vmem:[%s3866_s25 + $0x88] sm:$0xff]  ;;  %v770_v53 = vld [vmem:[%s5393_s3 + $0x70] sm:$0xff]  ;;  %v771_v54 = vld [vmem:[%s5393_s3 + $0x78] sm:$0xff] }
  0x59   : > { %3003 = vmatprep.subr.bf16.mxu0 %v3703_v0  ;;  %3122 = vmatpush3.bf16.msra.mxu1 %v3046_v4  ;;  %v406_v50 = vld [vmem:[%s3866_s25 + $0x168] sm:$0xff]  ;;  %v407_v56 = vld [vmem:[%s3866_s25 + $0x170] sm:$0xff]  ;;  %v417_v2 = vld [vmem:[%s3866_s25 + $0x1c0] sm:$0xff] }
  0x5a   : > { %3115 = vmatprep.subr.bf16.mxu1 %v3050_v9  ;;  %v410_v57 = vld [vmem:[%s3866_s25 + $0x188] sm:$0xff]  ;;  %v411_v60 = vld [vmem:[%s3866_s25 + $0x190] sm:$0xff]  ;;  %v421_v6 = vld [vmem:[%s3866_s25 + $0x1e0] sm:$0xff] }
  0x5b   : > { %v414_v61 = vld [vmem:[%s3866_s25 + $0x1a8] sm:$0xff]  ;;  %v424_v7 = vld [vmem:[%s3866_s25 + $0x1f8] sm:$0xff] }
  0x5c   : > { %3005 = vmatpush1.bf16.msra.mxu0 %v3004_v25  ;;  %v379_v25 = vld [vmem:[%s3866_s25 + $0x90] sm:$0xff]  ;;  %v418_v1 = vld [vmem:[%s3866_s25 + $0x1c8] sm:$0xff] }
  0x5d   : > { %3006 = vmatprep.subr.bf16.mxu0 %v3703_v0  ;;  %3123 = vmatpush3.bf16.msra.mxu1 %v3050_v9 }
  0x5e   : > { %3116 = vmatprep.subr.bf16.mxu1 %v3054_v14 }
  0x60   : > { %3008 = vmatpush1.bf16.msra.mxu0 %v3007_v28  ;;  %v384_v28 = vld [vmem:[%s3866_s25 + $0xb8] sm:$0xff] }
  0x61   : > { %3009 = vmatprep.subr.bf16.mxu0 %v3703_v0  ;;  %3124 = vmatpush3.bf16.msra.mxu1 %v3054_v14 }
  0x64   : > { %3011 = vmatpush1.bf16.msra.mxu0 %v3010_v31  ;;  %v385_v31 = vld [vmem:[%s3866_s25 + $0xc0] sm:$0xff] }
  0x65   : > { %3012 = vmatprep.subr.bf16.mxu0 %v3703_v0 }
  0x68   : > { %3014 = vmatpush1.bf16.msra.mxu0 %v3013_v36  ;;  %v392_v36 = vld [vmem:[%s3866_s25 + $0xf8] sm:$0xff] }
  0x69   : > { %3015 = vmatprep.subr.bf16.mxu0 %v3703_v0 }
  0x6c   : > { %3017 = vmatpush1.bf16.msra.mxu0 %v3016_v40  ;;  %v396_v40 = vld [vmem:[%s3866_s25 + $0x118] sm:$0xff] }
  0x6d   : > { %3018 = vmatprep.subr.bf16.mxu0 %v3703_v0 }
  0x70   : > { %3020 = vmatpush1.bf16.msra.mxu0 %v3019_v43  ;;  %v397_v43 = vld [vmem:[%s3866_s25 + $0x120] sm:$0xff] }
  0x71   : > { %3021 = vmatprep.subr.bf16.mxu0 %v3703_v0 }
  0x74   : > { %3023 = vmatpush1.bf16.msra.mxu0 %v3022_v46  ;;  %v402_v46 = vld [vmem:[%s3866_s25 + $0x148] sm:$0xff] }
  0x75   : > { %3024 = vmatprep.subr.bf16.mxu0 %v3703_v0 }
  0x78   : > { %3026 = vmatpush1.bf16.msra.mxu0 %v3025_v51  ;;  %v405_v51 = vld [vmem:[%s3866_s25 + $0x160] sm:$0xff] }
  0x79   : > { %3027 = vmatprep.subr.bf16.mxu0 %v3703_v0  ;;  %v363_v0 = vld [vmem:[%s3866_s25 + $0x10] sm:$0xff] }
  0x7c   : > { %3029 = vmatpush1.bf16.msra.mxu0 %v3028_v55  ;;  %v3058_v55 = vpack.c.bf16 %v771_v54, %v770_v53 }
  0x7d   : > { %3031 = vmatprep.subr.bf16.mxu0 %v3030_v37 }
  0x7e   : > { %3117 = vmatprep.subr.bf16.mxu1 %v3058_v55 }
  0x7f   : > { %564 = vmatmul.mubr.f32.vlgmr.msra.gmra.mrb[0].mxu0 %v361_v58  ;;  %3125 = vmatpush3.bf16.msra.mxu1 %v3058_v55  ;;  %v409_v58 = vld [vmem:[%s3866_s25 + $0x180] sm:$0xff] }
  0x80   : > { %568 = vmatprep.mubr.f32.mxu0 %v364_v62  ;;  %3033 = vmatpush3.bf16.msra.mxu0 %v3030_v37  ;;  %v391_v37 = vld [vmem:[%s3866_s25 + $0xf0] sm:$0xff]  ;;  %v413_v62 = vld [vmem:[%s3866_s25 + $0x1a0] sm:$0xff] }
  0x81   : > { %3035 = vmatprep.subr.bf16.mxu0 %v3034_v52 }
  0x83   : > { %569 = vmatmul.mubr.f32.gmra.mrb[2].mxu0 %v363_v0  ;;  %v415_v0 = vld [vmem:[%s3866_s25 + $0x1b0] sm:$0xff] }
  0x84   : > { %573 = vmatprep.mubr.f32.mxu0 %v366_v3  ;;  %3037 = vmatpush3.bf16.msra.mxu0 %v3034_v52  ;;  %v408_v52 = vld [vmem:[%s3866_s25 + $0x178] sm:$0xff] }
  0x85   : > { %3039 = vmatprep.subr.bf16.mxu0 %v3038_v59  ;;  %v420_v3 = vld [vmem:[%s3866_s25 + $0x1d8] sm:$0xff] }
  0x87   : > { %574 = vmatmul.mubr.f32.gmra.mrb[4].mxu0 %v365_v5  ;;  %v422_v5 = vld [vmem:[%s3866_s25 + $0x1e8] sm:$0xff] }
  0x88   : > { %578 = vmatprep.mubr.f32.mxu0 %v368_v8  ;;  %3041 = vmatpush3.bf16.msra.mxu0 %v3038_v59  ;;  %v412_v59 = vld [vmem:[%s3866_s25 + $0x198] sm:$0xff]  ;;  %v423_v8 = vld [vmem:[%s3866_s25 + $0x1f0] sm:$0xff] }
  0x89   : > { %3043 = vmatprep.subr.bf16.mxu0 %v3042_v63 }
  0x8b   : > { %579 = vmatmul.mubr.f32.gmra.mrb[6].mxu0 %v367_v10 }
  0x8c   : > { %583 = vmatprep.mubr.f32.mxu0 %v370_v13  ;;  %3045 = vmatpush3.bf16.msra.mxu0 %v3042_v63  ;;  %v416_v63 = vld [vmem:[%s3866_s25 + $0x1b8] sm:$0xff] }
  0x8d   : > { %3047 = vmatprep.subr.bf16.mxu0 %v3046_v4 }
  0x8f   : > { %584 = vmatmul.mubr.f32.gmra.mrb[8].mxu0 %v369_v15 }
  0x90   : > { %588 = vmatprep.mubr.f32.mxu0 %v372_v16  ;;  %3049 = vmatpush3.bf16.msra.mxu0 %v3046_v4  ;;  %v419_v4 = vld [vmem:[%s3866_s25 + $0x1d0] sm:$0xff]  ;;  %s4157_s25 = scalar_lea.vmem [#allocation6], %s2698_s26 }
  0x91   : > { %3051 = vmatprep.subr.bf16.mxu0 %v3050_v9  ;;  %s2571_s19 = sshll.u32 %s4157_s25, 4  ;;  %s5190_s19 = int_to_ptr.vmem [resolvable:$true] %s2571_s19 }
  0x93   : > { %589 = vmatmul.mubr.f32.gmra.mrb[10].mxu0 %v371_v17 }
  0x94   : > { %593 = vmatprep.mubr.f32.mxu0 %v374_v18  ;;  %3053 = vmatpush3.bf16.msra.mxu0 %v3050_v9  ;;  %v4099_v9 = vld [vmem:[%s5396_s6] ss:$0 sm:$0xff] }
  0x95   : > { %3055 = vmatprep.subr.bf16.mxu0 %v3054_v14 }
  0x97   : > { %594 = vmatmul.mubr.f32.gmra.mrb[12].mxu0 %v373_v19 }
  0x98   : > { %598 = vmatprep.mubr.f32.mxu0 %v376_v20  ;;  %3057 = vmatpush3.bf16.msra.mxu0 %v3054_v14 }
  0x99   : > { %3059 = vmatprep.subr.bf16.mxu0 %v3058_v55 }
  0x9b   : > { %599 = vmatmul.mubr.f32.gmra.mrb[14].mxu0 %v375_v21 }
  0x9c   : > { %603 = vmatprep.mubr.f32.mxu0 %v378_v22  ;;  %3061 = vmatpush3.bf16.msra.mxu0 %v3058_v55 }
  0x9f   : > { %604 = vmatmul.mubr.f32.gmra.mrb[16].mxu0 %v377_v23 }
  0xa0   : > { %608 = vmatprep.mubr.f32.mxu0 %v380_v24 }
  0xa3   : > { %609 = vmatmul.mubr.f32.gmra.mrb[18].mxu0 %v379_v25 }
  0xa4   : > { %613 = vmatprep.mubr.f32.mxu0 %v382_v26 }
  0xa7   : > { %614 = vmatmul.mubr.f32.gmra.mrb[20].mxu0 %v381_v27 }
  0xa8   : > { %618 = vmatprep.mubr.f32.mxu0 %v384_v28 }
  0xab   : > { %619 = vmatmul.mubr.f32.gmra.mrb[22].mxu0 %v383_v29 }
  0xac   : > { %623 = vmatprep.mubr.f32.mxu0 %v386_v30 }
  0xaf   : > { %624 = vmatmul.mubr.f32.gmra.mrb[24].mxu0 %v385_v31 }
  0xb0   : > { %628 = vmatprep.mubr.f32.mxu0 %v388_v32 }
  0xb3   : > { %629 = vmatmul.mubr.f32.gmra.mrb[26].mxu0 %v387_v33 }
  0xb4   : > { %633 = vmatprep.mubr.f32.mxu0 %v390_v34 }
  0xb7   : > { %634 = vmatmul.mubr.f32.gmra.mrb[28].mxu0 %v389_v35 }
  0xb8   : > { %638 = vmatprep.mubr.f32.mxu0 %v392_v36 }
  0xbb   : > { %639 = vmatmul.mubr.f32.gmra.mrb[30].mxu0 %v391_v37 }
  0xbc   : > { %643 = vmatprep.mubr.f32.mxu0 %v394_v38 }
  0xbf   : > { %644 = vmatmul.mubr.f32.gmra.mrb[32].mxu0 %v393_v39 }
  0xc0   : > { %648 = vmatprep.mubr.f32.mxu0 %v396_v40 }
  0xc3   : > { %649 = vmatmul.mubr.f32.gmra.mrb[34].mxu0 %v395_v41 }
  0xc4   : > { %653 = vmatprep.mubr.f32.mxu0 %v398_v42 }
  0xc7   : > { %654 = vmatmul.mubr.f32.gmra.mrb[36].mxu0 %v397_v43 }
  0xc8   : > { %658 = vmatprep.mubr.f32.mxu0 %v400_v44 }
  0xcb   : > { %659 = vmatmul.mubr.f32.gmra.mrb[38].mxu0 %v399_v45 }
  0xcc   : > { %663 = vmatprep.mubr.f32.mxu0 %v402_v46 }
  0xcf   : > { %664 = vmatmul.mubr.f32.gmra.mrb[40].mxu0 %v401_v47 }
  0xd0   : > { %668 = vmatprep.mubr.f32.mxu0 %v404_v48 }
  0xd3   : > { %669 = vmatmul.mubr.f32.gmra.mrb[42].mxu0 %v403_v49 }
  0xd4   : > { %673 = vmatprep.mubr.f32.mxu0 %v406_v50 }
  0xd7   : > { %674 = vmatmul.mubr.f32.gmra.mrb[44].mxu0 %v405_v51 }
  0xd8   : > { %678 = vmatprep.mubr.f32.mxu0 %v408_v52 }
  0xdb   : > { %679 = vmatmul.mubr.f32.gmra.mrb[46].mxu0 %v407_v56 }
  0xdc   : > { %683 = vmatprep.mubr.f32.mxu0 %v410_v57 }
  0xdf   : > { %684 = vmatmul.mubr.f32.gmra.mrb[48].mxu0 %v409_v58 }
  0xe0   : > { %688 = vmatprep.mubr.f32.mxu0 %v412_v59 }
  0xe3   : > { %689 = vmatmul.mubr.f32.gmra.mrb[50].mxu0 %v411_v60 }
  0xe4   : > { %693 = vmatprep.mubr.f32.mxu0 %v414_v61 }
  0xe7   : > { %694 = vmatmul.mubr.f32.gmra.mrb[52].mxu0 %v413_v62 }
  0xe8   : > { %698 = vmatprep.mubr.f32.mxu0 %v416_v63 }
  0xeb   : > { %699 = vmatmul.mubr.f32.gmra.mrb[54].mxu0 %v415_v0 }
  0xec   : > { %703 = vmatprep.mubr.f32.mxu0 %v418_v1 }
  0xef   : > { %704 = vmatmul.mubr.f32.gmra.mrb[56].mxu0 %v417_v2 }
  0xf0   : > { %708 = vmatprep.mubr.f32.mxu0 %v420_v3 }
  0xf3   : > { %709 = vmatmul.mubr.f32.gmra.mrb[58].mxu0 %v419_v4 }
  0xf4   : > { %713 = vmatprep.mubr.f32.mxu0 %v422_v5 }
  0xf7   : > { %714 = vmatmul.mubr.f32.gmra.mrb[60].mxu0 %v421_v6 }
  0xf8   : > { %718 = vmatprep.mubr.f32.mxu0 %v424_v7 }
  0xfb   : > { %719 = vmatmul.mubr.f32.gmra.mrb[62].mxu0 %v423_v8 }
 0x152   : > { %v565_v10 = vpop.f32.mrb[0].mxu0 }
 0x153   : > { %v566_v11 = vadd.f32 %v4099_v9, %v565_v10  ;;  %v567_v12 = vpop.f32.mrb[1].mxu0 }
 0x155   : > { %3186 = vtanh.f32 %v566_v11 }
 0x156   : > { %v570_v13 = vpop.f32.mrb[2].mxu0 }
 0x157   : > { %v571_v14 = vadd.f32 %v4099_v9, %v570_v13  ;;  %v572_v15 = vpop.f32.mrb[3].mxu0 }
 0x159   : > { %3188 = vtanh.f32 %v571_v14 }
 0x15a   : > { %v575_v16 = vpop.f32.mrb[4].mxu0 }
 0x15b   : > { %v576_v17 = vadd.f32 %v4099_v9, %v575_v16  ;;  %v577_v18 = vpop.f32.mrb[5].mxu0 }
 0x15d   : > { %3190 = vtanh.f32 %v576_v17 }
 0x15e   : > { %v580_v19 = vpop.f32.mrb[6].mxu0 }
 0x15f   : > { %v3187_v20 = vpop.eup %3186  ;;  %v581_v21 = vadd.f32 %v4099_v9, %v580_v19  ;;  %v582_v22 = vpop.f32.mrb[7].mxu0 }
 0x160   : > { %2870 = vmatprep.mubr.f32.mxu0 %v3187_v20 }
 0x161   : > { %3192 = vtanh.f32 %v581_v21 }
 0x162   : > { %v585_v23 = vpop.f32.mrb[8].mxu0 }
 0x163   : > { %v3189_v24 = vpop.eup %3188  ;;  %v586_v25 = vadd.f32 %v4099_v9, %v585_v23  ;;  %v587_v26 = vpop.f32.mrb[9].mxu0 }
 0x164   : > { %2871 = vmatmul.mubr.f32.vlgmr.msra.gmra.mrb[64].mxu0 %v3189_v24 }
 0x165   : > { %3194 = vtanh.f32 %v586_v25 }
 0x166   : > { %v590_v27 = vpop.f32.mrb[10].mxu0 }
 0x167   : > { %v3191_v28 = vpop.eup %3190  ;;  %v591_v29 = vadd.f32 %v4099_v9, %v590_v27  ;;  %v592_v30 = vpop.f32.mrb[11].mxu0 }
 0x168   : > { %2873 = vmatprep.mubr.f32.mxu0 %v3191_v28 }
 0x169   : > { %3196 = vtanh.f32 %v591_v29 }
 0x16a   : > { %v595_v31 = vpop.f32.mrb[12].mxu0 }
 0x16b   : > { %v3193_v32 = vpop.eup %3192  ;;  %v596_v33 = vadd.f32 %v4099_v9, %v595_v31  ;;  %v597_v34 = vpop.f32.mrb[13].mxu0 }
 0x16c   : > { %2874 = vmatmul.mubr.f32.gmra.mrb[66].mxu0 %v3193_v32 }
 0x16d   : > { %3198 = vtanh.f32 %v596_v33 }
 0x16e   : > { %v600_v35 = vpop.f32.mrb[14].mxu0 }
 0x16f   : > { %v3195_v36 = vpop.eup %3194  ;;  %v601_v37 = vadd.f32 %v4099_v9, %v600_v35  ;;  %v602_v38 = vpop.f32.mrb[15].mxu0 }
 0x170   : > { %2876 = vmatprep.mubr.f32.mxu0 %v3195_v36 }
 0x171   : > { %3200 = vtanh.f32 %v601_v37 }
 0x172   : > { %v605_v39 = vpop.f32.mrb[16].mxu0 }
 0x173   : > { %v3197_v40 = vpop.eup %3196  ;;  %v606_v41 = vadd.f32 %v4099_v9, %v605_v39  ;;  %v607_v42 = vpop.f32.mrb[17].mxu0 }
 0x174   : > { %2877 = vmatmul.mubr.f32.gmra.mrb[68].mxu0 %v3197_v40 }
 0x175   : > { %3202 = vtanh.f32 %v606_v41 }
 0x176   : > { %v610_v43 = vpop.f32.mrb[18].mxu0 }
 0x177   : > { %v3199_v44 = vpop.eup %3198  ;;  %v611_v45 = vadd.f32 %v4099_v9, %v610_v43  ;;  %v612_v46 = vpop.f32.mrb[19].mxu0 }
 0x178   : > { %2879 = vmatprep.mubr.f32.mxu0 %v3199_v44 }
 0x179   : > { %3204 = vtanh.f32 %v611_v45 }
 0x17a   : > { %v615_v47 = vpop.f32.mrb[20].mxu0 }
 0x17b   : > { %v3201_v48 = vpop.eup %3200  ;;  %v616_v49 = vadd.f32 %v4099_v9, %v615_v47  ;;  %v617_v50 = vpop.f32.mrb[21].mxu0 }
 0x17c   : > { %2880 = vmatmul.mubr.f32.gmra.mrb[70].mxu0 %v3201_v48 }
 0x17d   : > { %3206 = vtanh.f32 %v616_v49 }
 0x17e   : > { %v620_v51 = vpop.f32.mrb[22].mxu0 }
 0x17f   : > { %v3203_v52 = vpop.eup %3202  ;;  %v621_v53 = vadd.f32 %v4099_v9, %v620_v51  ;;  %v622_v54 = vpop.f32.mrb[23].mxu0 }
 0x180   : > { %2882 = vmatprep.mubr.f32.mxu0 %v3203_v52 }
 0x181   : > { %3208 = vtanh.f32 %v621_v53 }
 0x182   : > { %v625_v55 = vpop.f32.mrb[24].mxu0 }
 0x183   : > { %v3205_v56 = vpop.eup %3204  ;;  %v626_v57 = vadd.f32 %v4099_v9, %v625_v55  ;;  %v627_v58 = vpop.f32.mrb[25].mxu0 }
 0x184   : > { %2883 = vmatmul.mubr.f32.gmra.mrb[72].mxu0 %v3205_v56 }
 0x185   : > { %3210 = vtanh.f32 %v626_v57 }
 0x186   : > { %v630_v59 = vpop.f32.mrb[26].mxu0 }
 0x187   : > { %v3207_v60 = vpop.eup %3206  ;;  %v631_v61 = vadd.f32 %v4099_v9, %v630_v59  ;;  %v632_v62 = vpop.f32.mrb[27].mxu0 }
 0x188   : > { %2885 = vmatprep.mubr.f32.mxu0 %v3207_v60 }
 0x189   : > { %3212 = vtanh.f32 %v631_v61 }
 0x18a   : > { %v635_v63 = vpop.f32.mrb[28].mxu0 }
 0x18b   : > { %v3209_v0 = vpop.eup %3208  ;;  %v636_v1 = vadd.f32 %v4099_v9, %v635_v63  ;;  %v637_v2 = vpop.f32.mrb[29].mxu0 }
 0x18c   : > { %2886 = vmatmul.mubr.f32.gmra.mrb[74].mxu0 %v3209_v0 }
 0x18d   : > { %3214 = vtanh.f32 %v636_v1 }
 0x18e   : > { %v640_v3 = vpop.f32.mrb[30].mxu0 }
 0x18f   : > { %v3211_v4 = vpop.eup %3210  ;;  %v641_v5 = vadd.f32 %v4099_v9, %v640_v3  ;;  %v642_v6 = vpop.f32.mrb[31].mxu0 }
 0x190   : > { %2888 = vmatprep.mubr.f32.mxu0 %v3211_v4 }
 0x191   : > { %3216 = vtanh.f32 %v641_v5 }
 0x192   : > { %v645_v7 = vpop.f32.mrb[32].mxu0 }
 0x193   : > { %v3213_v8 = vpop.eup %3212  ;;  %v646_v10 = vadd.f32 %v4099_v9, %v645_v7  ;;  %v647_v11 = vpop.f32.mrb[33].mxu0 }
 0x194   : > { %2889 = vmatmul.mubr.f32.gmra.mrb[76].mxu0 %v3213_v8 }
 0x195   : > { %3218 = vtanh.f32 %v646_v10 }
 0x196   : > { %v650_v12 = vpop.f32.mrb[34].mxu0 }
 0x197   : > { %v3215_v13 = vpop.eup %3214  ;;  %v651_v14 = vadd.f32 %v4099_v9, %v650_v12  ;;  %v652_v15 = vpop.f32.mrb[35].mxu0  ;;  %v1291_v12 = vld [vmem:[%s5394_s4] sm:$0xff] }
 0x198   : > { %2891 = vmatprep.mubr.f32.mxu0 %v3215_v13  ;;  %v1292_v13 = vld [vmem:[%s5394_s4 + $0x8] sm:$0xff]  ;;  %v1293_v15 = vld [vmem:[%s5394_s4 + $0x10] sm:$0xff] }
 0x199   : > { %3220 = vtanh.f32 %v651_v14  ;;  %v3062_v14 = vpack.c.bf16 %v1292_v13, %v1291_v12 }
 0x19a   : > { %v655_v16 = vpop.f32.mrb[36].mxu0 }
 0x19b   : > { %v3217_v17 = vpop.eup %3216  ;;  %v656_v18 = vadd.f32 %v4099_v9, %v655_v16  ;;  %v657_v19 = vpop.f32.mrb[37].mxu0  ;;  %3063 = vmatprep.subr.bf16.mxu1 %v3062_v14  ;;  %v1294_v16 = vld [vmem:[%s5394_s4 + $0x18] sm:$0xff] }
 0x19c   : > { %2892 = vmatmul.mubr.f32.gmra.mrb[78].mxu0 %v3217_v17 }
 0x19d   : > { %3222 = vtanh.f32 %v656_v18  ;;  %v3066_v18 = vpack.c.bf16 %v1294_v16, %v1293_v15 }
 0x19e   : > { %v660_v20 = vpop.f32.mrb[38].mxu0 }
 0x19f   : > { %v3219_v21 = vpop.eup %3218  ;;  %v661_v22 = vadd.f32 %v4099_v9, %v660_v20  ;;  %v662_v23 = vpop.f32.mrb[39].mxu0 }
 0x1a0   : > { %2894 = vmatprep.mubr.f32.mxu0 %v3219_v21  ;;  %v1296_v23 = vld [vmem:[%s5394_s4 + $0x28] sm:$0xff] }
 0x1a1   : > { %3224 = vtanh.f32 %v661_v22  ;;  %v1295_v22 = vld [vmem:[%s5394_s4 + $0x20] sm:$0xff] }
 0x1a2   : > { %v665_v24 = vpop.f32.mrb[40].mxu0 }
 0x1a3   : > { %v3221_v25 = vpop.eup %3220  ;;  %v666_v26 = vadd.f32 %v4099_v9, %v665_v24  ;;  %v667_v27 = vpop.f32.mrb[41].mxu0 }
 0x1a4   : > { %2895 = vmatmul.mubr.f32.gmra.mrb[80].mxu0 %v3221_v25 }
 0x1a5   : > { %3226 = vtanh.f32 %v666_v26  ;;  %v3070_v26 = vpack.c.bf16 %v1296_v23, %v1295_v22 }
 0x1a6   : > { %v670_v28 = vpop.f32.mrb[42].mxu0 }
 0x1a7   : > { %v3223_v29 = vpop.eup %3222  ;;  %v671_v30 = vadd.f32 %v4099_v9, %v670_v28  ;;  %v672_v31 = vpop.f32.mrb[43].mxu0  ;;  %v1297_v28 = vld [vmem:[%s5394_s4 + $0x30] sm:$0xff] }
 0x1a8   : > { %2897 = vmatprep.mubr.f32.mxu0 %v3223_v29  ;;  %v1298_v29 = vld [vmem:[%s5394_s4 + $0x38] sm:$0xff] }
 0x1a9   : > { %3228 = vtanh.f32 %v671_v30 }
 0x1aa   : > { %v675_v32 = vpop.f32.mrb[44].mxu0 }
 0x1ab   : > { %v3225_v33 = vpop.eup %3224  ;;  %v676_v34 = vadd.f32 %v4099_v9, %v675_v32  ;;  %v677_v35 = vpop.f32.mrb[45].mxu0  ;;  %v3074_v32 = vpack.c.bf16 %v1298_v29, %v1297_v28 }
 0x1ac   : > { %2898 = vmatmul.mubr.f32.gmra.mrb[82].mxu0 %v3225_v33 }
 0x1ad   : > { %3230 = vtanh.f32 %v676_v34 }
 0x1ae   : > { %v680_v36 = vpop.f32.mrb[46].mxu0 }
 0x1af   : > { %v3227_v37 = vpop.eup %3226  ;;  %v681_v38 = vadd.f32 %v4099_v9, %v680_v36  ;;  %v682_v39 = vpop.f32.mrb[47].mxu0 }
 0x1b0   : > { %2900 = vmatprep.mubr.f32.mxu0 %v3227_v37 }
 0x1b1   : > { %3232 = vtanh.f32 %v681_v38 }
 0x1b2   : > { %v685_v40 = vpop.f32.mrb[48].mxu0 }
 0x1b3   : > { %v3229_v41 = vpop.eup %3228  ;;  %v686_v42 = vadd.f32 %v4099_v9, %v685_v40  ;;  %v687_v43 = vpop.f32.mrb[49].mxu0 }
 0x1b4   : > { %2901 = vmatmul.mubr.f32.gmra.mrb[84].mxu0 %v3229_v41 }
 0x1b5   : > { %3234 = vtanh.f32 %v686_v42 }
 0x1b6   : > { %v690_v44 = vpop.f32.mrb[50].mxu0 }
 0x1b7   : > { %v3231_v45 = vpop.eup %3230  ;;  %v691_v46 = vadd.f32 %v4099_v9, %v690_v44  ;;  %v692_v47 = vpop.f32.mrb[51].mxu0 }
 0x1b8   : > { %2903 = vmatprep.mubr.f32.mxu0 %v3231_v45 }
 0x1b9   : > { %3236 = vtanh.f32 %v691_v46 }
 0x1ba   : > { %v695_v48 = vpop.f32.mrb[52].mxu0 }
 0x1bb   : > { %v3233_v49 = vpop.eup %3232  ;;  %v696_v50 = vadd.f32 %v4099_v9, %v695_v48  ;;  %v697_v51 = vpop.f32.mrb[53].mxu0 }
 0x1bc   : > { %2904 = vmatmul.mubr.f32.gmra.mrb[86].mxu0 %v3233_v49 }
 0x1bd   : > { %3238 = vtanh.f32 %v696_v50 }
 0x1be   : > { %v700_v52 = vpop.f32.mrb[54].mxu0 }
 0x1bf   : > { %v3235_v53 = vpop.eup %3234  ;;  %v701_v54 = vadd.f32 %v4099_v9, %v700_v52  ;;  %v702_v55 = vpop.f32.mrb[55].mxu0 }
 0x1c0   : > { %2906 = vmatprep.mubr.f32.mxu1 %v3235_v53 }
 0x1c1   : > { %3240 = vtanh.f32 %v701_v54 }
 0x1c2   : > { %v705_v56 = vpop.f32.mrb[56].mxu0 }
 0x1c3   : > { %v3237_v57 = vpop.eup %3236  ;;  %v706_v58 = vadd.f32 %v4099_v9, %v705_v56  ;;  %v707_v59 = vpop.f32.mrb[57].mxu0 }
 0x1c4   : > { %2907 = vmatmul.mubr.f32.vlgmr.msra.gmra.mrb[0].mxu1 %v3237_v57 }
 0x1c5   : > { %3242 = vtanh.f32 %v706_v58  ;;  %3065 = vmatpush3.bf16.msra.mxu1 %v3062_v14 }
 0x1c6   : > { %v710_v60 = vpop.f32.mrb[58].mxu0  ;;  %3067 = vmatprep.subr.bf16.mxu1 %v3066_v18 }
 0x1c7   : > { %v3239_v61 = vpop.eup %3238  ;;  %v711_v62 = vadd.f32 %v4099_v9, %v710_v60  ;;  %v712_v63 = vpop.f32.mrb[59].mxu0 }
 0x1c8   : > { %2909 = vmatprep.mubr.f32.mxu1 %v3239_v61 }
 0x1c9   : > { %3244 = vtanh.f32 %v711_v62  ;;  %3069 = vmatpush3.bf16.msra.mxu1 %v3066_v18 }
 0x1ca   : > { %v715_v0 = vpop.f32.mrb[60].mxu0  ;;  %3071 = vmatprep.subr.bf16.mxu1 %v3070_v26 }
 0x1cb   : > { %v3241_v1 = vpop.eup %3240  ;;  %v716_v2 = vadd.f32 %v4099_v9, %v715_v0  ;;  %v717_v3 = vpop.f32.mrb[61].mxu0 }
 0x1cc   : > { %2910 = vmatmul.mubr.f32.gmra.mrb[2].mxu1 %v3241_v1 }
 0x1cd   : > { %3246 = vtanh.f32 %v716_v2  ;;  %3073 = vmatpush3.bf16.msra.mxu1 %v3070_v26 }
 0x1ce   : > { %v720_v4 = vpop.f32.mrb[62].mxu0  ;;  %3075 = vmatprep.subr.bf16.mxu1 %v3074_v32 }
 0x1cf   : > { %v3243_v5 = vpop.eup %3242  ;;  %v721_v6 = vadd.f32 %v4099_v9, %v720_v4  ;;  %v722_v7 = vpop.f32.mrb[63].mxu0  ;;  %v4143_v9 = vld [vmem:[%s5396_s6 + $0x1] ss:$0 sm:$0xff] }
 0x1d0   : > { %2912 = vmatprep.mubr.f32.mxu1 %v3243_v5 }
 0x1d1   : > { %3248 = vtanh.f32 %v721_v6  ;;  %3077 = vmatpush3.bf16.msra.mxu1 %v3074_v32 }
 0x1d3   : > { %v3245_v8 = vpop.eup %3244 }
 0x1d4   : > { %2913 = vmatmul.mubr.f32.gmra.mrb[4].mxu1 %v3245_v8 }
 0x1d7   : > { %v3247_v10 = vpop.eup %3246 }
 0x1d8   : > { %2915 = vmatprep.mubr.f32.mxu1 %v3247_v10 }
 0x1db   : > { %v3249_v11 = vpop.eup %3248 }
 0x1dc   : > { %2916 = vmatmul.mubr.f32.gmra.mrb[6].mxu1 %v3249_v11 }
 0x237   : > { %v2872_v17 = vpop.f32.mrb[64].mxu0 }
 0x238   : > { %v4152_v19 = vadd.f32 %v2872_v17, %v4143_v9  ;;  %v844_v20 = vpop.f32.mrb[65].mxu0 }
 0x239   : > { %v4155_v21 = vadd.f32 %v4143_v9, %v844_v20 }
 0x23a   : > { %2504 = vst [vmem:[%s4157_s25 + $0x8] sm:$0xff] %v4152_v19  ;;  %v1004_v24 = vmul.f32 0.5, %v4152_v19 }
 0x23b   : > { %v1003_v25 = vmul.f32 0.5, %v4155_v21  ;;  %2503 = vst [vmem:[%s4157_s25] sm:$0xff] %v4155_v21 }
 0x23c   : > { %v1037_v30 = vmul.f32 1.442695, %v1004_v24 }
 0x23d   : > { %v1035_v27 = vmul.f32 1.442695, %v1003_v25 }
 0x23f   : > { %3250 = vpow2.f32 %v1035_v27  ;;  %v2875_v31 = vpop.f32.mrb[66].mxu0 }
 0x240   : > { %v4178_v33 = vadd.f32 %v2875_v31, %v4143_v9  ;;  %v854_v34 = vpop.f32.mrb[67].mxu0  ;;  %3252 = vpow2.f32 %v1037_v30 }
 0x241   : > { %v4181_v35 = vadd.f32 %v4143_v9, %v854_v34 }
 0x242   : > { %2506 = vst [vmem:[%s4157_s25 + $0x18] sm:$0xff] %v4178_v33  ;;  %v1006_v36 = vmul.f32 0.5, %v4178_v33 }
 0x243   : > { %v1005_v37 = vmul.f32 0.5, %v4181_v35  ;;  %2505 = vst [vmem:[%s4157_s25 + $0x10] sm:$0xff] %v4181_v35 }
 0x244   : > { %v1041_v39 = vmul.f32 1.442695, %v1006_v36 }
 0x245   : > { %v1039_v38 = vmul.f32 1.442695, %v1005_v37 }
 0x247   : > { %3254 = vpow2.f32 %v1039_v38  ;;  %v2878_v40 = vpop.f32.mrb[68].mxu0 }
 0x248   : > { %v4190_v41 = vadd.f32 %v2878_v40, %v4143_v9  ;;  %v864_v42 = vpop.f32.mrb[69].mxu0  ;;  %3256 = vpow2.f32 %v1041_v39 }
 0x249   : > { %v3251_v43 = vpop.eup %3250  ;;  %v4193_v44 = vadd.f32 %v4143_v9, %v864_v42 }
 0x24a   : > { %v1008_v45 = vmul.f32 0.5, %v4190_v41  ;;  %2508 = vst [vmem:[%s4157_s25 + $0x28] sm:$0xff] %v4190_v41  ;;  %1131 = vrot.lane.b32.xlu0 %v3251_v43, %s3704_s13  ;;  %v3253_v48 = vpop.eup %3252 }
 0x24b   : > { %v1007_v46 = vmul.f32 0.5, %v4193_v44  ;;  %2507 = vst [vmem:[%s4157_s25 + $0x20] sm:$0xff] %v4193_v44 }
 0x24c   : > { %v1045_v47 = vmul.f32 1.442695, %v1008_v45 }
 0x24d   : > { %v1043_v49 = vmul.f32 1.442695, %v1007_v46 }
 0x24e   : > { %3258 = vpow2.f32 %v1045_v47  ;;  %1133 = vrot.lane.b32.xlu0 %v3253_v48, %s3704_s13 }
 0x24f   : > { %3260 = vpow2.f32 %v1043_v49  ;;  %v2881_v50 = vpop.f32.mrb[70].mxu0 }
 0x250   : > { %v4204_v51 = vadd.f32 %v2881_v50, %v4143_v9  ;;  %v874_v52 = vpop.f32.mrb[71].mxu0 }
 0x251   : > { %v3255_v53 = vpop.eup %3254  ;;  %v4207_v54 = vadd.f32 %v4143_v9, %v874_v52 }
 0x252   : > { %v1010_v55 = vmul.f32 0.5, %v4204_v51  ;;  %2510 = vst [vmem:[%s4157_s25 + $0x38] sm:$0xff] %v4204_v51  ;;  %1135 = vrot.lane.b32.xlu1 %v3255_v53, %s3704_s13  ;;  %v3257_v58 = vpop.eup %3256 }
 0x253   : > { %v1009_v56 = vmul.f32 0.5, %v4207_v54  ;;  %2509 = vst [vmem:[%s4157_s25 + $0x30] sm:$0xff] %v4207_v54 }
 0x254   : > { %v1049_v57 = vmul.f32 1.442695, %v1010_v55 }
 0x255   : > { %v1047_v59 = vmul.f32 1.442695, %v1009_v56 }
 0x256   : > { %3262 = vpow2.f32 %v1049_v57  ;;  %1137 = vrot.lane.b32.xlu1 %v3257_v58, %s3704_s13 }
 0x257   : > { %3264 = vpow2.f32 %v1047_v59  ;;  %v2884_v60 = vpop.f32.mrb[72].mxu0 }
 0x258   : > { %v3259_v61 = vpop.eup %3258  ;;  %v4218_v62 = vadd.f32 %v2884_v60, %v4143_v9  ;;  %v884_v63 = vpop.f32.mrb[73].mxu0 }
 0x259   : > { %v3261_v0 = vpop.eup %3260  ;;  %v4221_v1 = vadd.f32 %v4143_v9, %v884_v63 }
 0x25a   : > { %v1012_v2 = vmul.f32 0.5, %v4218_v62  ;;  %2512 = vst [vmem:[%s4157_s25 + $0x48] sm:$0xff] %v4218_v62  ;;  %1141 = vrot.lane.b32.xlu1 %v3259_v61, %s3704_s13  ;;  %1139 = vrot.lane.b32.xlu0 %v3261_v0, %s3704_s13 }
 0x25b   : > { %v1011_v3 = vmul.f32 0.5, %v4221_v1  ;;  %2511 = vst [vmem:[%s4157_s25 + $0x40] sm:$0xff] %v4221_v1 }
 0x25c   : > { %v1053_v4 = vmul.f32 1.442695, %v1012_v2 }
 0x25d   : > { %v1051_v5 = vmul.f32 1.442695, %v1011_v3 }
 0x25e   : > { %3266 = vpow2.f32 %v1053_v4 }
 0x25f   : > { %3268 = vpow2.f32 %v1051_v5  ;;  %v2887_v6 = vpop.f32.mrb[74].mxu0 }
 0x260   : > { %v3263_v7 = vpop.eup %3262  ;;  %v4232_v8 = vadd.f32 %v2887_v6, %v4143_v9  ;;  %v894_v10 = vpop.f32.mrb[75].mxu0 }
 0x261   : > { %v3265_v11 = vpop.eup %3264  ;;  %v4235_v12 = vadd.f32 %v4143_v9, %v894_v10  ;;  %1145 = vrot.lane.b32.xlu1 %v3263_v7, %s3704_s13 }
 0x262   : > { %v1014_v13 = vmul.f32 0.5, %v4232_v8  ;;  %2514 = vst [vmem:[%s4157_s25 + $0x58] sm:$0xff] %v4232_v8  ;;  %1143 = vrot.lane.b32.xlu0 %v3265_v11, %s3704_s13 }
 0x263   : > { %v1013_v14 = vmul.f32 0.5, %v4235_v12  ;;  %2513 = vst [vmem:[%s4157_s25 + $0x50] sm:$0xff] %v4235_v12 }
 0x264   : > { %v1057_v15 = vmul.f32 1.442695, %v1014_v13 }
 0x265   : > { %v1055_v16 = vmul.f32 1.442695, %v1013_v14 }
 0x266   : > { %3270 = vpow2.f32 %v1057_v15 }
 0x267   : > { %3272 = vpow2.f32 %v1055_v16  ;;  %v2890_v17 = vpop.f32.mrb[76].mxu0 }
 0x268   : > { %v3267_v18 = vpop.eup %3266  ;;  %v4246_v20 = vadd.f32 %v2890_v17, %v4143_v9  ;;  %v904_v22 = vpop.f32.mrb[77].mxu0 }
 0x269   : > { %v3269_v23 = vpop.eup %3268  ;;  %v4249_v24 = vadd.f32 %v4143_v9, %v904_v22  ;;  %1149 = vrot.lane.b32.xlu1 %v3267_v18, %s3704_s13 }
 0x26a   : > { %v1016_v25 = vmul.f32 0.5, %v4246_v20  ;;  %2516 = vst [vmem:[%s4157_s25 + $0x68] sm:$0xff] %v4246_v20  ;;  %1147 = vrot.lane.b32.xlu0 %v3269_v23, %s3704_s13 }
 0x26b   : > { %v1015_v26 = vmul.f32 0.5, %v4249_v24  ;;  %2515 = vst [vmem:[%s4157_s25 + $0x60] sm:$0xff] %v4249_v24 }
 0x26c   : > { %v1061_v27 = vmul.f32 1.442695, %v1016_v25 }
 0x26d   : > { %v1059_v28 = vmul.f32 1.442695, %v1015_v26 }
 0x26e   : > { %3274 = vpow2.f32 %v1061_v27 }
 0x26f   : > { %3276 = vpow2.f32 %v1059_v28  ;;  %v2893_v29 = vpop.f32.mrb[78].mxu0 }
 0x270   : > { %v3271_v30 = vpop.eup %3270  ;;  %v4260_v31 = vadd.f32 %v2893_v29, %v4143_v9  ;;  %v914_v32 = vpop.f32.mrb[79].mxu0 }
 0x271   : > { %v3273_v34 = vpop.eup %3272  ;;  %v4263_v36 = vadd.f32 %v4143_v9, %v914_v32  ;;  %1153 = vrot.lane.b32.xlu1 %v3271_v30, %s3704_s13 }
 0x272   : > { %v1018_v37 = vmul.f32 0.5, %v4260_v31  ;;  %2518 = vst [vmem:[%s4157_s25 + $0x78] sm:$0xff] %v4260_v31  ;;  %1151 = vrot.lane.b32.xlu0 %v3273_v34, %s3704_s13 }
 0x273   : > { %v1017_v38 = vmul.f32 0.5, %v4263_v36  ;;  %2517 = vst [vmem:[%s4157_s25 + $0x70] sm:$0xff] %v4263_v36 }
 0x274   : > { %v1065_v39 = vmul.f32 1.442695, %v1018_v37 }
 0x275   : > { %v1063_v40 = vmul.f32 1.442695, %v1017_v38 }
 0x276   : > { %3278 = vpow2.f32 %v1065_v39 }
 0x277   : > { %3280 = vpow2.f32 %v1063_v40  ;;  %v2896_v42 = vpop.f32.mrb[80].mxu0 }
 0x278   : > { %v3275_v43 = vpop.eup %3274  ;;  %v4274_v45 = vadd.f32 %v2896_v42, %v4143_v9  ;;  %v924_v46 = vpop.f32.mrb[81].mxu0 }
 0x279   : > { %v3277_v47 = vpop.eup %3276  ;;  %v4277_v48 = vadd.f32 %v4143_v9, %v924_v46  ;;  %1157 = vrot.lane.b32.xlu1 %v3275_v43, %s3704_s13 }
 0x27a   : > { %v1020_v49 = vmul.f32 0.5, %v4274_v45  ;;  %2520 = vst [vmem:[%s4157_s25 + $0x88] sm:$0xff] %v4274_v45  ;;  %1155 = vrot.lane.b32.xlu0 %v3277_v47, %s3704_s13 }
 0x27b   : > { %v1019_v50 = vmul.f32 0.5, %v4277_v48  ;;  %2519 = vst [vmem:[%s4157_s25 + $0x80] sm:$0xff] %v4277_v48 }
 0x27c   : > { %v1069_v52 = vmul.f32 1.442695, %v1020_v49 }
 0x27d   : > { %v1067_v53 = vmul.f32 1.442695, %v1019_v50 }
 0x27e   : > { %3282 = vpow2.f32 %v1069_v52 }
 0x27f   : > { %3284 = vpow2.f32 %v1067_v53  ;;  %v2899_v55 = vpop.f32.mrb[82].mxu0 }
 0x280   : > { %v3279_v56 = vpop.eup %3278  ;;  %v4288_v57 = vadd.f32 %v2899_v55, %v4143_v9  ;;  %v934_v58 = vpop.f32.mrb[83].mxu0 }
 0x281   : > { %v3281_v59 = vpop.eup %3280  ;;  %v4291_v60 = vadd.f32 %v4143_v9, %v934_v58  ;;  %1161 = vrot.lane.b32.xlu1 %v3279_v56, %s3704_s13 }
 0x282   : > { %v1022_v61 = vmul.f32 0.5, %v4288_v57  ;;  %2522 = vst [vmem:[%s4157_s25 + $0x98] sm:$0xff] %v4288_v57  ;;  %1159 = vrot.lane.b32.xlu0 %v3281_v59, %s3704_s13 }
 0x283   : > { %v1021_v63 = vmul.f32 0.5, %v4291_v60  ;;  %2521 = vst [vmem:[%s4157_s25 + $0x90] sm:$0xff] %v4291_v60 }
 0x284   : > { %v1073_v0 = vmul.f32 1.442695, %v1022_v61 }
 0x285   : > { %v1071_v2 = vmul.f32 1.442695, %v1021_v63 }
 0x286   : > { %3286 = vpow2.f32 %v1073_v0 }
 0x287   : > { %3288 = vpow2.f32 %v1071_v2  ;;  %v2902_v3 = vpop.f32.mrb[84].mxu0 }
 0x288   : > { %v3283_v4 = vpop.eup %3282  ;;  %v4302_v5 = vadd.f32 %v2902_v3, %v4143_v9  ;;  %v944_v6 = vpop.f32.mrb[85].mxu0 }
 0x289   : > { %v3285_v7 = vpop.eup %3284  ;;  %v4305_v10 = vadd.f32 %v4143_v9, %v944_v6  ;;  %1165 = vrot.lane.b32.xlu1 %v3283_v4, %s3704_s13 }
 0x28a   : > { %v1024_v11 = vmul.f32 0.5, %v4302_v5  ;;  %2524 = vst [vmem:[%s4157_s25 + $0xa8] sm:$0xff] %v4302_v5  ;;  %1163 = vrot.lane.b32.xlu0 %v3285_v7, %s3704_s13 }
 0x28b   : > { %v1023_v13 = vmul.f32 0.5, %v4305_v10  ;;  %2523 = vst [vmem:[%s4157_s25 + $0xa0] sm:$0xff] %v4305_v10 }
 0x28c   : > { %v1077_v14 = vmul.f32 1.442695, %v1024_v11 }
 0x28d   : > { %v1075_v15 = vmul.f32 1.442695, %v1023_v13 }
 0x28e   : > { %3290 = vpow2.f32 %v1077_v14 }
 0x28f   : > { %3292 = vpow2.f32 %v1075_v15  ;;  %v2905_v16 = vpop.f32.mrb[86].mxu0 }
 0x290   : > { %v3287_v17 = vpop.eup %3286  ;;  %v4316_v18 = vadd.f32 %v2905_v16, %v4143_v9  ;;  %v954_v22 = vpop.f32.mrb[87].mxu0 }
 0x291   : > { %v3289_v23 = vpop.eup %3288  ;;  %v4319_v25 = vadd.f32 %v4143_v9, %v954_v22  ;;  %1169 = vrot.lane.b32.xlu1 %v3287_v17, %s3704_s13 }
 0x292   : > { %v1026_v26 = vmul.f32 0.5, %v4316_v18  ;;  %2526 = vst [vmem:[%s4157_s25 + $0xb8] sm:$0xff] %v4316_v18  ;;  %1167 = vrot.lane.b32.xlu0 %v3289_v23, %s3704_s13 }
 0x293   : > { %v1025_v27 = vmul.f32 0.5, %v4319_v25  ;;  %2525 = vst [vmem:[%s4157_s25 + $0xb0] sm:$0xff] %v4319_v25 }
 0x294   : > { %v1081_v28 = vmul.f32 1.442695, %v1026_v26 }
 0x295   : > { %v1079_v29 = vmul.f32 1.442695, %v1025_v27 }
 0x296   : > { %3294 = vpow2.f32 %v1081_v28 }
 0x297   : > { %3296 = vpow2.f32 %v1079_v29  ;;  %v2908_v30 = vpop.f32.mrb[0].mxu1 }
 0x298   : > { %v3291_v32 = vpop.eup %3290  ;;  %v4330_v34 = vadd.f32 %v2908_v30, %v4143_v9  ;;  %v964_v37 = vpop.f32.mrb[1].mxu1 }
 0x299   : > { %v3293_v38 = vpop.eup %3292  ;;  %v4333_v39 = vadd.f32 %v4143_v9, %v964_v37  ;;  %1173 = vrot.lane.b32.xlu1 %v3291_v32, %s3704_s13  ;;  %v425_v37 = vld [vmem:[%s4389_s10] sm:$0xff] }
 0x29a   : > { %v1028_v40 = vmul.f32 0.5, %v4330_v34  ;;  %2528 = vst [vmem:[%s4157_s25 + $0xc8] sm:$0xff] %v4330_v34  ;;  %1171 = vrot.lane.b32.xlu0 %v3293_v38, %s3704_s13  ;;  %v1660_v38 = vld [vmem:[%s5395_s5 + $0x8] sm:$0xff] }
 0x29b   : > { %v1027_v42 = vmul.f32 0.5, %v4333_v39  ;;  %2527 = vst [vmem:[%s4157_s25 + $0xc0] sm:$0xff] %v4333_v39 }
 0x29c   : > { %v1085_v43 = vmul.f32 1.442695, %v1028_v40  ;;  %v1662_v40 = vld [vmem:[%s5395_s5 + $0x18] sm:$0xff] }
 0x29d   : > { %v1083_v46 = vmul.f32 1.442695, %v1027_v42  ;;  %v3078_v42 = vpack.c.bf16 %v1662_v40, %v1660_v38  ;;  %v430_v38 = vld [vmem:[%s4389_s10 + $0x28] sm:$0xff]  ;;  %v429_v40 = vld [vmem:[%s4389_s10 + $0x20] sm:$0xff] }
 0x29e   : > { %3298 = vpow2.f32 %v1085_v43 }
 0x29f   : > { %3300 = vpow2.f32 %v1083_v46  ;;  %v2911_v47 = vpop.f32.mrb[2].mxu1  ;;  %3079 = vmatprep.subr.bf16.mxu1 %v3078_v42 }
 0x2a0   : > { %v3295_v49 = vpop.eup %3294  ;;  %v4344_v50 = vadd.f32 %v2911_v47, %v4143_v9  ;;  %v974_v52 = vpop.f32.mrb[3].mxu1  ;;  %v426_v47 = vld [vmem:[%s4389_s10 + $0x8] sm:$0xff] }
 0x2a1   : > { %v3297_v53 = vpop.eup %3296  ;;  %v4347_v55 = vadd.f32 %v4143_v9, %v974_v52  ;;  %1177 = vrot.lane.b32.xlu1 %v3295_v49, %s3704_s13  ;;  %v1659_v52 = vld [vmem:[%s5395_s5] sm:$0xff] }
 0x2a2   : > { %v1030_v56 = vmul.f32 0.5, %v4344_v50  ;;  %2530 = vst [vmem:[%s4157_s25 + $0xd8] sm:$0xff] %v4344_v50  ;;  %1175 = vrot.lane.b32.xlu0 %v3297_v53, %s3704_s13  ;;  %v1661_v53 = vld [vmem:[%s5395_s5 + $0x10] sm:$0xff] }
 0x2a3   : > { %v1029_v58 = vmul.f32 0.5, %v4347_v55  ;;  %2529 = vst [vmem:[%s4157_s25 + $0xd0] sm:$0xff] %v4347_v55 }
 0x2a4   : > { %v1089_v59 = vmul.f32 1.442695, %v1030_v56 }
 0x2a5   : > { %v1087_v61 = vmul.f32 1.442695, %v1029_v58 }
 0x2a6   : > { %3302 = vpow2.f32 %v1089_v59  ;;  %v1664_v59 = vld [vmem:[%s5395_s5 + $0x28] sm:$0xff] }
 0x2a7   : > { %3304 = vpow2.f32 %v1087_v61  ;;  %v2914_v63 = vpop.f32.mrb[4].mxu1  ;;  %v1666_v61 = vld [vmem:[%s5395_s5 + $0x38] sm:$0xff] }
 0x2a8   : > { %v3299_v0 = vpop.eup %3298  ;;  %v4358_v2 = vadd.f32 %v2914_v63, %v4143_v9  ;;  %v984_v3 = vpop.f32.mrb[5].mxu1 }
 0x2a9   : > { %v3301_v4 = vpop.eup %3300  ;;  %v4361_v6 = vadd.f32 %v4143_v9, %v984_v3  ;;  %1181 = vrot.lane.b32.xlu1 %v3299_v0, %s3704_s13  ;;  %v427_v0 = vld [vmem:[%s4389_s10 + $0x10] sm:$0xff]  ;;  %v3080_v3 = vpack.c.bf16 %v1661_v53, %v1659_v52  ;;  %v1671_v52 = vld [vmem:[%s5395_s5 + $0x60] sm:$0xff] }
 0x2aa   : > { %v1032_v7 = vmul.f32 0.5, %v4358_v2  ;;  %2532 = vst [vmem:[%s4157_s25 + $0xe8] sm:$0xff] %v4358_v2  ;;  %1179 = vrot.lane.b32.xlu0 %v3301_v4, %s3704_s13  ;;  %v1673_v53 = vld [vmem:[%s5395_s5 + $0x70] sm:$0xff] }
 0x2ab   : > { %v1031_v11 = vmul.f32 0.5, %v4361_v6  ;;  %2531 = vst [vmem:[%s4157_s25 + $0xe0] sm:$0xff] %v4361_v6 }
 0x2ac   : > { %v1093_v13 = vmul.f32 1.442695, %v1032_v7  ;;  %v3082_v7 = vpack.c.bf16 %v1666_v61, %v1664_v59  ;;  %v1678_v59 = vld [vmem:[%s5395_s5 + $0x98] sm:$0xff] }
 0x2ad   : > { %v1091_v14 = vmul.f32 1.442695, %v1031_v11  ;;  %v1663_v11 = vld [vmem:[%s5395_s5 + $0x20] sm:$0xff] }
 0x2ae   : > { %3306 = vpow2.f32 %v1093_v13  ;;  %v1665_v13 = vld [vmem:[%s5395_s5 + $0x30] sm:$0xff] }
 0x2af   : > { %3308 = vpow2.f32 %v1091_v14  ;;  %v2917_v15 = vpop.f32.mrb[6].mxu1 }
 0x2b0   : > { %v3303_v16 = vpop.eup %3302  ;;  %v4373_v17 = vadd.f32 %v2917_v15, %v4143_v9  ;;  %v994_v22 = vpop.f32.mrb[7].mxu1  ;;  %v1668_v15 = vld [vmem:[%s5395_s5 + $0x48] sm:$0xff] }
 0x2b1   : > { %v3305_v23 = vpop.eup %3304  ;;  %v4376_v26 = vadd.f32 %v4143_v9, %v994_v22  ;;  %1185 = vrot.lane.b32.xlu1 %v3303_v16, %s3704_s13  ;;  %v1670_v16 = vld [vmem:[%s5395_s5 + $0x58] sm:$0xff] }
 0x2b2   : > { %v1034_v27 = vmul.f32 0.5, %v4373_v17  ;;  %2534 = vst [vmem:[%s4157_s25 + $0xf8] sm:$0xff] %v4373_v17  ;;  %1183 = vrot.lane.b32.xlu0 %v3305_v23, %s3704_s13  ;;  %v428_v22 = vld [vmem:[%s4389_s10 + $0x18] sm:$0xff]  ;;  %v3084_v23 = vpack.c.bf16 %v1665_v13, %v1663_v11  ;;  %v431_v11 = vld [vmem:[%s4389_s10 + $0x30] sm:$0xff] }
 0x2b3   : > { %v1033_v28 = vmul.f32 0.5, %v4376_v26  ;;  %2533 = vst [vmem:[%s4157_s25 + $0xf0] sm:$0xff] %v4376_v26  ;;  %s3600_s25 = scalar_lea.vmem %s5190_s19, 4096 }
 0x2b4   : > { %v1097_v29 = vmul.f32 1.442695, %v1034_v27  ;;  %p3601_p10 = scmp.ne.s32.totalorder %s5190_s19, %s3600_s25 }
 0x2b5   : > { %v1095_v30 = vmul.f32 1.442695, %v1033_v28  ;;  %v3086_v28 = vpack.c.bf16 %v1670_v16, %v1668_v15 }
 0x2b6   : > { %3310 = vpow2.f32 %v1097_v29  ;;  %v1667_v29 = vld [vmem:[%s5395_s5 + $0x40] sm:$0xff]  ;;  %p3602_p12 = pnand %p3601_p10, %p5460_p11 }
 0x2b7   : > { %3312 = vpow2.f32 %v1095_v30  ;;  %v1669_v30 = vld [vmem:[%s5395_s5 + $0x50] sm:$0xff] }
 0x2b8   : > { %v3307_v9 = vpop.eup %3306  ;;  %v3088_v42 = vpack.c.bf16 %v1669_v30, %v1667_v29  ;;  %v1686_v29 = vld [vmem:[%s5395_s5 + $0xd8] sm:$0xff]  ;;  %p3603_p8 = pneg %p3602_p12 }
 0x2b9   : > { %v3309_v32 = vpop.eup %3308  ;;  %1189 = vrot.lane.b32.xlu1 %v3307_v9, %s3704_s13 }
 0x2ba   : > { %1187 = vrot.lane.b32.xlu0 %v3309_v32, %s3704_s13  ;;  %v1672_v32 = vld [vmem:[%s5395_s5 + $0x68] sm:$0xff] }
 0x2bc   : > { %v1132_v43 = vpop.permute.xlu0 %1131 }
 0x2bd   : > { %v1227_v46 = vmul.f32 %v1132_v43, %v425_v37  ;;  %v1674_v37 = vld [vmem:[%s5395_s5 + $0x78] sm:$0xff] }
 0x2bf   : > { %v1259_v49 = vadd.f32 %v1227_v46, %v4155_v21  ;;  %v3090_v46 = vpack.c.bf16 %v1674_v37, %v1672_v32 }
 0x2c0   : > { %v3311_v56 = vpop.eup %3310  ;;  %v1134_v58 = vpop.permute.xlu0 %1133 }
 0x2c1   : > { %v3313_v63 = vpop.eup %3312  ;;  %v1228_v21 = vmul.f32 %v1134_v58, %v426_v47  ;;  %1193 = vrot.lane.b32.xlu1 %v3311_v56, %s3704_s13  ;;  %2934 = vmatprep.mubr.msk.f32.mxu1 %vm1305_vm0, %v1259_v49 }
 0x2c2   : > { %1191 = vrot.lane.b32.xlu0 %v3313_v63, %s3704_s13  ;;  %s3706_s13 = smov [#allocation6]  }
 0x2c3   : > { %v1260_v4 = vadd.f32 %v1228_v21, %v4152_v19  ;;  %v3092_v21 = vpack.c.bf16 %v1673_v53, %v1671_v52  ;;  %v436_v53 = vld [vmem:[%s4389_s10 + $0x58] sm:$0xff]  ;;  %s3604_s15 = sshll.u32 %s3706_s13, 4  ;;  %s3605_s15 = int_to_ptr.vmem [resolvable:$false] %s3604_s15 }
 0x2c4   : > { %v1136_v14 = vpop.permute.xlu1 %1135  ;;  %p3607_p9 = scmp.lt.s32.totalorder %s5190_s19, %s3605_s15 }
 0x2c5   : > { %v1229_v19 = vmul.f32 %v1136_v14, %v427_v0  ;;  %2935 = vmatmul.mubr.msk.f32.vlgmr.msra.gmra.mrb[8].mxu1 %vm1305_vm0, %v1260_v4  ;;  %v1677_v4 = vld [vmem:[%s5395_s5 + $0x90] sm:$0xff] }
 0x2c6   : > { %3081 = vmatpush1.bf16.msra.mxu1 %v3080_v3  ;;  %v1675_v3 = vld [vmem:[%s5395_s5 + $0x80] sm:$0xff] }
 0x2c7   : > { %v1261_v27 = vadd.f32 %v1229_v19, %v4181_v35  ;;  %3083 = vmatprep.subr.bf16.mxu1 %v3082_v7  ;;  %v432_v7 = vld [vmem:[%s4389_s10 + $0x38] sm:$0xff]  ;;  %v3096_v14 = vpack.c.bf16 %v1677_v4, %v1675_v3 }
 0x2c8   : > { %v1138_v9 = vpop.permute.xlu1 %1137 }
 0x2c9   : > { %v1230_v35 = vmul.f32 %v1138_v9, %v428_v22  ;;  %2937 = vmatprep.mubr.msk.f32.mxu1 %vm1305_vm0, %v1261_v27  ;;  %v1679_v22 = vld [vmem:[%s5395_s5 + $0xa0] sm:$0xff] }
 0x2ca   : > { %3085 = vmatpush1.bf16.msra.mxu1 %v3084_v23  ;;  %v1681_v23 = vld [vmem:[%s5395_s5 + $0xb0] sm:$0xff] }
 0x2cb   : > { %v1262_v43 = vadd.f32 %v1230_v35, %v4178_v33  ;;  %3087 = vmatprep.subr.bf16.mxu1 %v3086_v28  ;;  %v1676_v33 = vld [vmem:[%s5395_s5 + $0x88] sm:$0xff]  ;;  %v3100_v9 = vpack.c.bf16 %v1681_v23, %v1679_v22  ;;  %v1683_v35 = vld [vmem:[%s5395_s5 + $0xc0] sm:$0xff] }
 0x2cc   : > { %v1142_v47 = vpop.permute.xlu1 %1141  ;;  %v1140_v49 = vpop.permute.xlu0 %1139  ;;  %v3094_v0 = vpack.c.bf16 %v1678_v59, %v1676_v33  ;;  %v1684_v28 = vld [vmem:[%s5395_s5 + $0xc8] sm:$0xff] }
 0x2cd   : > { %v1232_v56 = vmul.f32 %v1142_v47, %v430_v38  ;;  %v1231_v58 = vmul.f32 %v1140_v49, %v429_v40  ;;  %2938 = vmatmul.mubr.msk.f32.gmra.mrb[10].mxu1 %vm1305_vm0, %v1262_v43  ;;  %v3102_v37 = vpack.c.bf16 %v1686_v29, %v1684_v28  ;;  %v1685_v38 = vld [vmem:[%s5395_s5 + $0xd0] sm:$0xff]  ;;  %v434_v40 = vld [vmem:[%s4389_s10 + $0x48] sm:$0xff] }
 0x2ce   : > { %3089 = vmatpush1.bf16.msra.mxu1 %v3088_v42 }
 0x2cf   : > { %v1264_v61 = vadd.f32 %v1232_v56, %v4190_v41  ;;  %v1263_v63 = vadd.f32 %v1231_v58, %v4193_v44  ;;  %3091 = vmatprep.subr.bf16.mxu1 %v3090_v46  ;;  %v1680_v41 = vld [vmem:[%s5395_s5 + $0xa8] sm:$0xff]  ;;  %v1682_v44 = vld [vmem:[%s5395_s5 + $0xb8] sm:$0xff]  ;;  %v435_v56 = vld [vmem:[%s4389_s10 + $0x50] sm:$0xff] }
 0x2d0   : > { %v3098_v19 = vpack.c.bf16 %v1682_v44, %v1680_v41 }
 0x2d1   : > { %2940 = vmatprep.mubr.msk.f32.mxu1 %vm1305_vm0, %v1263_v63 }
 0x2d2   : > { %2941 = vmatmul.mubr.msk.f32.gmra.mrb[12].mxu1 %vm1305_vm0, %v1264_v61 }
 0x2d3   : > { %v1146_v13 = vpop.permute.xlu1 %1145  ;;  %3093 = vmatpush1.bf16.msra.mxu1 %v3092_v21  ;;  %v438_v21 = vld [vmem:[%s4389_s10 + $0x68] sm:$0xff] }
 0x2d4   : > { %v1234_v15 = vmul.f32 %v1146_v13, %v432_v7  ;;  %v1144_v16 = vpop.permute.xlu0 %1143  ;;  %3095 = vmatprep.subr.bf16.mxu1 %v3094_v0 }
 0x2d5   : > { %v1233_v27 = vmul.f32 %v1144_v16, %v431_v11 }
 0x2d6   : > { %v1266_v32 = vadd.f32 %v1234_v15, %v4204_v51  ;;  %v3104_v51 = vpack.c.bf16 %v1685_v38, %v1683_v35 }
 0x2d7   : > { %v1265_v30 = vadd.f32 %v1233_v27, %v4207_v54  ;;  %3097 = vmatpush1.bf16.msra.mxu1 %v3096_v14  ;;  %v433_v54 = vld [vmem:[%s4389_s10 + $0x40] sm:$0xff] }
 0x2d8   : > { %3099 = vmatprep.subr.bf16.mxu1 %v3098_v19 }
 0x2d9   : > { %2943 = vmatprep.mubr.msk.f32.mxu1 %vm1305_vm0, %v1265_v30 }
 0x2da   : > { %2944 = vmatmul.mubr.msk.f32.gmra.mrb[14].mxu1 %vm1305_vm0, %v1266_v32 }
 0x2db   : > { %v1150_v42 = vpop.permute.xlu1 %1149  ;;  %3101 = vmatpush1.bf16.msra.mxu1 %v3100_v9 }
 0x2dc   : > { %v1236_v43 = vmul.f32 %v1150_v42, %v434_v40  ;;  %v1148_v46 = vpop.permute.xlu0 %1147  ;;  %3103 = vmatprep.subr.bf16.mxu1 %v3102_v37 }
 0x2dd   : > { %v1235_v47 = vmul.f32 %v1148_v46, %v433_v54 }
 0x2de   : > { %v1268_v52 = vadd.f32 %v1236_v43, %v4218_v62  ;;  %v437_v62 = vld [vmem:[%s4389_s10 + $0x60] sm:$0xff] }
 0x2df   : > { %v1267_v49 = vadd.f32 %v1235_v47, %v4221_v1  ;;  %3105 = vmatpush1.bf16.msra.mxu1 %v3104_v51 }
 0x2e1   : > { %2946 = vmatprep.mubr.msk.f32.mxu1 %vm1305_vm0, %v1267_v49 }
 0x2e2   : > { %2947 = vmatmul.mubr.msk.f32.gmra.mrb[16].mxu1 %vm1305_vm0, %v1268_v52 }
 0x2e3   : > { %v1154_v58 = vpop.permute.xlu1 %1153 }
 0x2e4   : > { %v1238_v33 = vmul.f32 %v1154_v58, %v436_v53  ;;  %v1152_v59 = vpop.permute.xlu0 %1151 }
 0x2e5   : > { %v1237_v61 = vmul.f32 %v1152_v59, %v435_v56  ;;  %v450_v59 = vld [vmem:[%s4389_s10 + $0xc8] sm:$0xff] }
 0x2e6   : > { %v1270_v1 = vadd.f32 %v1238_v33, %v4232_v8  ;;  %v439_v8 = vld [vmem:[%s4389_s10 + $0x70] sm:$0xff] }
 0x2e7   : > { %v1269_v63 = vadd.f32 %v1237_v61, %v4235_v12  ;;  %v440_v12 = vld [vmem:[%s4389_s10 + $0x78] sm:$0xff] }
 0x2e9   : > { %2949 = vmatprep.mubr.msk.f32.mxu1 %vm1305_vm0, %v1269_v63 }
 0x2ea   : > { %2950 = vmatmul.mubr.msk.f32.gmra.mrb[18].mxu1 %vm1305_vm0, %v1270_v1  ;;  %v1688_v1 = vld [vmem:[%s5395_s5 + $0xe8] sm:$0xff] }
 0x2eb   : > { %v1158_v0 = vpop.permute.xlu1 %1157 }
 0x2ec   : > { %v1240_v3 = vmul.f32 %v1158_v0, %v438_v21  ;;  %v1156_v4 = vpop.permute.xlu0 %1155  ;;  %v1689_v0 = vld [vmem:[%s5395_s5 + $0xf0] sm:$0xff] }
 0x2ed   : > { %v1239_v7 = vmul.f32 %v1156_v4, %v437_v62 }
 0x2ee   : > { %v1272_v44 = vadd.f32 %v1240_v3, %v4246_v20  ;;  %v441_v20 = vld [vmem:[%s4389_s10 + $0x80] sm:$0xff] }
 0x2ef   : > { %v1271_v41 = vadd.f32 %v1239_v7, %v4249_v24  ;;  %v442_v24 = vld [vmem:[%s4389_s10 + $0x88] sm:$0xff] }
 0x2f1   : > { %2952 = vmatprep.mubr.msk.f32.mxu1 %vm1305_vm0, %v1271_v41  ;;  %v452_v41 = vld [vmem:[%s4389_s10 + $0xd8] sm:$0xff] }
 0x2f2   : > { %2953 = vmatmul.mubr.msk.f32.gmra.mrb[20].mxu1 %vm1305_vm0, %v1272_v44  ;;  %v451_v44 = vld [vmem:[%s4389_s10 + $0xd0] sm:$0xff] }
 0x2f3   : > { %v1162_v11 = vpop.permute.xlu1 %1161 }
 0x2f4   : > { %v1242_v13 = vmul.f32 %v1162_v11, %v440_v12  ;;  %v1160_v14 = vpop.permute.xlu0 %1159 }
 0x2f5   : > { %v1241_v15 = vmul.f32 %v1160_v14, %v439_v8 }
 0x2f6   : > { %v1274_v19 = vadd.f32 %v1242_v13, %v4260_v31  ;;  %v443_v31 = vld [vmem:[%s4389_s10 + $0x90] sm:$0xff] }
 0x2f7   : > { %v1273_v16 = vadd.f32 %v1241_v15, %v4263_v36  ;;  %v444_v36 = vld [vmem:[%s4389_s10 + $0x98] sm:$0xff]  ;;  %v453_v15 = vld [vmem:[%s4389_s10 + $0xe0] sm:$0xff] }
 0x2f9   : > { %2955 = vmatprep.mubr.msk.f32.mxu1 %vm1305_vm0, %v1273_v16 }
 0x2fa   : > { %2956 = vmatmul.mubr.msk.f32.gmra.mrb[22].mxu1 %vm1305_vm0, %v1274_v19 }
 0x2fb   : > { %v1166_v22 = vpop.permute.xlu1 %1165 }
 0x2fc   : > { %v1244_v23 = vmul.f32 %v1166_v22, %v442_v24  ;;  %v1164_v27 = vpop.permute.xlu0 %1163 }
 0x2fd   : > { %v1243_v28 = vmul.f32 %v1164_v27, %v441_v20  ;;  %v456_v27 = vld [vmem:[%s4389_s10 + $0xf8] sm:$0xff] }
 0x2fe   : > { %v1276_v30 = vadd.f32 %v1244_v23, %v4274_v45  ;;  %v445_v45 = vld [vmem:[%s4389_s10 + $0xa0] sm:$0xff] }
 0x2ff   : > { %v1275_v29 = vadd.f32 %v1243_v28, %v4277_v48  ;;  %v446_v48 = vld [vmem:[%s4389_s10 + $0xa8] sm:$0xff] }
 0x301   : > { %2958 = vmatprep.mubr.msk.f32.mxu1 %vm1305_vm0, %v1275_v29 }
 0x302   : > { %2959 = vmatmul.mubr.msk.f32.gmra.mrb[24].mxu1 %vm1305_vm0, %v1276_v30 }
 0x303   : > { %v1170_v9 = vpop.permute.xlu1 %1169 }
 0x304   : > { %v1246_v32 = vmul.f32 %v1170_v9, %v444_v36  ;;  %v1168_v37 = vpop.permute.xlu0 %1167 }
 0x305   : > { %v1245_v35 = vmul.f32 %v1168_v37, %v443_v31 }
 0x306   : > { %v1278_v40 = vadd.f32 %v1246_v32, %v4288_v57  ;;  %v447_v57 = vld [vmem:[%s4389_s10 + $0xb0] sm:$0xff] }
 0x307   : > { %v1277_v38 = vadd.f32 %v1245_v35, %v4291_v60  ;;  %v448_v60 = vld [vmem:[%s4389_s10 + $0xb8] sm:$0xff] }
 0x309   : > { %2961 = vmatprep.mubr.msk.f32.mxu1 %vm1305_vm0, %v1277_v38 }
 0x30a   : > { %2962 = vmatmul.mubr.msk.f32.gmra.mrb[26].mxu1 %vm1305_vm0, %v1278_v40 }
 0x30b   : > { %v1174_v54 = vpop.permute.xlu1 %1173 }
 0x30c   : > { %v1248_v42 = vmul.f32 %v1174_v54, %v446_v48  ;;  %v1172_v51 = vpop.permute.xlu0 %1171 }
 0x30d   : > { %v1247_v43 = vmul.f32 %v1172_v51, %v445_v45 }
 0x30e   : > { %v1280_v47 = vadd.f32 %v1248_v42, %v4302_v5  ;;  %v449_v5 = vld [vmem:[%s4389_s10 + $0xc0] sm:$0xff] }
 0x30f   : > { %v1279_v46 = vadd.f32 %v1247_v43, %v4305_v10 }
 0x311   : > { %2964 = vmatprep.mubr.msk.f32.mxu1 %vm1305_vm0, %v1279_v46 }
 0x312   : > { %2965 = vmatmul.mubr.msk.f32.gmra.mrb[28].mxu1 %vm1305_vm0, %v1280_v47 }
 0x313   : > { %v1178_v49 = vpop.permute.xlu1 %1177 }
 0x314   : > { %v1250_v52 = vmul.f32 %v1178_v49, %v448_v60  ;;  %v1176_v53 = vpop.permute.xlu0 %1175 }
 0x315   : > { %v1249_v56 = vmul.f32 %v1176_v53, %v447_v57 }
 0x316   : > { %v1282_v33 = vadd.f32 %v1250_v52, %v4316_v18  ;;  %v1687_v18 = vld [vmem:[%s5395_s5 + $0xe0] sm:$0xff] }
 0x317   : > { %v1281_v58 = vadd.f32 %v1249_v56, %v4319_v25  ;;  %v1690_v25 = vld [vmem:[%s5395_s5 + $0xf8] sm:$0xff]  ;;  %v3108_v3 = vpack.c.bf16 %v1689_v0, %v1687_v18 }
 0x318   : > { %v3106_v62 = vpack.c.bf16 %v1690_v25, %v1688_v1 }
 0x319   : > { %2967 = vmatprep.mubr.msk.f32.mxu1 %vm1305_vm0, %v1281_v58 }
 0x31a   : > { %2968 = vmatmul.mubr.msk.f32.gmra.mrb[30].mxu1 %vm1305_vm0, %v1282_v33  ;;  %3107 = vmatprep.subr.bf16.mxu1 %v3106_v62 }
 0x31b   : > { %v1182_v10 = vpop.permute.xlu1 %1181  ;;  %3109 = vmatpush1.bf16.msra.mxu1 %v3108_v3 }
 0x31c   : > { %v1252_v61 = vmul.f32 %v1182_v10, %v450_v59  ;;  %v1180_v63 = vpop.permute.xlu0 %1179 }
 0x31d   : > { %v1251_v21 = vmul.f32 %v1180_v63, %v449_v5 }
 0x31e   : > { %v1284_v7 = vadd.f32 %v1252_v61, %v4330_v34  ;;  %v454_v34 = vld [vmem:[%s4389_s10 + $0xe8] sm:$0xff] }
 0x31f   : > { %v1283_v4 = vadd.f32 %v1251_v21, %v4333_v39 }
 0x321   : > { %2970 = vmatprep.mubr.msk.f32.mxu1 %vm1305_vm0, %v1283_v4 }
 0x322   : > { %2971 = vmatmul.mubr.msk.f32.gmra.mrb[32].mxu1 %vm1305_vm0, %v1284_v7 }
 0x323   : > { %v1186_v12 = vpop.permute.xlu1 %1185 }
 0x324   : > { %v1254_v8 = vmul.f32 %v1186_v12, %v452_v41  ;;  %v1184_v11 = vpop.permute.xlu0 %1183 }
 0x325   : > { %v1253_v13 = vmul.f32 %v1184_v11, %v451_v44 }
 0x326   : > { %v1286_v39 = vadd.f32 %v1254_v8, %v4344_v50  ;;  %v455_v50 = vld [vmem:[%s4389_s10 + $0xf0] sm:$0xff]  ;;  %s3606_s10 = scalar_lea.vmem %s3605_s15, 8192 }
 0x327   : > { %v1285_v14 = vadd.f32 %v1253_v13, %v4347_v55  ;;  %p3608_p13 = scmp.lt.s32.totalorder %s3606_s10, %s3600_s25 }
 0x329   : > { %2973 = vmatprep.mubr.msk.f32.mxu1 %vm1305_vm0, %v1285_v14  ;;  %p3609_p1 = por %p3608_p13, %p3607_p9 }
 0x32a   : > { %2974 = vmatmul.mubr.msk.f32.gmra.mrb[34].mxu1 %vm1305_vm0, %v1286_v39 }
 0x32b   : > { %v1190_v16 = vpop.permute.xlu1 %1189  ;;  %p3610_p3 = pnand %p3609_p1, %p3603_p8 }
 0x32c   : > { %v1256_v19 = vmul.f32 %v1190_v16, %v454_v34  ;;  %v1188_v24 = vpop.permute.xlu0 %1187 }
 0x32d   : > { %v1255_v20 = vmul.f32 %v1188_v24, %v453_v15 }
 0x32e   : > { %v1288_v23 = vadd.f32 %v1256_v19, %v4358_v2  ;;  %v4591_v2 = vld [vmem:[%s5396_s6 + $0x2] ss:$0 sm:$0xff] }
 0x32f   : > { %v1287_v22 = vadd.f32 %v1255_v20, %v4361_v6  ;;  %v3705_v6 = vmov 0.0  }
 0x331   : > { %2976 = vmatprep.mubr.msk.f32.mxu1 %vm1305_vm0, %v1287_v22 }
 0x332   : > { %2977 = vmatmul.mubr.msk.f32.gmra.mrb[36].mxu1 %vm1305_vm0, %v1288_v23 }
 0x333   : > { %v1194_v55 = vpop.permute.xlu1 %1193 }
 0x334   : > { %v1258_v28 = vmul.f32 %v1194_v55, %v456_v27  ;;  %v1192_v29 = vpop.permute.xlu0 %1191 }
 0x335   : > { %v1257_v30 = vmul.f32 %v1192_v29, %v455_v50 }
 0x336   : > { %v1290_v31 = vadd.f32 %v1258_v28, %v4373_v17 }
 0x337   : > { %v1289_v36 = vadd.f32 %v1257_v30, %v4376_v26 }
 0x339   : > { %2979 = vmatprep.mubr.msk.f32.mxu1 %vm1305_vm0, %v1289_v36 }
 0x33a   : > { %2980 = vmatmul.mubr.msk.f32.gmra.mrb[38].mxu1 %vm1305_vm0, %v1290_v31 }
 0x33b   : > { %1766 = vmatprep.mubr.f32.mxu1 %v3705_v6 }
 0x398   : > { %v2936_v9 = vpop.f32.mrb[8].mxu1 }
 0x399   : > { %v1468_v32 = vpop.f32.mrb[9].mxu1  ;;  %v1474_v26 = vadd.f32 %v2936_v9, %v4591_v2 }
 0x39a   : > { %v1469_v37 = vadd.f32 %v4591_v2, %v1468_v32 }
 0x39c   : > { %3314 = vtanh.f32 %v1469_v37 }
 0x39d   : > { %3316 = vtanh.f32 %v1474_v26 }
 0x3a0   : > { %v2939_v17 = vpop.f32.mrb[10].mxu1 }
 0x3a1   : > { %v1478_v35 = vpop.f32.mrb[11].mxu1  ;;  %v1484_v40 = vadd.f32 %v2939_v17, %v4591_v2 }
 0x3a2   : > { %v1479_v38 = vadd.f32 %v4591_v2, %v1478_v35 }
 0x3a4   : > { %3318 = vtanh.f32 %v1479_v38 }
 0x3a5   : > { %v2942_v48 = vpop.f32.mrb[12].mxu1  ;;  %3320 = vtanh.f32 %v1484_v40 }
 0x3a6   : > { %v3315_v45 = vpop.eup %3314  ;;  %v1488_v54 = vpop.f32.mrb[13].mxu1  ;;  %v1494_v43 = vadd.f32 %v2942_v48, %v4591_v2 }
 0x3a7   : > { %1767 = vmatmul.mubr.f32.vlgmr.msra.gmra.mrb[40].mxu1 %v3315_v45  ;;  %v1489_v42 = vadd.f32 %v4591_v2, %v1488_v54  ;;  %v3317_v51 = vpop.eup %3316 }
 0x3a8   : > { %1772 = vmatprep.mubr.f32.mxu1 %v3705_v6 }
 0x3a9   : > { %3322 = vtanh.f32 %v1489_v42 }
 0x3aa   : > { %3324 = vtanh.f32 %v1494_v43 }
 0x3ab   : > { %1773 = vmatmul.mubr.f32.gmra.mrb[42].mxu1 %v3317_v51 }
 0x3ac   : > { %1778 = vmatprep.mubr.f32.mxu1 %v3705_v6 }
 0x3ad   : > { %v2945_v46 = vpop.f32.mrb[14].mxu1 }
 0x3ae   : > { %v3319_v47 = vpop.eup %3318  ;;  %v1498_v60 = vpop.f32.mrb[15].mxu1  ;;  %v1504_v52 = vadd.f32 %v2945_v46, %v4591_v2 }
 0x3af   : > { %1779 = vmatmul.mubr.f32.gmra.mrb[44].mxu1 %v3319_v47  ;;  %v1499_v57 = vadd.f32 %v4591_v2, %v1498_v60  ;;  %v3321_v49 = vpop.eup %3320 }
 0x3b0   : > { %1784 = vmatprep.mubr.f32.mxu1 %v3705_v6 }
 0x3b1   : > { %3326 = vtanh.f32 %v1499_v57 }
 0x3b2   : > { %3328 = vtanh.f32 %v1504_v52 }
 0x3b3   : > { %1785 = vmatmul.mubr.f32.gmra.mrb[46].mxu1 %v3321_v49  ;;  %v3323_v56 = vpop.eup %3322 }
 0x3b4   : > { %1790 = vmatprep.mubr.f32.mxu1 %v3705_v6  ;;  %v3325_v59 = vpop.eup %3324 }
 0x3b5   : > { %v2948_v53 = vpop.f32.mrb[16].mxu1 }
 0x3b6   : > { %v1508_v58 = vpop.f32.mrb[17].mxu1  ;;  %v1514_v5 = vadd.f32 %v2948_v53, %v4591_v2 }
 0x3b7   : > { %1791 = vmatmul.mubr.f32.gmra.mrb[48].mxu1 %v3323_v56  ;;  %v1509_v33 = vadd.f32 %v4591_v2, %v1508_v58 }
 0x3b8   : > { %1796 = vmatprep.mubr.f32.mxu1 %v3705_v6 }
 0x3b9   : > { %3330 = vtanh.f32 %v1509_v33 }
 0x3ba   : > { %3332 = vtanh.f32 %v1514_v5 }
 0x3bb   : > { %1797 = vmatmul.mubr.f32.gmra.mrb[50].mxu1 %v3325_v59  ;;  %v3327_v61 = vpop.eup %3326 }
 0x3bc   : > { %1802 = vmatprep.mubr.f32.mxu1 %v3705_v6  ;;  %v3329_v25 = vpop.eup %3328 }
 0x3bd   : > { %v2951_v10 = vpop.f32.mrb[18].mxu1 }
 0x3be   : > { %v1518_v63 = vpop.f32.mrb[19].mxu1  ;;  %v1524_v18 = vadd.f32 %v2951_v10, %v4591_v2 }
 0x3bf   : > { %1803 = vmatmul.mubr.f32.gmra.mrb[52].mxu1 %v3327_v61  ;;  %v1519_v1 = vadd.f32 %v4591_v2, %v1518_v63 }
 0x3c0   : > { %1808 = vmatprep.mubr.f32.mxu1 %v3705_v6 }
 0x3c1   : > { %3334 = vtanh.f32 %v1519_v1 }
 0x3c2   : > { %3336 = vtanh.f32 %v1524_v18 }
 0x3c3   : > { %1809 = vmatmul.mubr.f32.gmra.mrb[54].mxu1 %v3329_v25  ;;  %v3331_v62 = vpop.eup %3330 }
 0x3c4   : > { %1814 = vmatprep.mubr.f32.mxu1 %v3705_v6  ;;  %v3333_v4 = vpop.eup %3332 }
 0x3c5   : > { %v2954_v21 = vpop.f32.mrb[20].mxu1 }
 0x3c6   : > { %v1528_v0 = vpop.f32.mrb[21].mxu1  ;;  %v1534_v7 = vadd.f32 %v2954_v21, %v4591_v2 }
 0x3c7   : > { %1815 = vmatmul.mubr.f32.gmra.mrb[56].mxu1 %v3331_v62  ;;  %v1529_v3 = vadd.f32 %v4591_v2, %v1528_v0  ;;  %v1692_v0 = vlaneseq }
 0x3c8   : > { %1820 = vmatprep.mubr.f32.mxu1 %v3705_v6 }
 0x3c9   : > { %3338 = vtanh.f32 %v1529_v3 }
 0x3ca   : > { %3340 = vtanh.f32 %v1534_v7 }
 0x3cb   : > { %1821 = vmatmul.mubr.f32.gmra.mrb[58].mxu1 %v3333_v4  ;;  %v3335_v44 = vpop.eup %3334  ;;  %v460_v4 = vld [vmem:[%s5396_s6 + $0x3] sm:$0x3] }
 0x3cc   : > { %1826 = vmatprep.mubr.f32.mxu1 %v3705_v6  ;;  %v3337_v11 = vpop.eup %3336 }
 0x3cd   : > { %v2957_v41 = vpop.f32.mrb[22].mxu1 }
 0x3ce   : > { %v1538_v12 = vpop.f32.mrb[23].mxu1  ;;  %v1544_v13 = vadd.f32 %v2957_v41, %v4591_v2 }
 0x3cf   : > { %1827 = vmatmul.mubr.f32.gmra.mrb[60].mxu1 %v3335_v44  ;;  %v1539_v8 = vadd.f32 %v4591_v2, %v1538_v12 }
 0x3d0   : > { %1832 = vmatprep.mubr.f32.mxu1 %v3705_v6 }
 0x3d1   : > { %3342 = vtanh.f32 %v1539_v8 }
 0x3d2   : > { %3344 = vtanh.f32 %v1544_v13 }
 0x3d3   : > { %1833 = vmatmul.mubr.f32.gmra.mrb[62].mxu1 %v3337_v11  ;;  %v3339_v39 = vpop.eup %3338 }
 0x3d4   : > { %1838 = vmatprep.mubr.f32.mxu1 %v3705_v6  ;;  %v3341_v16 = vpop.eup %3340 }
 0x3d5   : > { %v2960_v14 = vpop.f32.mrb[24].mxu1 }
 0x3d6   : > { %v1548_v34 = vpop.f32.mrb[25].mxu1  ;;  %v1554_v19 = vadd.f32 %v2960_v14, %v4591_v2 }
 0x3d7   : > { %1839 = vmatmul.mubr.f32.gmra.mrb[64].mxu1 %v3339_v39  ;;  %v1549_v15 = vadd.f32 %v4591_v2, %v1548_v34 }
 0x3d8   : > { %1844 = vmatprep.mubr.f32.mxu1 %v3705_v6 }
 0x3d9   : > { %3346 = vtanh.f32 %v1549_v15 }
 0x3da   : > { %3348 = vtanh.f32 %v1554_v19 }
 0x3db   : > { %1845 = vmatmul.mubr.f32.gmra.mrb[66].mxu1 %v3341_v16  ;;  %v3343_v20 = vpop.eup %3342 }
 0x3dc   : > { %1850 = vmatprep.mubr.f32.mxu1 %v3705_v6  ;;  %v3345_v27 = vpop.eup %3344 }
 0x3dd   : > { %v2963_v24 = vpop.f32.mrb[26].mxu1 }
 0x3de   : > { %v1558_v22 = vpop.f32.mrb[27].mxu1  ;;  %v1564_v50 = vadd.f32 %v2963_v24, %v4591_v2 }
 0x3df   : > { %1851 = vmatmul.mubr.f32.gmra.mrb[68].mxu1 %v3343_v20  ;;  %v1559_v23 = vadd.f32 %v4591_v2, %v1558_v22 }
 0x3e0   : > { %1856 = vmatprep.mubr.f32.mxu1 %v3705_v6 }
 0x3e1   : > { %3350 = vtanh.f32 %v1559_v23 }
 0x3e2   : > { %3352 = vtanh.f32 %v1564_v50 }
 0x3e3   : > { %1857 = vmatmul.mubr.f32.gmra.mrb[70].mxu1 %v3345_v27  ;;  %v3347_v28 = vpop.eup %3346 }
 0x3e4   : > { %1862 = vmatprep.mubr.f32.mxu1 %v3705_v6  ;;  %v3349_v36 = vpop.eup %3348 }
 0x3e5   : > { %v2966_v55 = vpop.f32.mrb[28].mxu1 }
 0x3e6   : > { %v1568_v29 = vpop.f32.mrb[29].mxu1  ;;  %v1574_v31 = vadd.f32 %v2966_v55, %v4591_v2 }
 0x3e7   : > { %1863 = vmatmul.mubr.f32.gmra.mrb[72].mxu1 %v3347_v28  ;;  %v1569_v30 = vadd.f32 %v4591_v2, %v1568_v29 }
 0x3e8   : > { %1868 = vmatprep.mubr.f32.mxu1 %v3705_v6 }
 0x3e9   : > { %3354 = vtanh.f32 %v1569_v30 }
 0x3ea   : > { %3356 = vtanh.f32 %v1574_v31 }
 0x3eb   : > { %1869 = vmatmul.mubr.f32.gmra.mrb[74].mxu1 %v3349_v36  ;;  %v3351_v32 = vpop.eup %3350 }
 0x3ec   : > { %1874 = vmatprep.mubr.f32.mxu1 %v3705_v6  ;;  %v3353_v17 = vpop.eup %3352 }
 0x3ed   : > { %v2969_v9 = vpop.f32.mrb[30].mxu1 }
 0x3ee   : > { %v1578_v37 = vpop.f32.mrb[31].mxu1  ;;  %v1584_v35 = vadd.f32 %v2969_v9, %v4591_v2 }
 0x3ef   : > { %1875 = vmatmul.mubr.f32.gmra.mrb[76].mxu1 %v3351_v32  ;;  %v1579_v26 = vadd.f32 %v4591_v2, %v1578_v37 }
 0x3f0   : > { %1880 = vmatprep.mubr.f32.mxu1 %v3705_v6 }
 0x3f1   : > { %3358 = vtanh.f32 %v1579_v26 }
 0x3f2   : > { %3360 = vtanh.f32 %v1584_v35 }
 0x3f3   : > { %1881 = vmatmul.mubr.f32.gmra.mrb[78].mxu1 %v3353_v17  ;;  %v3355_v40 = vpop.eup %3354 }
 0x3f4   : > { %1886 = vmatprep.mubr.f32.mxu1 %v3705_v6  ;;  %v3357_v54 = vpop.eup %3356 }
 0x3f5   : > { %v2972_v38 = vpop.f32.mrb[32].mxu1 }
 0x3f6   : > { %v1588_v48 = vpop.f32.mrb[33].mxu1  ;;  %v1594_v42 = vadd.f32 %v2972_v38, %v4591_v2 }
 0x3f7   : > { %1887 = vmatmul.mubr.f32.gmra.mrb[80].mxu1 %v3355_v40  ;;  %v1589_v45 = vadd.f32 %v4591_v2, %v1588_v48 }
 0x3f8   : > { %1892 = vmatprep.mubr.f32.mxu1 %v3705_v6 }
 0x3f9   : > { %3362 = vtanh.f32 %v1589_v45 }
 0x3fa   : > { %3364 = vtanh.f32 %v1594_v42 }
 0x3fb   : > { %1893 = vmatmul.mubr.f32.gmra.mrb[82].mxu1 %v3357_v54  ;;  %v3359_v43 = vpop.eup %3358 }
 0x3fc   : > { %1898 = vmatprep.mubr.f32.mxu1 %v3705_v6  ;;  %v3361_v60 = vpop.eup %3360 }
 0x3fd   : > { %v2975_v51 = vpop.f32.mrb[34].mxu1 }
 0x3fe   : > { %v1598_v46 = vpop.f32.mrb[35].mxu1  ;;  %v1604_v57 = vadd.f32 %v2975_v51, %v4591_v2 }
 0x3ff   : > { %1899 = vmatmul.mubr.f32.gmra.mrb[84].mxu1 %v3359_v43  ;;  %v1599_v47 = vadd.f32 %v4591_v2, %v1598_v46 }
 0x400   : > { %1904 = vmatprep.mubr.f32.mxu1 %v3705_v6 }
 0x401   : > { %3366 = vtanh.f32 %v1599_v47 }
 0x402   : > { %3368 = vtanh.f32 %v1604_v57 }
 0x403   : > { %1905 = vmatmul.mubr.f32.gmra.mrb[86].mxu1 %v3361_v60  ;;  %v3363_v52 = vpop.eup %3362 }
 0x404   : > { %1910 = vmatprep.mubr.f32.mxu1 %v3705_v6  ;;  %v3365_v58 = vpop.eup %3364 }
 0x405   : > { %v2978_v49 = vpop.f32.mrb[36].mxu1 }
 0x406   : > { %v1608_v53 = vpop.f32.mrb[37].mxu1  ;;  %v1614_v33 = vadd.f32 %v2978_v49, %v4591_v2 }
 0x407   : > { %1911 = vmatmul.mubr.f32.gmra.mrb[88].mxu1 %v3363_v52  ;;  %v1609_v56 = vadd.f32 %v4591_v2, %v1608_v53 }
 0x408   : > { %1916 = vmatprep.mubr.f32.mxu1 %v3705_v6 }
 0x409   : > { %3370 = vtanh.f32 %v1609_v56 }
 0x40a   : > { %3372 = vtanh.f32 %v1614_v33 }
 0x40b   : > { %1917 = vmatmul.mubr.f32.gmra.mrb[90].mxu1 %v3365_v58  ;;  %v3367_v5 = vpop.eup %3366 }
 0x40c   : > { %1922 = vmatprep.mubr.f32.mxu1 %v3705_v6  ;;  %v3369_v63 = vpop.eup %3368 }
 0x40d   : > { %v2981_v59 = vpop.f32.mrb[38].mxu1 }
 0x40e   : > { %v1618_v10 = vpop.f32.mrb[39].mxu1  ;;  %v1624_v1 = vadd.f32 %v2981_v59, %v4591_v2 }
 0x40f   : > { %1923 = vmatmul.mubr.f32.gmra.mrb[92].mxu1 %v3367_v5  ;;  %v1619_v61 = vadd.f32 %v4591_v2, %v1618_v10  ;;  %v1693_v2 = vshrl.u32 %v1692_v0, 7 }
 0x410   : > { %1928 = vmatprep.mubr.f32.mxu1 %v3705_v6 }
 0x411   : > { %3374 = vtanh.f32 %v1619_v61  ;;  %v1694_v3 = vsub.s32 0, %v1693_v2  ;;  %v1698_v7 = vsub.s32 1, %v1693_v2 }
 0x412   : > { %3376 = vtanh.f32 %v1624_v1 }
 0x413   : > { %1929 = vmatmul.mubr.f32.gmra.mrb[94].mxu1 %v3369_v63  ;;  %v3371_v25 = vpop.eup %3370  ;;  %v4659_v41 = vrot.slane %v460_v4, %v1694_v3  ;;  %v4661_v44 = vrot.slane %v460_v4, %v1698_v7 }
 0x414   : > { %1934 = vmatprep.mubr.f32.mxu1 %v3705_v6  ;;  %v3373_v18 = vpop.eup %3372 }
 0x417   : > { %1935 = vmatmul.mubr.f32.gmra.mrb[96].mxu1 %v3371_v25 }
 0x418   : > { %1940 = vmatprep.mubr.f32.mxu1 %v3705_v6 }
 0x41b   : > { %1941 = vmatmul.mubr.f32.gmra.mrb[98].mxu1 %v3373_v18  ;;  %v3375_v21 = vpop.eup %3374 }
 0x41c   : > { %1946 = vmatprep.mubr.f32.mxu1 %v3705_v6  ;;  %v3377_v62 = vpop.eup %3376 }
 0x41f   : > { %1947 = vmatmul.mubr.f32.gmra.mrb[100].mxu1 %v3375_v21 }
 0x420   : > { %1952 = vmatprep.mubr.f32.mxu1 %v3705_v6 }
 0x423   : > { %1953 = vmatmul.mubr.f32.gmra.mrb[102].mxu1 %v3377_v62 }
 0x47a   : > { %v1768_v12 = vpop.f32.mrb[40].mxu1 }
 0x47b   : > { %v4664_v8 = vadd.f32 %v1768_v12, %v4659_v41  ;;  %v1770_v11 = vpop.f32.mrb[41].mxu1 }
 0x47c   : > { %v4667_v6 = vadd.f32 %v1770_v11, %v4661_v44 }
 0x47e   : > { %v1774_v13 = vpop.f32.mrb[42].mxu1  ;;  %v1959_v14 = vmax.f32 %v4664_v8, %v4667_v6 }
 0x47f   : > { %v4672_v39 = vadd.f32 %v1774_v13, %v4659_v41  ;;  %v1776_v34 = vpop.f32.mrb[43].mxu1 }
 0x480   : > { %v4675_v15 = vadd.f32 %v1776_v34, %v4661_v44  ;;  %1960 = vmax.xlane.f32.xlu0 %v1959_v14 }
 0x482   : > { %v1780_v16 = vpop.f32.mrb[44].mxu1  ;;  %v1962_v19 = vmax.f32 %v4672_v39, %v4675_v15 }
 0x483   : > { %v4680_v24 = vadd.f32 %v1780_v16, %v4659_v41  ;;  %v1782_v20 = vpop.f32.mrb[45].mxu1 }
 0x484   : > { %v4683_v22 = vadd.f32 %v1782_v20, %v4661_v44  ;;  %1963 = vmax.xlane.f32.xlu1 %v1962_v19 }
 0x486   : > { %v1786_v23 = vpop.f32.mrb[46].mxu1  ;;  %v1965_v27 = vmax.f32 %v4680_v24, %v4683_v22 }
 0x487   : > { %v4688_v50 = vadd.f32 %v1786_v23, %v4659_v41  ;;  %v1788_v55 = vpop.f32.mrb[47].mxu1 }
 0x488   : > { %v4691_v28 = vadd.f32 %v1788_v55, %v4661_v44  ;;  %1966 = vmax.xlane.f32.xlu0 %v1965_v27 }
 0x48a   : > { %v1792_v29 = vpop.f32.mrb[48].mxu1  ;;  %v1968_v30 = vmax.f32 %v4688_v50, %v4691_v28 }
 0x48b   : > { %v4696_v36 = vadd.f32 %v1792_v29, %v4659_v41  ;;  %v1794_v31 = vpop.f32.mrb[49].mxu1 }
 0x48c   : > { %v4699_v9 = vadd.f32 %v1794_v31, %v4661_v44  ;;  %1969 = vmax.xlane.f32.xlu0 %v1968_v30 }
 0x48e   : > { %v1798_v32 = vpop.f32.mrb[50].mxu1  ;;  %v1971_v37 = vmax.f32 %v4696_v36, %v4699_v9 }
 0x48f   : > { %v4704_v26 = vadd.f32 %v1798_v32, %v4659_v41  ;;  %v1800_v17 = vpop.f32.mrb[51].mxu1 }
 0x490   : > { %v4707_v35 = vadd.f32 %v1800_v17, %v4661_v44  ;;  %1972 = vmax.xlane.f32.xlu1 %v1971_v37 }
 0x492   : > { %v1804_v38 = vpop.f32.mrb[52].mxu1  ;;  %v1974_v40 = vmax.f32 %v4704_v26, %v4707_v35 }
 0x493   : > { %v4712_v48 = vadd.f32 %v1804_v38, %v4659_v41  ;;  %v1806_v45 = vpop.f32.mrb[53].mxu1 }
 0x494   : > { %v4715_v54 = vadd.f32 %v1806_v45, %v4661_v44  ;;  %1975 = vmax.xlane.f32.xlu0 %v1974_v40 }
 0x496   : > { %v1810_v42 = vpop.f32.mrb[54].mxu1  ;;  %v1977_v51 = vmax.f32 %v4712_v48, %v4715_v54 }
 0x497   : > { %v4720_v43 = vadd.f32 %v1810_v42, %v4659_v41  ;;  %v1812_v46 = vpop.f32.mrb[55].mxu1 }
 0x498   : > { %v4723_v47 = vadd.f32 %v1812_v46, %v4661_v44  ;;  %1978 = vmax.xlane.f32.xlu1 %v1977_v51 }
 0x49a   : > { %v1816_v60 = vpop.f32.mrb[56].mxu1  ;;  %v1980_v57 = vmax.f32 %v4720_v43, %v4723_v47 }
 0x49b   : > { %v4728_v49 = vadd.f32 %v1816_v60, %v4659_v41  ;;  %v1818_v52 = vpop.f32.mrb[57].mxu1 }
 0x49c   : > { %v4731_v53 = vadd.f32 %v1818_v52, %v4661_v44  ;;  %1981 = vmax.xlane.f32.xlu0 %v1980_v57 }
 0x49e   : > { %v1822_v56 = vpop.f32.mrb[58].mxu1  ;;  %v1983_v58 = vmax.f32 %v4728_v49, %v4731_v53 }
 0x49f   : > { %v4736_v33 = vadd.f32 %v1822_v56, %v4659_v41  ;;  %v1824_v59 = vpop.f32.mrb[59].mxu1 }
 0x4a0   : > { %v4739_v5 = vadd.f32 %v1824_v59, %v4661_v44  ;;  %1984 = vmax.xlane.f32.xlu1 %v1983_v58 }
 0x4a2   : > { %v1828_v10 = vpop.f32.mrb[60].mxu1  ;;  %v1986_v61 = vmax.f32 %v4736_v33, %v4739_v5 }
 0x4a3   : > { %v4744_v63 = vadd.f32 %v1828_v10, %v4659_v41  ;;  %v1830_v1 = vpop.f32.mrb[61].mxu1 }
 0x4a4   : > { %v4747_v25 = vadd.f32 %v1830_v1, %v4661_v44  ;;  %1987 = vmax.xlane.f32.xlu0 %v1986_v61 }
 0x4a6   : > { %v1834_v18 = vpop.f32.mrb[62].mxu1  ;;  %v1989_v21 = vmax.f32 %v4744_v63, %v4747_v25 }
 0x4a7   : > { %v4752_v62 = vadd.f32 %v1834_v18, %v4659_v41  ;;  %v1836_v0 = vpop.f32.mrb[63].mxu1 }
 0x4a8   : > { %v4755_v2 = vadd.f32 %v1836_v0, %v4661_v44  ;;  %1990 = vmax.xlane.f32.xlu1 %v1989_v21 }
 0x4aa   : > { %v1840_v3 = vpop.f32.mrb[64].mxu1  ;;  %v1992_v4 = vmax.f32 %v4752_v62, %v4755_v2 }
 0x4ab   : > { %v4760_v7 = vadd.f32 %v1840_v3, %v4659_v41  ;;  %v1842_v12 = vpop.f32.mrb[65].mxu1 }
 0x4ac   : > { %v4763_v11 = vadd.f32 %v1842_v12, %v4661_v44  ;;  %1993 = vmax.xlane.f32.xlu0 %v1992_v4 }
 0x4ae   : > { %v1846_v13 = vpop.f32.mrb[66].mxu1  ;;  %v1995_v14 = vmax.f32 %v4760_v7, %v4763_v11 }
 0x4af   : > { %v4768_v34 = vadd.f32 %v1846_v13, %v4659_v41  ;;  %v1848_v16 = vpop.f32.mrb[67].mxu1 }
 0x4b0   : > { %v4771_v19 = vadd.f32 %v1848_v16, %v4661_v44  ;;  %1996 = vmax.xlane.f32.xlu1 %v1995_v14 }
 0x4b2   : > { %v1852_v20 = vpop.f32.mrb[68].mxu1  ;;  %v1998_v23 = vmax.f32 %v4768_v34, %v4771_v19 }
 0x4b3   : > { %v4776_v27 = vadd.f32 %v1852_v20, %v4659_v41  ;;  %v1854_v55 = vpop.f32.mrb[69].mxu1 }
 0x4b4   : > { %v4779_v29 = vadd.f32 %v1854_v55, %v4661_v44  ;;  %1999 = vmax.xlane.f32.xlu0 %v1998_v23 }
 0x4b6   : > { %v1858_v30 = vpop.f32.mrb[70].mxu1  ;;  %v2001_v31 = vmax.f32 %v4776_v27, %v4779_v29 }
 0x4b7   : > { %v4784_v32 = vadd.f32 %v1858_v30, %v4659_v41  ;;  %v1860_v37 = vpop.f32.mrb[71].mxu1 }
 0x4b8   : > { %v4787_v17 = vadd.f32 %v1860_v37, %v4661_v44  ;;  %2002 = vmax.xlane.f32.xlu1 %v2001_v31 }
 0x4ba   : > { %v1864_v38 = vpop.f32.mrb[72].mxu1  ;;  %v2004_v40 = vmax.f32 %v4784_v32, %v4787_v17 }
 0x4bb   : > { %v4792_v45 = vadd.f32 %v1864_v38, %v4659_v41  ;;  %v1866_v42 = vpop.f32.mrb[73].mxu1 }
 0x4bc   : > { %v4795_v51 = vadd.f32 %v1866_v42, %v4661_v44  ;;  %2005 = vmax.xlane.f32.xlu0 %v2004_v40 }
 0x4be   : > { %v1870_v46 = vpop.f32.mrb[74].mxu1  ;;  %v2007_v60 = vmax.f32 %v4792_v45, %v4795_v51 }
 0x4bf   : > { %v4800_v57 = vadd.f32 %v1870_v46, %v4659_v41  ;;  %v1872_v52 = vpop.f32.mrb[75].mxu1 }
 0x4c0   : > { %v4803_v56 = vadd.f32 %v1872_v52, %v4661_v44  ;;  %2008 = vmax.xlane.f32.xlu1 %v2007_v60 }
 0x4c2   : > { %v1876_v58 = vpop.f32.mrb[76].mxu1  ;;  %v2010_v59 = vmax.f32 %v4800_v57, %v4803_v56 }
 0x4c3   : > { %v4808_v10 = vadd.f32 %v1876_v58, %v4659_v41  ;;  %v1878_v61 = vpop.f32.mrb[77].mxu1 }
 0x4c4   : > { %v4811_v1 = vadd.f32 %v1878_v61, %v4661_v44  ;;  %2011 = vmax.xlane.f32.xlu0 %v2010_v59 }
 0x4c6   : > { %v1882_v18 = vpop.f32.mrb[78].mxu1  ;;  %v2013_v21 = vmax.f32 %v4808_v10, %v4811_v1 }
 0x4c7   : > { %v4816_v0 = vadd.f32 %v1882_v18, %v4659_v41  ;;  %v1884_v3 = vpop.f32.mrb[79].mxu1 }
 0x4c8   : > { %v4819_v4 = vadd.f32 %v1884_v3, %v4661_v44  ;;  %2014 = vmax.xlane.f32.xlu1 %v2013_v21 }
 0x4ca   : > { %v1888_v12 = vpop.f32.mrb[80].mxu1  ;;  %v2016_v13 = vmax.f32 %v4816_v0, %v4819_v4 }
 0x4cb   : > { %v4824_v14 = vadd.f32 %v1888_v12, %v4659_v41  ;;  %v1890_v16 = vpop.f32.mrb[81].mxu1 }
 0x4cc   : > { %v4827_v20 = vadd.f32 %v1890_v16, %v4661_v44  ;;  %2017 = vmax.xlane.f32.xlu0 %v2016_v13 }
 0x4ce   : > { %v1894_v23 = vpop.f32.mrb[82].mxu1  ;;  %v2019_v55 = vmax.f32 %v4824_v14, %v4827_v20 }
 0x4cf   : > { %v4832_v30 = vadd.f32 %v1894_v23, %v4659_v41  ;;  %v1896_v31 = vpop.f32.mrb[83].mxu1 }
 0x4d0   : > { %v4835_v37 = vadd.f32 %v1896_v31, %v4661_v44  ;;  %2020 = vmax.xlane.f32.xlu1 %v2019_v55 }
 0x4d2   : > { %v1900_v38 = vpop.f32.mrb[84].mxu1  ;;  %v2022_v40 = vmax.f32 %v4832_v30, %v4835_v37 }
 0x4d3   : > { %v4840_v42 = vadd.f32 %v1900_v38, %v4659_v41  ;;  %v1902_v46 = vpop.f32.mrb[85].mxu1 }
 0x4d4   : > { %v4843_v60 = vadd.f32 %v1902_v46, %v4661_v44  ;;  %2023 = vmax.xlane.f32.xlu0 %v2022_v40 }
 0x4d6   : > { %v1906_v52 = vpop.f32.mrb[86].mxu1  ;;  %v2025_v58 = vmax.f32 %v4840_v42, %v4843_v60 }
 0x4d7   : > { %v4848_v59 = vadd.f32 %v1906_v52, %v4659_v41  ;;  %v1908_v61 = vpop.f32.mrb[87].mxu1 }
 0x4d8   : > { %v4851_v18 = vadd.f32 %v1908_v61, %v4661_v44  ;;  %2026 = vmax.xlane.f32.xlu1 %v2025_v58 }
 0x4da   : > { %v1912_v21 = vpop.f32.mrb[88].mxu1  ;;  %v2028_v3 = vmax.f32 %v4848_v59, %v4851_v18 }
 0x4db   : > { %v4856_v12 = vadd.f32 %v1912_v21, %v4659_v41  ;;  %v1914_v13 = vpop.f32.mrb[89].mxu1 }
 0x4dc   : > { %v4859_v16 = vadd.f32 %v1914_v13, %v4661_v44  ;;  %2029 = vmax.xlane.f32.xlu0 %v2028_v3 }
 0x4de   : > { %5426 = vst [vmem:[#allocation11_spill] sm:$0xff] %v4859_v16  ;;  %v1918_v23 = vpop.f32.mrb[90].mxu1  ;;  %v2031_v55 = vmax.f32 %v4856_v12, %v4859_v16 }
 0x4df   : > { %v4864_v31 = vadd.f32 %v1918_v23, %v4659_v41  ;;  %v1920_v38 = vpop.f32.mrb[91].mxu1 }
 0x4e0   : > { %v4867_v40 = vadd.f32 %v1920_v38, %v4661_v44  ;;  %2032 = vmax.xlane.f32.xlu1 %v2031_v55 }
 0x4e1   : > { %5427 = vst [vmem:[#allocation12_spill] sm:$0xff] %v4864_v31 }
 0x4e2   : > { %5428 = vst [vmem:[#allocation13_spill] sm:$0xff] %v4867_v40  ;;  %v1924_v46 = vpop.f32.mrb[92].mxu1  ;;  %v2034_v52 = vmax.f32 %v4864_v31, %v4867_v40 }
 0x4e3   : > { %v4872_v58 = vadd.f32 %v1924_v46, %v4659_v41  ;;  %v1926_v61 = vpop.f32.mrb[93].mxu1 }
 0x4e4   : > { %v4875_v21 = vadd.f32 %v1926_v61, %v4661_v44  ;;  %2035 = vmax.xlane.f32.xlu0 %v2034_v52 }
 0x4e5   : > { %5429 = vst [vmem:[#allocation14_spill] sm:$0xff] %v4872_v58 }
 0x4e6   : > { %5430 = vst [vmem:[#allocation15_spill] sm:$0xff] %v4875_v21  ;;  %v1930_v3 = vpop.f32.mrb[94].mxu1  ;;  %v2037_v13 = vmax.f32 %v4872_v58, %v4875_v21 }
 0x4e7   : > { %v4880_v23 = vadd.f32 %v1930_v3, %v4659_v41  ;;  %v1932_v55 = vpop.f32.mrb[95].mxu1 }
 0x4e8   : > { %v4883_v38 = vadd.f32 %v1932_v55, %v4661_v44  ;;  %2038 = vmax.xlane.f32.xlu1 %v2037_v13 }
 0x4e9   : > { %5431 = vst [vmem:[#allocation16_spill] sm:$0xff] %v4880_v23 }
 0x4ea   : > { %5432 = vst [vmem:[#allocation17_spill] sm:$0xff] %v4883_v38  ;;  %v1936_v40 = vpop.f32.mrb[96].mxu1  ;;  %v2040_v46 = vmax.f32 %v4880_v23, %v4883_v38 }
 0x4eb   : > { %v4888_v61 = vadd.f32 %v1936_v40, %v4659_v41  ;;  %v1938_v52 = vpop.f32.mrb[97].mxu1 }
 0x4ec   : > { %v4891_v31 = vadd.f32 %v1938_v52, %v4661_v44  ;;  %2041 = vmax.xlane.f32.xlu0 %v2040_v46 }
 0x4ed   : > { %5433 = vst [vmem:[#allocation18_spill] sm:$0xff] %v4888_v61 }
 0x4ee   : > { %5434 = vst [vmem:[#allocation19_spill] sm:$0xff] %v4891_v31  ;;  %v1942_v21 = vpop.f32.mrb[98].mxu1  ;;  %v2043_v3 = vmax.f32 %v4888_v61, %v4891_v31 }
 0x4ef   : > { %v4896_v55 = vadd.f32 %v1942_v21, %v4659_v41  ;;  %v1944_v13 = vpop.f32.mrb[99].mxu1 }
 0x4f0   : > { %v4899_v58 = vadd.f32 %v1944_v13, %v4661_v44  ;;  %2044 = vmax.xlane.f32.xlu1 %v2043_v3 }
 0x4f1   : > { %5435 = vst [vmem:[#allocation20_spill] sm:$0xff] %v4896_v55 }
 0x4f2   : > { %5436 = vst [vmem:[#allocation21_spill] sm:$0xff] %v4899_v58  ;;  %v1948_v38 = vpop.f32.mrb[100].mxu1  ;;  %v2046_v40 = vmax.f32 %v4896_v55, %v4899_v58 }
 0x4f3   : > { %v4904_v52 = vadd.f32 %v1948_v38, %v4659_v41  ;;  %v1950_v46 = vpop.f32.mrb[101].mxu1 }
 0x4f4   : > { %v4907_v23 = vadd.f32 %v1950_v46, %v4661_v44  ;;  %2047 = vmax.xlane.f32.xlu0 %v2046_v40 }
 0x4f6   : > { %5437 = vst [vmem:[#allocation22_spill] sm:$0xff] %v4907_v23  ;;  %v1954_v31 = vpop.f32.mrb[102].mxu1  ;;  %v2049_v21 = vmax.f32 %v4904_v52, %v4907_v23 }
 0x4f7   : > { %v4912_v13 = vadd.f32 %v1954_v31, %v4659_v41  ;;  %v1956_v3 = vpop.f32.mrb[103].mxu1 }
 0x4f8   : > { %v4915_v61 = vadd.f32 %v1956_v3, %v4661_v44  ;;  %2050 = vmax.xlane.f32.xlu1 %v2049_v21 }
 0x4fa   : > { %5438 = vst [vmem:[#allocation23_spill] sm:$0xff] %v4915_v61  ;;  %v2052_v38 = vmax.f32 %v4912_v13, %v4915_v61 }
 0x4fc   : > { %2053 = vmax.xlane.f32.xlu0 %v2052_v38 }
 0x50d   : > { %v1961_v58 = vpop.xlane.xlu0 %1960 }
 0x50e   : > { %v2055_v46 = vsub.f32 %v4664_v8, %v1961_v58  ;;  %v2056_v40 = vsub.f32 %v4667_v6, %v1961_v58 }
 0x510   : > { %v2119_v55 = vmul.f32 1.442695, %v2055_v46  ;;  %v2121_v16 = vmul.f32 1.442695, %v2056_v40 }
 0x511   : > { %v1964_v23 = vpop.xlane.xlu1 %1963 }
 0x512   : > { %3378 = vpow2.f32 %v2119_v55  ;;  %v2057_v41 = vsub.f32 %v4672_v39, %v1964_v23  ;;  %v2058_v31 = vsub.f32 %v4675_v15, %v1964_v23 }
 0x513   : > { %3380 = vpow2.f32 %v2121_v16 }
 0x514   : > { %v2123_v44 = vmul.f32 1.442695, %v2057_v41  ;;  %v2125_v21 = vmul.f32 1.442695, %v2058_v31 }
 0x515   : > { %v1967_v3 = vpop.xlane.xlu0 %1966 }
 0x516   : > { %3382 = vpow2.f32 %v2123_v44  ;;  %v2059_v38 = vsub.f32 %v4680_v24, %v1967_v3  ;;  %v2060_v61 = vsub.f32 %v4683_v22, %v1967_v3 }
 0x517   : > { %3384 = vpow2.f32 %v2125_v21 }
 0x518   : > { %v2127_v8 = vmul.f32 1.442695, %v2059_v38  ;;  %v2129_v6 = vmul.f32 1.442695, %v2060_v61 }
 0x519   : > { %v1970_v58 = vpop.xlane.xlu0 %1969 }
 0x51a   : > { %3386 = vpow2.f32 %v2127_v8  ;;  %v2061_v55 = vsub.f32 %v4688_v50, %v1970_v58  ;;  %v2062_v39 = vsub.f32 %v4691_v28, %v1970_v58 }
 0x51b   : > { %3388 = vpow2.f32 %v2129_v6 }
 0x51c   : > { %v4927_v15 = vpop.eup %3378  ;;  %v2131_v16 = vmul.f32 1.442695, %v2061_v55  ;;  %v2133_v23 = vmul.f32 1.442695, %v2062_v39 }
 0x51d   : > { %v4929_v46 = vpop.eup %3380  ;;  %v1973_v40 = vpop.xlane.xlu1 %1972 }
 0x51e   : > { %3390 = vpow2.f32 %v2131_v16  ;;  %v2063_v24 = vsub.f32 %v4696_v36, %v1973_v40  ;;  %v2064_v22 = vsub.f32 %v4699_v9, %v1973_v40  ;;  %v2247_v61 = vadd.f32 %v4929_v46, %v4927_v15 }
 0x51f   : > { %3392 = vpow2.f32 %v2133_v23 }
 0x520   : > { %v4935_v50 = vpop.eup %3382  ;;  %v2135_v28 = vmul.f32 1.442695, %v2063_v24  ;;  %v2137_v41 = vmul.f32 1.442695, %v2064_v22  ;;  %2248 = vadd.xlane.f32.xlu1 %v2247_v61 }
 0x521   : > { %v4937_v31 = vpop.eup %3384  ;;  %v1976_v44 = vpop.xlane.xlu0 %1975 }
 0x522   : > { %3394 = vpow2.f32 %v2135_v28  ;;  %v2065_v21 = vsub.f32 %v4704_v26, %v1976_v44  ;;  %v2066_v3 = vsub.f32 %v4707_v35, %v1976_v44  ;;  %v2250_v36 = vadd.f32 %v4937_v31, %v4935_v50 }
 0x523   : > { %3396 = vpow2.f32 %v2137_v41 }
 0x524   : > { %v4943_v9 = vpop.eup %3386  ;;  %v2139_v38 = vmul.f32 1.442695, %v2065_v21  ;;  %v2141_v8 = vmul.f32 1.442695, %v2066_v3  ;;  %2251 = vadd.xlane.f32.xlu0 %v2250_v36 }
 0x525   : > { %v4945_v6 = vpop.eup %3388  ;;  %v1979_v58 = vpop.xlane.xlu1 %1978 }
 0x526   : > { %3398 = vpow2.f32 %v2139_v38  ;;  %v2067_v55 = vsub.f32 %v4712_v48, %v1979_v58  ;;  %v2068_v39 = vsub.f32 %v4715_v54, %v1979_v58  ;;  %v2253_v26 = vadd.f32 %v4945_v6, %v4943_v9 }
 0x527   : > { %3400 = vpow2.f32 %v2141_v8 }
 0x528   : > { %v4951_v35 = vpop.eup %3390  ;;  %v2143_v16 = vmul.f32 1.442695, %v2067_v55  ;;  %v2145_v23 = vmul.f32 1.442695, %v2068_v39  ;;  %2254 = vadd.xlane.f32.xlu1 %v2253_v26 }
 0x529   : > { %v4953_v40 = vpop.eup %3392  ;;  %v1982_v24 = vpop.xlane.xlu0 %1981 }
 0x52a   : > { %3402 = vpow2.f32 %v2143_v16  ;;  %v2069_v22 = vsub.f32 %v4720_v43, %v1982_v24  ;;  %v2070_v61 = vsub.f32 %v4723_v47, %v1982_v24  ;;  %v2256_v48 = vadd.f32 %v4953_v40, %v4951_v35 }
 0x52b   : > { %3404 = vpow2.f32 %v2145_v23 }
 0x52c   : > { %v4959_v54 = vpop.eup %3394  ;;  %v2147_v28 = vmul.f32 1.442695, %v2069_v22  ;;  %v2149_v41 = vmul.f32 1.442695, %v2070_v61  ;;  %2257 = vadd.xlane.f32.xlu0 %v2256_v48 }
 0x52d   : > { %v4961_v44 = vpop.eup %3396  ;;  %v1985_v21 = vpop.xlane.xlu1 %1984 }
 0x52e   : > { %3406 = vpow2.f32 %v2147_v28  ;;  %v2071_v3 = vsub.f32 %v4728_v49, %v1985_v21  ;;  %v2072_v36 = vsub.f32 %v4731_v53, %v1985_v21  ;;  %v2259_v43 = vadd.f32 %v4961_v44, %v4959_v54 }
 0x52f   : > { %3408 = vpow2.f32 %v2149_v41 }
 0x530   : > { %v4967_v47 = vpop.eup %3398  ;;  %v2151_v38 = vmul.f32 1.442695, %v2071_v3  ;;  %v2153_v8 = vmul.f32 1.442695, %v2072_v36  ;;  %2260 = vadd.xlane.f32.xlu1 %v2259_v43 }
 0x531   : > { %v4969_v58 = vpop.eup %3400  ;;  %v1988_v55 = vpop.xlane.xlu0 %1987 }
 0x532   : > { %3410 = vpow2.f32 %v2151_v38  ;;  %v2073_v39 = vsub.f32 %v4736_v33, %v1988_v55  ;;  %v2074_v26 = vsub.f32 %v4739_v5, %v1988_v55  ;;  %v2262_v49 = vadd.f32 %v4969_v58, %v4967_v47 }
 0x533   : > { %3412 = vpow2.f32 %v2153_v8 }
 0x534   : > { %v4975_v53 = vpop.eup %3402  ;;  %v2155_v16 = vmul.f32 1.442695, %v2073_v39  ;;  %v2157_v23 = vmul.f32 1.442695, %v2074_v26  ;;  %2263 = vadd.xlane.f32.xlu0 %v2262_v49 }
 0x535   : > { %v4977_v24 = vpop.eup %3404  ;;  %v1991_v22 = vpop.xlane.xlu1 %1990 }
 0x536   : > { %3414 = vpow2.f32 %v2155_v16  ;;  %v2075_v61 = vsub.f32 %v4744_v63, %v1991_v22  ;;  %v2076_v48 = vsub.f32 %v4747_v25, %v1991_v22  ;;  %v2265_v33 = vadd.f32 %v4977_v24, %v4975_v53 }
 0x537   : > { %3416 = vpow2.f32 %v2157_v23 }
 0x538   : > { %v4983_v5 = vpop.eup %3406  ;;  %v2159_v28 = vmul.f32 1.442695, %v2075_v61  ;;  %v2161_v41 = vmul.f32 1.442695, %v2076_v48  ;;  %2266 = vadd.xlane.f32.xlu1 %v2265_v33 }
 0x539   : > { %v4985_v21 = vpop.eup %3408  ;;  %v1994_v3 = vpop.xlane.xlu0 %1993 }
 0x53a   : > { %3418 = vpow2.f32 %v2159_v28  ;;  %v2077_v36 = vsub.f32 %v4752_v62, %v1994_v3  ;;  %v2078_v43 = vsub.f32 %v4755_v2, %v1994_v3  ;;  %v2268_v63 = vadd.f32 %v4985_v21, %v4983_v5 }
 0x53b   : > { %3420 = vpow2.f32 %v2161_v41 }
 0x53c   : > { %v4991_v25 = vpop.eup %3410  ;;  %v2163_v38 = vmul.f32 1.442695, %v2077_v36  ;;  %v2165_v8 = vmul.f32 1.442695, %v2078_v43  ;;  %2269 = vadd.xlane.f32.xlu0 %v2268_v63 }
 0x53d   : > { %v4993_v55 = vpop.eup %3412  ;;  %v1997_v39 = vpop.xlane.xlu1 %1996 }
 0x53e   : > { %3422 = vpow2.f32 %v2163_v38  ;;  %v2079_v26 = vsub.f32 %v4760_v7, %v1997_v39  ;;  %v2080_v49 = vsub.f32 %v4763_v11, %v1997_v39  ;;  %v2271_v62 = vadd.f32 %v4993_v55, %v4991_v25 }
 0x53f   : > { %3424 = vpow2.f32 %v2165_v8 }
 0x540   : > { %v4999_v2 = vpop.eup %3414  ;;  %v2167_v16 = vmul.f32 1.442695, %v2079_v26  ;;  %v2169_v23 = vmul.f32 1.442695, %v2080_v49  ;;  %2272 = vadd.xlane.f32.xlu1 %v2271_v62 }
 0x541   : > { %v5001_v22 = vpop.eup %3416  ;;  %v2000_v61 = vpop.xlane.xlu0 %1999 }
 0x542   : > { %3426 = vpow2.f32 %v2167_v16  ;;  %v2081_v48 = vsub.f32 %v4768_v34, %v2000_v61  ;;  %v2082_v33 = vsub.f32 %v4771_v19, %v2000_v61  ;;  %v2274_v7 = vadd.f32 %v5001_v22, %v4999_v2 }
 0x543   : > { %3428 = vpow2.f32 %v2169_v23 }
 0x544   : > { %v5007_v11 = vpop.eup %3418  ;;  %v2171_v28 = vmul.f32 1.442695, %v2081_v48  ;;  %v2173_v41 = vmul.f32 1.442695, %v2082_v33  ;;  %2275 = vadd.xlane.f32.xlu0 %v2274_v7 }
 0x545   : > { %v5009_v3 = vpop.eup %3420  ;;  %v2003_v36 = vpop.xlane.xlu1 %2002 }
 0x546   : > { %3430 = vpow2.f32 %v2171_v28  ;;  %v2083_v43 = vsub.f32 %v4776_v27, %v2003_v36  ;;  %v2084_v63 = vsub.f32 %v4779_v29, %v2003_v36  ;;  %v2277_v34 = vadd.f32 %v5009_v3, %v5007_v11 }
 0x547   : > { %3432 = vpow2.f32 %v2173_v41 }
 0x548   : > { %v5015_v19 = vpop.eup %3422  ;;  %v2175_v38 = vmul.f32 1.442695, %v2083_v43  ;;  %v2177_v8 = vmul.f32 1.442695, %v2084_v63  ;;  %2278 = vadd.xlane.f32.xlu1 %v2277_v34 }
 0x549   : > { %v5017_v39 = vpop.eup %3424  ;;  %v2006_v26 = vpop.xlane.xlu0 %2005 }
 0x54a   : > { %3434 = vpow2.f32 %v2175_v38  ;;  %v2085_v49 = vsub.f32 %v4784_v32, %v2006_v26  ;;  %v2086_v62 = vsub.f32 %v4787_v17, %v2006_v26  ;;  %v2280_v27 = vadd.f32 %v5017_v39, %v5015_v19 }
 0x54b   : > { %3436 = vpow2.f32 %v2177_v8 }
 0x54c   : > { %v5023_v29 = vpop.eup %3426  ;;  %v2179_v16 = vmul.f32 1.442695, %v2085_v49  ;;  %v2181_v23 = vmul.f32 1.442695, %v2086_v62  ;;  %2281 = vadd.xlane.f32.xlu0 %v2280_v27 }
 0x54d   : > { %v5025_v61 = vpop.eup %3428  ;;  %v2009_v48 = vpop.xlane.xlu1 %2008 }
 0x54e   : > { %3438 = vpow2.f32 %v2179_v16  ;;  %v2087_v33 = vsub.f32 %v4792_v45, %v2009_v48  ;;  %v2088_v7 = vsub.f32 %v4795_v51, %v2009_v48  ;;  %v2283_v32 = vadd.f32 %v5025_v61, %v5023_v29 }
 0x54f   : > { %3440 = vpow2.f32 %v2181_v23 }
 0x550   : > { %v5031_v17 = vpop.eup %3430  ;;  %v2183_v28 = vmul.f32 1.442695, %v2087_v33  ;;  %v2185_v41 = vmul.f32 1.442695, %v2088_v7  ;;  %2284 = vadd.xlane.f32.xlu1 %v2283_v32 }
 0x551   : > { %v5033_v36 = vpop.eup %3432  ;;  %v2012_v43 = vpop.xlane.xlu0 %2011 }
 0x552   : > { %3442 = vpow2.f32 %v2183_v28  ;;  %v2089_v63 = vsub.f32 %v4800_v57, %v2012_v43  ;;  %v2090_v34 = vsub.f32 %v4803_v56, %v2012_v43  ;;  %v2286_v45 = vadd.f32 %v5033_v36, %v5031_v17 }
 0x553   : > { %3444 = vpow2.f32 %v2185_v41 }
 0x554   : > { %v5039_v51 = vpop.eup %3434  ;;  %v2187_v38 = vmul.f32 1.442695, %v2089_v63  ;;  %v2189_v8 = vmul.f32 1.442695, %v2090_v34  ;;  %2287 = vadd.xlane.f32.xlu0 %v2286_v45 }
 0x555   : > { %v5041_v26 = vpop.eup %3436  ;;  %v2015_v49 = vpop.xlane.xlu1 %2014 }
 0x556   : > { %3446 = vpow2.f32 %v2187_v38  ;;  %v2091_v62 = vsub.f32 %v4808_v10, %v2015_v49  ;;  %v2092_v27 = vsub.f32 %v4811_v1, %v2015_v49  ;;  %v2289_v57 = vadd.f32 %v5041_v26, %v5039_v51 }
 0x557   : > { %3448 = vpow2.f32 %v2189_v8 }
 0x558   : > { %v5047_v56 = vpop.eup %3438  ;;  %v2191_v16 = vmul.f32 1.442695, %v2091_v62  ;;  %v2193_v23 = vmul.f32 1.442695, %v2092_v27  ;;  %2290 = vadd.xlane.f32.xlu1 %v2289_v57 }
 0x559   : > { %v5049_v48 = vpop.eup %3440  ;;  %v2018_v33 = vpop.xlane.xlu0 %2017 }
 0x55a   : > { %3450 = vpow2.f32 %v2191_v16  ;;  %v2093_v7 = vsub.f32 %v4816_v0, %v2018_v33  ;;  %v2094_v32 = vsub.f32 %v4819_v4, %v2018_v33  ;;  %v2292_v10 = vadd.f32 %v5049_v48, %v5047_v56 }
 0x55b   : > { %3452 = vpow2.f32 %v2193_v23 }
 0x55c   : > { %v5055_v1 = vpop.eup %3442  ;;  %v2195_v28 = vmul.f32 1.442695, %v2093_v7  ;;  %v2197_v41 = vmul.f32 1.442695, %v2094_v32  ;;  %2293 = vadd.xlane.f32.xlu0 %v2292_v10 }
 0x55d   : > { %v5057_v43 = vpop.eup %3444  ;;  %v2021_v63 = vpop.xlane.xlu1 %2020 }
 0x55e   : > { %3454 = vpow2.f32 %v2195_v28  ;;  %v2095_v34 = vsub.f32 %v4824_v14, %v2021_v63  ;;  %v2096_v45 = vsub.f32 %v4827_v20, %v2021_v63  ;;  %v2295_v0 = vadd.f32 %v5057_v43, %v5055_v1 }
 0x55f   : > { %3456 = vpow2.f32 %v2197_v41 }
 0x560   : > { %v5063_v4 = vpop.eup %3446  ;;  %v2199_v38 = vmul.f32 1.442695, %v2095_v34  ;;  %v2201_v8 = vmul.f32 1.442695, %v2096_v45  ;;  %2296 = vadd.xlane.f32.xlu1 %v2295_v0 }
 0x561   : > { %v5065_v49 = vpop.eup %3448  ;;  %v2024_v62 = vpop.xlane.xlu0 %2023 }
 0x562   : > { %3458 = vpow2.f32 %v2199_v38  ;;  %v2097_v27 = vsub.f32 %v4832_v30, %v2024_v62  ;;  %v2098_v57 = vsub.f32 %v4835_v37, %v2024_v62  ;;  %v2298_v14 = vadd.f32 %v5065_v49, %v5063_v4 }
 0x563   : > { %3460 = vpow2.f32 %v2201_v8 }
 0x564   : > { %v5071_v20 = vpop.eup %3450  ;;  %v2203_v16 = vmul.f32 1.442695, %v2097_v27  ;;  %v2205_v23 = vmul.f32 1.442695, %v2098_v57  ;;  %2299 = vadd.xlane.f32.xlu0 %v2298_v14  ;;  %v5439_v14 = vld [vmem:[#allocation11_spill] sm:$0xff] }
 0x565   : > { %v5073_v33 = vpop.eup %3452  ;;  %v2027_v7 = vpop.xlane.xlu1 %2026 }
 0x566   : > { %3462 = vpow2.f32 %v2203_v16  ;;  %v2099_v32 = vsub.f32 %v4840_v42, %v2027_v7  ;;  %v2100_v10 = vsub.f32 %v4843_v60, %v2027_v7  ;;  %v2301_v30 = vadd.f32 %v5073_v33, %v5071_v20 }
 0x567   : > { %3464 = vpow2.f32 %v2205_v23 }
 0x568   : > { %v5079_v37 = vpop.eup %3454  ;;  %v2207_v28 = vmul.f32 1.442695, %v2099_v32  ;;  %v2209_v41 = vmul.f32 1.442695, %v2100_v10  ;;  %2302 = vadd.xlane.f32.xlu1 %v2301_v30  ;;  %v5440_v30 = vld [vmem:[#allocation12_spill] sm:$0xff] }
 0x569   : > { %v5081_v63 = vpop.eup %3456  ;;  %v2030_v34 = vpop.xlane.xlu0 %2029 }
 0x56a   : > { %3466 = vpow2.f32 %v2207_v28  ;;  %v2101_v45 = vsub.f32 %v4848_v59, %v2030_v34  ;;  %v2102_v0 = vsub.f32 %v4851_v18, %v2030_v34  ;;  %v2304_v42 = vadd.f32 %v5081_v63, %v5079_v37 }
 0x56b   : > { %3468 = vpow2.f32 %v2209_v41  ;;  %v5441_v41 = vld [vmem:[#allocation13_spill] sm:$0xff] }
 0x56c   : > { %v5087_v60 = vpop.eup %3458  ;;  %v2211_v38 = vmul.f32 1.442695, %v2101_v45  ;;  %v2213_v8 = vmul.f32 1.442695, %v2102_v0  ;;  %2305 = vadd.xlane.f32.xlu0 %v2304_v42 }
 0x56d   : > { %v5089_v62 = vpop.eup %3460  ;;  %v2033_v27 = vpop.xlane.xlu1 %2032 }
 0x56e   : > { %3470 = vpow2.f32 %v2211_v38  ;;  %v2103_v57 = vsub.f32 %v4856_v12, %v2033_v27  ;;  %v2104_v16 = vsub.f32 %v5439_v14, %v2033_v27  ;;  %v2307_v59 = vadd.f32 %v5089_v62, %v5087_v60  ;;  %v5444_v27 = vld [vmem:[#allocation14_spill] sm:$0xff]  ;;  %v5445_v14 = vld [vmem:[#allocation15_spill] sm:$0xff] }
 0x56f   : > { %3472 = vpow2.f32 %v2213_v8 }
 0x570   : > { %v5095_v18 = vpop.eup %3462  ;;  %v2215_v23 = vmul.f32 1.442695, %v2103_v57  ;;  %v2217_v7 = vmul.f32 1.442695, %v2104_v16  ;;  %2308 = vadd.xlane.f32.xlu1 %v2307_v59 }
 0x571   : > { %v5097_v32 = vpop.eup %3464  ;;  %v2036_v10 = vpop.xlane.xlu0 %2035 }
 0x572   : > { %3474 = vpow2.f32 %v2215_v23  ;;  %v2105_v28 = vsub.f32 %v5440_v30, %v2036_v10  ;;  %v2106_v34 = vsub.f32 %v5441_v41, %v2036_v10  ;;  %v2310_v12 = vadd.f32 %v5097_v32, %v5095_v18  ;;  %v5448_v41 = vld [vmem:[#allocation16_spill] sm:$0xff] }
 0x573   : > { %3476 = vpow2.f32 %v2217_v7 }
 0x574   : > { %v5103_v45 = vpop.eup %3466  ;;  %v2219_v0 = vmul.f32 1.442695, %v2105_v28  ;;  %v2221_v42 = vmul.f32 1.442695, %v2106_v34  ;;  %2311 = vadd.xlane.f32.xlu0 %v2310_v12  ;;  %v5449_v12 = vld [vmem:[#allocation17_spill] sm:$0xff] }
 0x575   : > { %5442 = vst [vmem:[#allocation11_spill] sm:$0xff] %v5103_v45  ;;  %v5105_v38 = vpop.eup %3468  ;;  %v2039_v8 = vpop.xlane.xlu1 %2038 }
 0x576   : > { %5443 = vst [vmem:[#allocation12_spill] sm:$0xff] %v5105_v38  ;;  %3478 = vpow2.f32 %v2219_v0  ;;  %v2107_v57 = vsub.f32 %v5444_v27, %v2039_v8  ;;  %v2108_v16 = vsub.f32 %v5445_v14, %v2039_v8  ;;  %v2313_v59 = vadd.f32 %v5105_v38, %v5103_v45 }
 0x577   : > { %3480 = vpow2.f32 %v2221_v42 }
 0x578   : > { %v5111_v23 = vpop.eup %3470  ;;  %v2223_v7 = vmul.f32 1.442695, %v2107_v57  ;;  %v2225_v10 = vmul.f32 1.442695, %v2108_v16  ;;  %2314 = vadd.xlane.f32.xlu1 %v2313_v59  ;;  %v5451_v59 = vld [vmem:[#allocation18_spill] sm:$0xff] }
 0x579   : > { %5446 = vst [vmem:[#allocation13_spill] sm:$0xff] %v5111_v23  ;;  %v5113_v30 = vpop.eup %3472  ;;  %v2042_v28 = vpop.xlane.xlu0 %2041 }
 0x57a   : > { %5447 = vst [vmem:[#allocation14_spill] sm:$0xff] %v5113_v30  ;;  %3482 = vpow2.f32 %v2223_v7  ;;  %v2109_v34 = vsub.f32 %v5448_v41, %v2042_v28  ;;  %v2110_v0 = vsub.f32 %v5449_v12, %v2042_v28  ;;  %v2316_v8 = vadd.f32 %v5113_v30, %v5111_v23  ;;  %v5452_v7 = vld [vmem:[#allocation19_spill] sm:$0xff] }
 0x57b   : > { %3484 = vpow2.f32 %v2225_v10 }
 0x57c   : > { %v5119_v27 = vpop.eup %3474  ;;  %v2227_v42 = vmul.f32 1.442695, %v2109_v34  ;;  %v2229_v14 = vmul.f32 1.442695, %v2110_v0  ;;  %2317 = vadd.xlane.f32.xlu0 %v2316_v8  ;;  %v5454_v8 = vld [vmem:[#allocation20_spill] sm:$0xff] }
 0x57d   : > { %v5121_v57 = vpop.eup %3476  ;;  %v2045_v16 = vpop.xlane.xlu1 %2044 }
 0x57e   : > { %5450 = vst [vmem:[#allocation15_spill] sm:$0xff] %v5121_v57  ;;  %3486 = vpow2.f32 %v2227_v42  ;;  %v2111_v38 = vsub.f32 %v5451_v59, %v2045_v16  ;;  %v2112_v45 = vsub.f32 %v5452_v7, %v2045_v16  ;;  %v2319_v28 = vadd.f32 %v5121_v57, %v5119_v27  ;;  %v5455_v42 = vld [vmem:[#allocation21_spill] sm:$0xff] }
 0x57f   : > { %3488 = vpow2.f32 %v2229_v14 }
 0x580   : > { %v5127_v41 = vpop.eup %3478  ;;  %v2231_v10 = vmul.f32 1.442695, %v2111_v38  ;;  %v2233_v12 = vmul.f32 1.442695, %v2112_v45  ;;  %2320 = vadd.xlane.f32.xlu1 %v2319_v28 }
 0x581   : > { %v5129_v34 = vpop.eup %3480  ;;  %v2048_v0 = vpop.xlane.xlu0 %2047 }
 0x582   : > { %5453 = vst [vmem:[#allocation16_spill] sm:$0xff] %v5129_v34  ;;  %3490 = vpow2.f32 %v2231_v10  ;;  %v2113_v30 = vsub.f32 %v5454_v8, %v2048_v0  ;;  %v2114_v23 = vsub.f32 %v5455_v42, %v2048_v0  ;;  %v2322_v16 = vadd.f32 %v5129_v34, %v5127_v41  ;;  %v5456_v10 = vld [vmem:[#allocation22_spill] sm:$0xff] }
 0x583   : > { %3492 = vpow2.f32 %v2233_v12 }
 0x584   : > { %v5135_v59 = vpop.eup %3482  ;;  %v2235_v14 = vmul.f32 1.442695, %v2113_v30  ;;  %v2237_v7 = vmul.f32 1.442695, %v2114_v23  ;;  %2323 = vadd.xlane.f32.xlu0 %v2322_v16 }
 0x585   : > { %v5137_v38 = vpop.eup %3484  ;;  %v2051_v45 = vpop.xlane.xlu1 %2050 }
 0x586   : > { %3494 = vpow2.f32 %v2235_v14  ;;  %v2115_v28 = vsub.f32 %v4904_v52, %v2051_v45  ;;  %v2116_v57 = vsub.f32 %v5456_v10, %v2051_v45  ;;  %v2325_v0 = vadd.f32 %v5137_v38, %v5135_v59  ;;  %v5457_v14 = vld [vmem:[#allocation23_spill] sm:$0xff] }
 0x587   : > { %3496 = vpow2.f32 %v2237_v7 }
 0x588   : > { %v5143_v8 = vpop.eup %3486  ;;  %v2239_v12 = vmul.f32 1.442695, %v2115_v28  ;;  %v2241_v42 = vmul.f32 1.442695, %v2116_v57  ;;  %2326 = vadd.xlane.f32.xlu1 %v2325_v0 }
 0x589   : > { %v5145_v30 = vpop.eup %3488  ;;  %v2054_v23 = vpop.xlane.xlu0 %2053 }
 0x58a   : > { %3498 = vpow2.f32 %v2239_v12  ;;  %v2117_v16 = vsub.f32 %v4912_v13, %v2054_v23  ;;  %v2118_v34 = vsub.f32 %v5457_v14, %v2054_v23  ;;  %v2328_v52 = vadd.f32 %v5145_v30, %v5143_v8 }
 0x58b   : > { %3500 = vpow2.f32 %v2241_v42 }
 0x58c   : > { %v5151_v45 = vpop.eup %3490  ;;  %v2243_v7 = vmul.f32 1.442695, %v2117_v16  ;;  %v2245_v10 = vmul.f32 1.442695, %v2118_v34  ;;  %2329 = vadd.xlane.f32.xlu0 %v2328_v52 }
 0x58d   : > { %v5153_v28 = vpop.eup %3492 }
 0x58e   : > { %3502 = vpow2.f32 %v2243_v7  ;;  %v2331_v57 = vadd.f32 %v5153_v28, %v5151_v45 }
 0x58f   : > { %3504 = vpow2.f32 %v2245_v10 }
 0x590   : > { %v5157_v0 = vpop.eup %3494  ;;  %2332 = vadd.xlane.f32.xlu1 %v2331_v57 }
 0x591   : > { %v5159_v13 = vpop.eup %3496 }
 0x592   : > { %v2334_v12 = vadd.f32 %v5159_v13, %v5157_v0 }
 0x594   : > { %v5163_v42 = vpop.eup %3498  ;;  %2335 = vadd.xlane.f32.xlu0 %v2334_v12 }
 0x595   : > { %5458 = vst [vmem:[#allocation17_spill] sm:$0xff] %v5163_v42  ;;  %v5165_v34 = vpop.eup %3500 }
 0x596   : > { %5459 = vst [vmem:[#allocation18_spill] sm:$0xff] %v5165_v34  ;;  %v2337_v23 = vadd.f32 %v5165_v34, %v5163_v42 }
 0x598   : > { %v5169_v16 = vpop.eup %3502  ;;  %2338 = vadd.xlane.f32.xlu1 %v2337_v23 }
 0x599   : > { %v5171_v14 = vpop.eup %3504 }
 0x59a   : > { %v2340_v52 = vadd.f32 %v5171_v14, %v5169_v16 }
 0x59c   : > { %2341 = vadd.xlane.f32.xlu0 %v2340_v52 }
 0x5ad   : > { %v2249_v7 = vpop.xlane.xlu1 %2248 }
 0x5ae   : > { %3506 = vrcp.f32 %v2249_v7 }
 0x5b1   : > { %v2252_v10 = vpop.xlane.xlu0 %2251 }
 0x5b2   : > { %3508 = vrcp.f32 %v2252_v10 }
 0x5b5   : > { %v2255_v57 = vpop.xlane.xlu1 %2254 }
 0x5b6   : > { %3510 = vrcp.f32 %v2255_v57 }
 0x5b8   : > { %v3507_v12 = vpop.eup %3506 }
 0x5b9   : > { %v2375_v34 = vmul.f32 %v3507_v12, %v4927_v15  ;;  %v2376_v23 = vmul.f32 %v3507_v12, %v4929_v46  ;;  %v2258_v42 = vpop.xlane.xlu0 %2257 }
 0x5ba   : > { %3512 = vrcp.f32 %v2258_v42 }
 0x5bb   : > { %2439 = vst [vmem:[%s5181_s24] sm:$0xff] %v2375_v34  ;;  %2440 = vst [vmem:[%s5181_s24 + $0x8] sm:$0xff] %v2376_v23 }
 0x5bc   : > { %v3509_v15 = vpop.eup %3508 }
 0x5bd   : > { %v2377_v46 = vmul.f32 %v3509_v15, %v4935_v50  ;;  %v2378_v42 = vmul.f32 %v3509_v15, %v4937_v31  ;;  %v2261_v52 = vpop.xlane.xlu1 %2260 }
 0x5be   : > { %3613 = shalt.err (!%p3610_p3)
}
 0x5bf   : > { %s3614_s16 = scalar_lea.hbm %s5188_s20, 4096  ;;  %s3618_s12 = scalar_lea.hbm %s5398_s8, 16384 }
 0x5c0   : > { %p3615_p4 = scmp.ne.s32.totalorder %s5188_s20, %s3614_s16  ;;  %p3619_p2 = scmp.lt.u32.totalorder %s5188_s20, %s5398_s8 }
 0x5c1   : > { %p3620_p7 = scmp.lt.u32.totalorder %s3618_s12, %s3614_s16  ;;  %p3622_p10 = scmp.lt.u32.totalorder %s3614_s16, %s5188_s20 }
 0x5c2   : > { %p3616_p5 = pnand %p3615_p4, %p5460_p11 }
 0x5c3   : > { %p3621_p6 = por %p3620_p7, %p3619_p2 }
 0x5c4   : > { %p3617_p0 = pneg %p3616_p5 }
 0x5c5   : > { %p3623_p12 = por %p3622_p10, %p3621_p6 }
 0x5c7   : > { %p3624_p8 = pnand %p3623_p12, %p3617_p0 }
 0x5c9   : > { %3627 = shalt.err (!%p3624_p8)
}
 0x5ca   : > { %s3707_s25 = smov 128   ;;  %s3708_s10 = smov 8   ;;  %3514 = vrcp.f32 %v2261_v52  ;;  %2441 = vst [vmem:[%s5181_s24 + $0x10] sm:$0xff] %v2377_v46  ;;  %2442 = vst [vmem:[%s5181_s24 + $0x18] sm:$0xff] %v2378_v42  ;;  %v3511_v50 = vpop.eup %3510  ;;  %v2264_v7 = vpop.xlane.xlu0 %2263 }
 0x5cb   : > { %3129 = dma.vmem_to_hbm [thread:$0]  (%p5460_p11), %s5190_s19, 4096, %s5188_s20, %s2541_s23, %s3707_s25, %s3707_s25, %s3708_s10   ;;  %v2379_v31 = vmul.f32 %v3511_v50, %v4943_v9  ;;  %v2380_v34 = vmul.f32 %v3511_v50, %v4945_v6  ;;  %3516 = vrcp.f32 %v2264_v7  ;;  %v3513_v10 = vpop.eup %3512  ;;  %v2267_v23 = vpop.xlane.xlu1 %2266 }
 0x5cc   : > { %v2381_v57 = vmul.f32 %v3513_v10, %v4951_v35  ;;  %v2382_v12 = vmul.f32 %v3513_v10, %v4953_v40  ;;  %3518 = vrcp.f32 %v2267_v23  ;;  %s2748_s19 = sshll.u32 %s3778_s9, 13  ;;  %s2555_s20 = sshll.u32 %s5181_s24, 4  ;;  %s5343_s20 = int_to_ptr.vmem [resolvable:$true] %s2555_s20 }
 0x5cd   : > { %2443 = vst [vmem:[%s5181_s24 + $0x20] sm:$0xff] %v2379_v31  ;;  %2444 = vst [vmem:[%s5181_s24 + $0x28] sm:$0xff] %v2380_v34  ;;  %s5341_s21 = scalar_lea.hbm %s5397_s7, %s2748_s19  ;;  %s2536_s9 = scalar_lea.sflag [#allocation4], %s3860_s22 }
 0x5ce   : > { %2445 = vst [vmem:[%s5181_s24 + $0x30] sm:$0xff] %v2381_v57  ;;  %2446 = vst [vmem:[%s5181_s24 + $0x38] sm:$0xff] %v2382_v12  ;;  %v2270_v46 = vpop.xlane.xlu0 %2269  ;;  %s3628_s26 = scalar_lea.vmem %s5343_s20, 8192  ;;  %s3709_s12 = smov [#allocation5]  }
 0x5cf   : > { %3520 = vrcp.f32 %v2270_v46  ;;  %v2273_v52 = vpop.xlane.xlu1 %2272  ;;  %p3629_p9 = scmp.ne.s32.totalorder %s5343_s20, %s3628_s26  ;;  %s3632_s13 = sshll.u32 %s3709_s12, 4  ;;  %s3633_s13 = int_to_ptr.vmem [resolvable:$false] %s3632_s13 }
 0x5d0   : > { %3522 = vrcp.f32 %v2273_v52  ;;  %s3634_s15 = scalar_lea.vmem %s3633_s13, 16384  ;;  %p3635_p3 = scmp.lt.s32.totalorder %s5343_s20, %s3633_s13 }
 0x5d1   : > { %p3630_p13 = pnand %p3629_p9, %p5460_p11  ;;  %p3636_p4 = scmp.lt.s32.totalorder %s3634_s15, %s3628_s26 }
 0x5d2   : > { %v2276_v31 = vpop.xlane.xlu0 %2275 }
 0x5d3   : > { %3524 = vrcp.f32 %v2276_v31  ;;  %p3631_p1 = pneg %p3630_p13  ;;  %p3637_p5 = por %p3636_p4, %p3635_p3 }
 0x5d4   : > { %v3515_v9 = vpop.eup %3514 }
 0x5d5   : > { %v2383_v6 = vmul.f32 %v3515_v9, %v4959_v54  ;;  %v2384_v15 = vmul.f32 %v3515_v9, %v4961_v44  ;;  %v3517_v35 = vpop.eup %3516  ;;  %v2279_v7 = vpop.xlane.xlu1 %2278  ;;  %p3638_p0 = pnand %p3637_p5, %p3631_p1 }
 0x5d6   : > { %v2385_v40 = vmul.f32 %v3517_v35, %v4967_v47  ;;  %v2386_v42 = vmul.f32 %v3517_v35, %v4969_v58  ;;  %v3519_v54 = vpop.eup %3518  ;;  %3526 = vrcp.f32 %v2279_v7 }
 0x5d7   : > { %2447 = vst [vmem:[%s5181_s24 + $0x40] sm:$0xff] %v2383_v6  ;;  %2448 = vst [vmem:[%s5181_s24 + $0x48] sm:$0xff] %v2384_v15  ;;  %v2387_v44 = vmul.f32 %v3519_v54, %v4975_v53  ;;  %v2388_v50 = vmul.f32 %v3519_v54, %v4977_v24 }
 0x5d8   : > { %2449 = vst [vmem:[%s5181_s24 + $0x50] sm:$0xff] %v2385_v40  ;;  %2450 = vst [vmem:[%s5181_s24 + $0x58] sm:$0xff] %v2386_v42 }
 0x5d9   : > { %2451 = vst [vmem:[%s5181_s24 + $0x60] sm:$0xff] %v2387_v44  ;;  %2452 = vst [vmem:[%s5181_s24 + $0x68] sm:$0xff] %v2388_v50  ;;  %v3521_v47 = vpop.eup %3520  ;;  %v2282_v57 = vpop.xlane.xlu0 %2281 }
 0x5da   : > { %v2389_v58 = vmul.f32 %v3521_v47, %v4983_v5  ;;  %v2390_v34 = vmul.f32 %v3521_v47, %v4985_v21  ;;  %v3523_v53 = vpop.eup %3522  ;;  %3528 = vrcp.f32 %v2282_v57 }
 0x5db   : > { %v2391_v24 = vmul.f32 %v3523_v53, %v4991_v25  ;;  %v2392_v10 = vmul.f32 %v3523_v53, %v4993_v55 }
 0x5dc   : > { %2453 = vst [vmem:[%s5181_s24 + $0x70] sm:$0xff] %v2389_v58  ;;  %2454 = vst [vmem:[%s5181_s24 + $0x78] sm:$0xff] %v2390_v34 }
 0x5dd   : > { %2455 = vst [vmem:[%s5181_s24 + $0x80] sm:$0xff] %v2391_v24  ;;  %2456 = vst [vmem:[%s5181_s24 + $0x88] sm:$0xff] %v2392_v10  ;;  %v3525_v5 = vpop.eup %3524  ;;  %v2285_v23 = vpop.xlane.xlu1 %2284 }
 0x5de   : > { %v2393_v21 = vmul.f32 %v3525_v5, %v4999_v2  ;;  %v2394_v12 = vmul.f32 %v3525_v5, %v5001_v22  ;;  %3530 = vrcp.f32 %v2285_v23 }
 0x5e0   : > { %2457 = vst [vmem:[%s5181_s24 + $0x90] sm:$0xff] %v2393_v21  ;;  %2458 = vst [vmem:[%s5181_s24 + $0x98] sm:$0xff] %v2394_v12  ;;  %v3527_v25 = vpop.eup %3526 }
 0x5e1   : > { %v2395_v55 = vmul.f32 %v3527_v25, %v5007_v11  ;;  %v2396_v9 = vmul.f32 %v3527_v25, %v5009_v3  ;;  %v2288_v6 = vpop.xlane.xlu0 %2287  ;;  %v5461_v25 = vld [vmem:[#allocation11_spill] sm:$0xff] }
 0x5e2   : > { %3532 = vrcp.f32 %v2288_v6 }
 0x5e3   : > { %2459 = vst [vmem:[%s5181_s24 + $0xa0] sm:$0xff] %v2395_v55  ;;  %2460 = vst [vmem:[%s5181_s24 + $0xa8] sm:$0xff] %v2396_v9  ;;  %v5462_v55 = vld [vmem:[#allocation12_spill] sm:$0xff] }
 0x5e4   : > { %v3529_v2 = vpop.eup %3528 }
 0x5e5   : > { %v2397_v22 = vmul.f32 %v3529_v2, %v5015_v19  ;;  %v2398_v15 = vmul.f32 %v3529_v2, %v5017_v39  ;;  %v2291_v46 = vpop.xlane.xlu1 %2290  ;;  %v5463_v2 = vld [vmem:[#allocation13_spill] sm:$0xff] }
 0x5e6   : > { %3534 = vrcp.f32 %v2291_v46 }
 0x5e7   : > { %2461 = vst [vmem:[%s5181_s24 + $0xb0] sm:$0xff] %v2397_v22  ;;  %2462 = vst [vmem:[%s5181_s24 + $0xb8] sm:$0xff] %v2398_v15  ;;  %v5464_v22 = vld [vmem:[#allocation14_spill] sm:$0xff] }
 0x5e8   : > { %v3531_v11 = vpop.eup %3530 }
 0x5e9   : > { %v2399_v3 = vmul.f32 %v3531_v11, %v5023_v29  ;;  %v2400_v35 = vmul.f32 %v3531_v11, %v5025_v61  ;;  %v2294_v40 = vpop.xlane.xlu0 %2293 }
 0x5ea   : > { %3536 = vrcp.f32 %v2294_v40 }
 0x5eb   : > { %2463 = vst [vmem:[%s5181_s24 + $0xc0] sm:$0xff] %v2399_v3  ;;  %2464 = vst [vmem:[%s5181_s24 + $0xc8] sm:$0xff] %v2400_v35  ;;  %v5465_v35 = vld [vmem:[#allocation15_spill] sm:$0xff] }
 0x5ec   : > { %v3533_v19 = vpop.eup %3532 }
 0x5ed   : > { %v2401_v39 = vmul.f32 %v3533_v19, %v5031_v17  ;;  %v2402_v42 = vmul.f32 %v3533_v19, %v5033_v36  ;;  %v2297_v52 = vpop.xlane.xlu1 %2296 }
 0x5ee   : > { %3538 = vrcp.f32 %v2297_v52  ;;  %v5466_v52 = vld [vmem:[#allocation16_spill] sm:$0xff] }
 0x5ef   : > { %2465 = vst [vmem:[%s5181_s24 + $0xd0] sm:$0xff] %v2401_v39  ;;  %2466 = vst [vmem:[%s5181_s24 + $0xd8] sm:$0xff] %v2402_v42 }
 0x5f0   : > { %v3535_v29 = vpop.eup %3534 }
 0x5f1   : > { %v2403_v61 = vmul.f32 %v3535_v29, %v5039_v51  ;;  %v2404_v54 = vmul.f32 %v3535_v29, %v5041_v26  ;;  %v2300_v44 = vpop.xlane.xlu0 %2299 }
 0x5f2   : > { %3540 = vrcp.f32 %v2300_v44 }
 0x5f3   : > { %2467 = vst [vmem:[%s5181_s24 + $0xe0] sm:$0xff] %v2403_v61  ;;  %2468 = vst [vmem:[%s5181_s24 + $0xe8] sm:$0xff] %v2404_v54 }
 0x5f4   : > { %v3537_v17 = vpop.eup %3536 }
 0x5f5   : > { %v2405_v36 = vmul.f32 %v3537_v17, %v5047_v56  ;;  %v2406_v50 = vmul.f32 %v3537_v17, %v5049_v48  ;;  %v2303_v31 = vpop.xlane.xlu1 %2302 }
 0x5f6   : > { %3542 = vrcp.f32 %v2303_v31 }
 0x5f7   : > { %2469 = vst [vmem:[%s5181_s24 + $0xf0] sm:$0xff] %v2405_v36  ;;  %2470 = vst [vmem:[%s5181_s24 + $0xf8] sm:$0xff] %v2406_v50 }
 0x5f8   : > { %v3539_v51 = vpop.eup %3538 }
 0x5f9   : > { %v2407_v26 = vmul.f32 %v3539_v51, %v5055_v1  ;;  %v2408_v47 = vmul.f32 %v3539_v51, %v5057_v43  ;;  %v2306_v58 = vpop.xlane.xlu0 %2305 }
 0x5fa   : > { %3544 = vrcp.f32 %v2306_v58 }
 0x5fb   : > { %2471 = vst [vmem:[%s5181_s24 + $0x100] sm:$0xff] %v2407_v26  ;;  %2472 = vst [vmem:[%s5181_s24 + $0x108] sm:$0xff] %v2408_v47 }
 0x5fc   : > { %v3541_v56 = vpop.eup %3540 }
 0x5fd   : > { %v2409_v48 = vmul.f32 %v3541_v56, %v5063_v4  ;;  %v2410_v34 = vmul.f32 %v3541_v56, %v5065_v49  ;;  %v2309_v7 = vpop.xlane.xlu1 %2308 }
 0x5fe   : > { %3546 = vrcp.f32 %v2309_v7 }
 0x5ff   : > { %2473 = vst [vmem:[%s5181_s24 + $0x110] sm:$0xff] %v2409_v48  ;;  %2474 = vst [vmem:[%s5181_s24 + $0x118] sm:$0xff] %v2410_v34  ;;  %v5468_v48 = vld [vmem:[#allocation18_spill] sm:$0xff] }
 0x600   : > { %v3543_v1 = vpop.eup %3542 }
 0x601   : > { %v2411_v43 = vmul.f32 %v3543_v1, %v5071_v20  ;;  %v2412_v53 = vmul.f32 %v3543_v1, %v5073_v33  ;;  %v2312_v24 = vpop.xlane.xlu0 %2311 }
 0x602   : > { %3548 = vrcp.f32 %v2312_v24 }
 0x603   : > { %2475 = vst [vmem:[%s5181_s24 + $0x120] sm:$0xff] %v2411_v43  ;;  %2476 = vst [vmem:[%s5181_s24 + $0x128] sm:$0xff] %v2412_v53 }
 0x604   : > { %v3545_v4 = vpop.eup %3544 }
 0x605   : > { %v2413_v49 = vmul.f32 %v3545_v4, %v5079_v37  ;;  %v2414_v10 = vmul.f32 %v3545_v4, %v5081_v63  ;;  %v2315_v57 = vpop.xlane.xlu1 %2314 }
 0x606   : > { %3550 = vrcp.f32 %v2315_v57 }
 0x607   : > { %2477 = vst [vmem:[%s5181_s24 + $0x130] sm:$0xff] %v2413_v49  ;;  %2478 = vst [vmem:[%s5181_s24 + $0x138] sm:$0xff] %v2414_v10 }
 0x608   : > { %v3547_v20 = vpop.eup %3546 }
 0x609   : > { %v2415_v33 = vmul.f32 %v3547_v20, %v5087_v60  ;;  %v2416_v5 = vmul.f32 %v3547_v20, %v5089_v62  ;;  %v2318_v21 = vpop.xlane.xlu0 %2317 }
 0x60a   : > { %3552 = vrcp.f32 %v2318_v21 }
 0x60b   : > { %2479 = vst [vmem:[%s5181_s24 + $0x140] sm:$0xff] %v2415_v33  ;;  %2480 = vst [vmem:[%s5181_s24 + $0x148] sm:$0xff] %v2416_v5 }
 0x60c   : > { %v3549_v37 = vpop.eup %3548 }
 0x60d   : > { %v2417_v63 = vmul.f32 %v3549_v37, %v5095_v18  ;;  %v2418_v12 = vmul.f32 %v3549_v37, %v5097_v32  ;;  %v2321_v23 = vpop.xlane.xlu1 %2320 }
 0x60e   : > { %3554 = vrcp.f32 %v2321_v23 }
 0x60f   : > { %2481 = vst [vmem:[%s5181_s24 + $0x150] sm:$0xff] %v2417_v63  ;;  %2482 = vst [vmem:[%s5181_s24 + $0x158] sm:$0xff] %v2418_v12 }
 0x610   : > { %v3551_v60 = vpop.eup %3550 }
 0x611   : > { %v2419_v62 = vmul.f32 %v3551_v60, %v5461_v25  ;;  %v2420_v9 = vmul.f32 %v3551_v60, %v5462_v55  ;;  %v2324_v6 = vpop.xlane.xlu0 %2323 }
 0x612   : > { %3556 = vrcp.f32 %v2324_v6 }
 0x613   : > { %2483 = vst [vmem:[%s5181_s24 + $0x160] sm:$0xff] %v2419_v62  ;;  %2484 = vst [vmem:[%s5181_s24 + $0x168] sm:$0xff] %v2420_v9 }
 0x614   : > { %v3553_v18 = vpop.eup %3552 }
 0x615   : > { %v2421_v32 = vmul.f32 %v3553_v18, %v5463_v2  ;;  %v2422_v15 = vmul.f32 %v3553_v18, %v5464_v22  ;;  %v2327_v46 = vpop.xlane.xlu1 %2326 }
 0x616   : > { %3558 = vrcp.f32 %v2327_v46 }
 0x617   : > { %2485 = vst [vmem:[%s5181_s24 + $0x170] sm:$0xff] %v2421_v32  ;;  %2486 = vst [vmem:[%s5181_s24 + $0x178] sm:$0xff] %v2422_v15 }
 0x618   : > { %v3555_v11 = vpop.eup %3554 }
 0x619   : > { %v2423_v3 = vmul.f32 %v3555_v11, %v5119_v27  ;;  %v2424_v40 = vmul.f32 %v3555_v11, %v5465_v35  ;;  %v2330_v19 = vpop.xlane.xlu0 %2329 }
 0x61a   : > { %3560 = vrcp.f32 %v2330_v19 }
 0x61b   : > { %2487 = vst [vmem:[%s5181_s24 + $0x180] sm:$0xff] %v2423_v3  ;;  %2488 = vst [vmem:[%s5181_s24 + $0x188] sm:$0xff] %v2424_v40 }
 0x61c   : > { %v3557_v39 = vpop.eup %3556 }
 0x61d   : > { %v2425_v42 = vmul.f32 %v3557_v39, %v5127_v41  ;;  %v2426_v29 = vmul.f32 %v3557_v39, %v5466_v52  ;;  %v2333_v61 = vpop.xlane.xlu1 %2332 }
 0x61e   : > { %3562 = vrcp.f32 %v2333_v61 }
 0x61f   : > { %2489 = vst [vmem:[%s5181_s24 + $0x190] sm:$0xff] %v2425_v42  ;;  %2490 = vst [vmem:[%s5181_s24 + $0x198] sm:$0xff] %v2426_v29 }
 0x620   : > { %v3559_v27 = vpop.eup %3558 }
 0x621   : > { %v2427_v54 = vmul.f32 %v3559_v27, %v5135_v59  ;;  %v2428_v44 = vmul.f32 %v3559_v27, %v5137_v38  ;;  %v2336_v17 = vpop.xlane.xlu0 %2335 }
 0x622   : > { %3564 = vrcp.f32 %v2336_v17 }
 0x623   : > { %2491 = vst [vmem:[%s5181_s24 + $0x1a0] sm:$0xff] %v2427_v54  ;;  %2492 = vst [vmem:[%s5181_s24 + $0x1a8] sm:$0xff] %v2428_v44 }
 0x624   : > { %v3561_v41 = vpop.eup %3560 }
 0x625   : > { %v2429_v36 = vmul.f32 %v3561_v41, %v5143_v8  ;;  %v2430_v50 = vmul.f32 %v3561_v41, %v5145_v30  ;;  %v2339_v31 = vpop.xlane.xlu1 %2338 }
 0x626   : > { %3566 = vrcp.f32 %v2339_v31 }
 0x627   : > { %2493 = vst [vmem:[%s5181_s24 + $0x1b0] sm:$0xff] %v2429_v36  ;;  %2494 = vst [vmem:[%s5181_s24 + $0x1b8] sm:$0xff] %v2430_v50 }
 0x628   : > { %v3563_v59 = vpop.eup %3562 }
 0x629   : > { %v2431_v38 = vmul.f32 %v3563_v59, %v5151_v45  ;;  %v2432_v51 = vmul.f32 %v3563_v59, %v5153_v28  ;;  %v2342_v26 = vpop.xlane.xlu0 %2341  ;;  %v5467_v45 = vld [vmem:[#allocation17_spill] sm:$0xff] }
 0x62a   : > { %3568 = vrcp.f32 %v2342_v26 }
 0x62b   : > { %2495 = vst [vmem:[%s5181_s24 + $0x1c0] sm:$0xff] %v2431_v38  ;;  %2496 = vst [vmem:[%s5181_s24 + $0x1c8] sm:$0xff] %v2432_v51 }
 0x62c   : > { %v3565_v8 = vpop.eup %3564 }
 0x62d   : > { %v2433_v30 = vmul.f32 %v3565_v8, %v5157_v0  ;;  %v2434_v47 = vmul.f32 %v3565_v8, %v5159_v13 }
 0x62f   : > { %2497 = vst [vmem:[%s5181_s24 + $0x1d0] sm:$0xff] %v2433_v30  ;;  %2498 = vst [vmem:[%s5181_s24 + $0x1d8] sm:$0xff] %v2434_v47 }
 0x630   : > { %v3567_v58 = vpop.eup %3566 }
 0x631   : > { %v2435_v56 = vmul.f32 %v3567_v58, %v5467_v45  ;;  %v2436_v28 = vmul.f32 %v3567_v58, %v5468_v48 }
 0x633   : > { %2499 = vst [vmem:[%s5181_s24 + $0x1e0] sm:$0xff] %v2435_v56  ;;  %2500 = vst [vmem:[%s5181_s24 + $0x1e8] sm:$0xff] %v2436_v28 }
 0x634   : > { %v3569_v34 = vpop.eup %3568 }
 0x635   : > { %v2437_v0 = vmul.f32 %v3569_v34, %v5169_v16  ;;  %v2438_v13 = vmul.f32 %v3569_v34, %v5171_v14 }
 0x637   : > { %2501 = vst [vmem:[%s5181_s24 + $0x1f0] sm:$0xff] %v2437_v0  ;;  %2502 = vst [vmem:[%s5181_s24 + $0x1f8] sm:$0xff] %v2438_v13 }
 0x638   : > { %3641 = shalt.err (!%p3638_p0)
}
 0x639   : > { %s3642_s24 = scalar_lea.hbm %s5341_s21, 8192  ;;  %s3646_s19 = scalar_lea.hbm %s5397_s7, 32768 }
 0x63a   : > { %p3643_p2 = scmp.ne.s32.totalorder %s5341_s21, %s3642_s24  ;;  %p3647_p10 = scmp.lt.u32.totalorder %s5341_s21, %s5397_s7 }
 0x63b   : > { %p3648_p12 = scmp.lt.u32.totalorder %s3646_s19, %s3642_s24  ;;  %p3650_p9 = scmp.lt.u32.totalorder %s3642_s24, %s5341_s21 }
 0x63c   : > { %p3644_p7 = pnand %p3643_p2, %p5460_p11 }
 0x63d   : > { %p3649_p8 = por %p3648_p12, %p3647_p10 }
 0x63e   : > { %p3645_p6 = pneg %p3644_p7 }
 0x63f   : > { %p3651_p13 = por %p3650_p9, %p3649_p8 }
 0x641   : > { %p3652_p1 = pnand %p3651_p13, %p3645_p6 }
 0x643   : > { %3655 = shalt.err (!%p3652_p1)
}
 0x644   : > { %s3710_s26 = smov 256   ;;  %s3711_s12 = smov 16  }
 0x645   : > { %3128 = dma.vmem_to_hbm [thread:$0]  (%p5460_p11), %s5343_s20, 8192, %s5341_s21, %s2536_s9, %s3710_s26, %s3710_s26, %s3711_s12  }
 0x646 PF: > { %p3144_p3 = scmp.ge.s32.totalorder %s3698_s30, 2  ;;  %s2586_s13 = sand.u32 1, %s3686_s27  }
 0x647   : > { %p5469_p4 = scmp.ne.s32.totalorder %s5424_s18, 0  ;;  %s2587_s15 = scalar_lea.sflag [#allocation4], %s2586_s13 }
 0x649   : > { %p3137_p5 = pnand %p3144_p3, %p5469_p4 }
 0x64b   : > { %3677 = dma.done.wait (!%p3137_p5), %s2587_s15, 8192  }
 0x64c   : > { %3679 = vsyncadd (!%p3137_p5), %s2587_s15, 4294959104  ;;  %s2596_s24 = scalar_lea.sflag [#allocation7], %s2586_s13 }
 0x64d   : > { %3681 = dma.done.wait (!%p3137_p5), %s2596_s24, 4096  }
 0x64e   : > { %3683 = vsyncadd (!%p3137_p5), %s2596_s24, 4294963200  ;;  %p25_p11 = scmp.ge.s32.totalorder %s3782_s11, 6   ;;  %s5470_s27 = smov %s3690_s28 }
 0x64f   : > { %s5471_s28 = smov %s3694_s29  ;;  %s5472_s29 = smov %s3794_s14 }
 0x650   : > { %s5473_s30 = smov %s3782_s11  ;;  %27 = sbr.rel (!%p25_p11) target bundleno = 7 (0x7), region = 113 }
 0x657   :  { %2601 = vsyncpa [#allocation3], 1 }
 0x658   :  { %2603 = vsyncpa [#allocation3 + $0x1], 1 }
 0x659   :  { %2604 = vsyncpa [#allocation4], 1 }
 0x65a   :  { %2606 = vsyncpa [#allocation4 + $0x1], 1 }
 0x65b   :  { %2607 = vsyncpa [#allocation7], 1 }
 0x65c   :  { %2609 = vsyncpa [#allocation7 + $0x1], 1 }

</bundles_post_ra>
